<compile_context>
chip_gen: v7x
topology: tpu7x:2x2x1
jax: 0.10.0
libtpu: 0.0.40
codegen_flags: <defaults>
</compile_context>

<pallas_src>
import jax
import jax.numpy as jnp
from jax.experimental import pallas as pl
from jax.experimental.pallas import tpu as pltpu

K = 5      # conv kernel size
POOL = 5   # max-pool window / stride
C = 128    # channel width (embedding dim 100 zero-padded to 128)


# -------------------------- fused Pallas kernel --------------------------

def _net_kernel(tok_ref, emb_ref,
                w1_ref, b1_ref, w2_ref, b2_ref, w3_ref, b3_ref,
                lw1_ref, lb1_ref, lw2_ref, lb2_ref,
                o_ref, y1_s, y2_s):
    # tok_ref : (1, L, 1) int32   token ids for this batch row (sublane-major)
    # emb_ref : (Vpad, C) bf16    embedding table (rows >= vocab and cols >= 100 are zero)
    # w*_ref  : (K*C, C) bf16     conv weights, row k*C+ci  ==  torch w[co, ci, k]
    # b*_ref  : (1, C)   f32
    # lw1_ref : (C, C) bf16 ; lw2_ref: (C, C) bf16 (cols >= 20 zero) ; lb* : (1, C) f32
    # o_ref   : (1, 1, C) f32     logits live in cols 0..19
    # y1_s    : (L-K+1, C) f32    VMEM scratch (conv1 output, pooled via strided reads)
    # y2_s    : (P1-K+1, C) f32   VMEM scratch (conv2 output)
    L = tok_ref.shape[1]
    V = emb_ref.shape[0]

    # ---- embedding lookup kept in-kernel: one-hot @ table on the MXU ----
    tok = tok_ref[0]                                               # (L, 1) int32
    vocab = jax.lax.broadcasted_iota(jnp.int32, (L, V), 1)         # (L, V)
    one_hot = jnp.where(vocab == tok, jnp.float32(1.0),
                        jnp.float32(0.0)).astype(jnp.bfloat16)     # (L, V) bf16
    x0 = jnp.dot(one_hot, emb_ref[...],
                 preferred_element_type=jnp.float32).astype(jnp.bfloat16)   # (L, C)

    def conv_relu(x_bf16, w_ref, b_ref):
        # valid-padding conv as K shifted bf16 matmuls, f32 accumulation
        l_out = x_bf16.shape[0] - K + 1
        acc = jnp.dot(x_bf16[0:l_out, :], w_ref[0:C, :],
                      preferred_element_type=jnp.float32)
        for k in range(1, K):
            acc = acc + jnp.dot(x_bf16[k:k + l_out, :],
                                w_ref[k * C:(k + 1) * C, :],
                                preferred_element_type=jnp.float32)
        return jnp.maximum(acc + b_ref[...], 0.0)                  # (l_out, C) f32

    def pool_max(y_ref, p):
        # non-overlapping MaxPool1d(POOL): strided sublane reads from VMEM scratch
        m = y_ref[pl.ds(0, p, stride=POOL), :]
        for i in range(1, POOL):
            m = jnp.maximum(m, y_ref[pl.ds(i, p, stride=POOL), :])
        return m                                                   # (p, C) f32

    # Conv1d(100->128,5) + ReLU + MaxPool1d(5)
    y1_s[...] = conv_relu(x0, w1_ref, b1_ref)
    p1 = pool_max(y1_s, y1_s.shape[0] // POOL)

    # Conv1d(128,128,5) + ReLU + MaxPool1d(5)
    y2_s[...] = conv_relu(p1.astype(jnp.bfloat16), w2_ref, b2_ref)
    p2 = pool_max(y2_s, y2_s.shape[0] // POOL)

    # Conv1d(128,128,5) + ReLU + AdaptiveMaxPool1d(1)
    y3 = conv_relu(p2.astype(jnp.bfloat16), w3_ref, b3_ref)
    g = jnp.max(y3, axis=0, keepdims=True)                         # (1, C) f32

    # Flatten -> Linear(128,128)+ReLU -> Linear(128, 20-padded-to-128)
    h = jnp.dot(g.astype(jnp.bfloat16), lw1_ref[...],
                preferred_element_type=jnp.float32) + lb1_ref[...]
    h = jnp.maximum(h, 0.0)
    o = jnp.dot(h.astype(jnp.bfloat16), lw2_ref[...],
                preferred_element_type=jnp.float32) + lb2_ref[...]
    o_ref[0] = o


# -------------------------- wrapper --------------------------

def net_forward(tokens, params):
    B, L = tokens.shape
    L1 = L - K + 1                  # conv1 output length
    P1 = L1 // POOL                 # pool1 output length
    L2 = P1 - K + 1                 # conv2 output length
    V = params["emb"].shape[0]

    # bf16 copies of matmul operands (f32 master weights kept in params).
    emb = params["emb"].astype(jnp.bfloat16)
    w1 = params["w1"].astype(jnp.bfloat16)
    w2 = params["w2"].astype(jnp.bfloat16)
    w3 = params["w3"].astype(jnp.bfloat16)
    lw1 = params["lw1"].astype(jnp.bfloat16)
    lw2 = params["lw2"].astype(jnp.bfloat16)

    tok3 = tokens.astype(jnp.int32).reshape(B, L, 1)

    out = pl.pallas_call(
        _net_kernel,
        out_shape=jax.ShapeDtypeStruct((B, 1, C), jnp.float32),
        grid=(B,),
        in_specs=[
            pl.BlockSpec((1, L, 1), lambda b: (b, 0, 0)),   # tokens (per batch row)
            pl.BlockSpec((V, C), lambda b: (0, 0)),         # embedding table
            pl.BlockSpec((K * C, C), lambda b: (0, 0)),     # w1
            pl.BlockSpec((1, C), lambda b: (0, 0)),         # b1
            pl.BlockSpec((K * C, C), lambda b: (0, 0)),     # w2
            pl.BlockSpec((1, C), lambda b: (0, 0)),         # b2
            pl.BlockSpec((K * C, C), lambda b: (0, 0)),     # w3
            pl.BlockSpec((1, C), lambda b: (0, 0)),         # b3
            pl.BlockSpec((C, C), lambda b: (0, 0)),         # lw1
            pl.BlockSpec((1, C), lambda b: (0, 0)),         # lb1
            pl.BlockSpec((C, C), lambda b: (0, 0)),         # lw2 (out-padded to 128)
            pl.BlockSpec((1, C), lambda b: (0, 0)),         # lb2 (out-padded to 128)
        ],
        out_specs=pl.BlockSpec((1, 1, C), lambda b: (b, 0, 0)),
        scratch_shapes=[
            pltpu.VMEM((L1, C), jnp.float32),
            pltpu.VMEM((L2, C), jnp.float32),
        ],
        compiler_params=pltpu.CompilerParams(
            dimension_semantics=("parallel",)),               # batch across cores (v7x: 2 TCs)
    )(tok3, emb, w1, params["b1"], w2, params["b2"], w3, params["b3"],
      lw1, params["lb1"], lw2, params["lb2"])

    return out[:, 0, :20]                                     # drop lane padding -> (B, 20)


# -------------------------- pure-JAX f32 reference --------------------------

def _reference(tokens, params):
    x = params["emb"][tokens]                                  # (B, L, C) f32

    def conv_relu(x, w, b):
        lo = x.shape[1] - K + 1
        acc = jnp.zeros((x.shape[0], lo, w.shape[1]), jnp.float32)
        for k in range(K):
            acc = acc + jnp.einsum("blc,co->blo", x[:, k:k + lo, :],
                                   w[k * C:(k + 1) * C, :])
        return jnp.maximum(acc + b, 0.0)

    def pool(x):
        Bn, Ln, Cn = x.shape
        P = Ln // POOL
        return x[:, :P * POOL, :].reshape(Bn, P, POOL, Cn).max(axis=2)

    x = pool(conv_relu(x, params["w1"], params["b1"]))
    x = pool(conv_relu(x, params["w2"], params["b2"]))
    x = conv_relu(x, params["w3"], params["b3"]).max(axis=1)   # (B, C)
    h = jnp.maximum(x @ params["lw1"] + params["lb1"], 0.0)
    o = h @ params["lw2"] + params["lb2"]
    return o[:, :20]


# -------------------------- main --------------------------

if __name__ == "__main__":
    key = jax.random.PRNGKey(0)
    ks = jax.random.split(key, 12)

    VOCAB, EMB_DIM = 50, 100
    V_PAD = 128                       # pad vocab so the one-hot lane dim is 128-dense
    NUM_CLASSES = 20
    B, L = 2, 200                     # L chosen so the conv/pool chain stays valid

    # Embedding table: (VOCAB, 100) zero-padded to (128, 128).
    emb = jax.random.normal(ks[0], (VOCAB, EMB_DIM), jnp.float32) * 0.1
    emb = jnp.pad(emb, ((0, V_PAD - VOCAB), (0, C - EMB_DIM)))

    def conv_w(cin, cout, k_key):
        # torch layout [Cout, Cin, K] -> permute(2,1,0), pad Cin to 128 -> [K*128, Cout]
        w = jax.random.normal(k_key, (cout, cin, K), jnp.float32) * 0.05
        w = jnp.transpose(w, (2, 1, 0))
        w = jnp.pad(w, ((0, 0), (0, C - cin), (0, 0)))
        return w.reshape(K * C, cout)

    def pad_cols(a):
        return jnp.pad(a, ((0, 0), (0, C - a.shape[1])))

    params = {
        "emb": emb,
        "w1": conv_w(100, 128, ks[1]),
        "b1": jax.random.normal(ks[2], (1, C), jnp.float32) * 0.05,
        "w2": conv_w(128, 128, ks[3]),
        "b2": jax.random.normal(ks[4], (1, C), jnp.float32) * 0.05,
        "w3": conv_w(128, 128, ks[5]),
        "b3": jax.random.normal(ks[6], (1, C), jnp.float32) * 0.05,
        "lw1": jax.random.normal(ks[7], (C, C), jnp.float32) * 0.05,     # [in, out]
        "lb1": jax.random.normal(ks[8], (1, C), jnp.float32) * 0.05,
        "lw2": pad_cols(jax.random.normal(ks[9], (C, NUM_CLASSES), jnp.float32) * 0.05),
        "lb2": pad_cols(jnp.zeros((1, NUM_CLASSES), jnp.float32)),
    }

    tokens = jax.random.randint(ks[10], (B, L), 0, VOCAB, dtype=jnp.int32)

    out = jax.jit(net_forward)(tokens, params)
    out = jax.block_until_ready(out)
    assert out.shape == (B, NUM_CLASSES) and out.dtype == jnp.float32

    # Sanity check against the f32 reference (loose tolerance: matmuls run in bf16).
    ref = _reference(tokens, params)
    err = float(jnp.max(jnp.abs(out - ref)))
    assert err < 8e-2, f"max abs err {err}"

    print("KERNEL_OK")
</pallas_src>

<mosaic_0001>
module attributes {stable_mosaic.version = 11 : i64} {
  func.func @_net_kernel(%arg0: i32, %arg1: memref<1x200x1xi32, #tpu.memory_space<vmem>>, %arg2: memref<128x128xbf16, #tpu.memory_space<vmem>>, %arg3: memref<640x128xbf16, #tpu.memory_space<vmem>>, %arg4: memref<1x128xf32, #tpu.memory_space<vmem>>, %arg5: memref<640x128xbf16, #tpu.memory_space<vmem>>, %arg6: memref<1x128xf32, #tpu.memory_space<vmem>>, %arg7: memref<640x128xbf16, #tpu.memory_space<vmem>>, %arg8: memref<1x128xf32, #tpu.memory_space<vmem>>, %arg9: memref<128x128xbf16, #tpu.memory_space<vmem>>, %arg10: memref<1x128xf32, #tpu.memory_space<vmem>>, %arg11: memref<128x128xbf16, #tpu.memory_space<vmem>>, %arg12: memref<1x128xf32, #tpu.memory_space<vmem>>, %arg13: memref<1x1x128xf32, #tpu.memory_space<vmem>>, %arg14: memref<196x128xf32, #tpu.memory_space<vmem>>, %arg15: memref<35x128xf32, #tpu.memory_space<vmem>>) attributes {dimension_semantics = [#tpu.dimension_semantics<parallel>], iteration_bounds = array<i64: 2>, scalar_prefetch = 0 : i64, scratch_operands = 2 : i64, tpu.core_type = #tpu.core_type<tc>, window_params = [{transform_indices = @transform_0, window_bounds = array<i64: 1, 200, 1>}, {pipeline_mode = #tpu.pipeline_mode<synchronous>, transform_indices = @transform_1, window_bounds = array<i64: 128, 128>}, {pipeline_mode = #tpu.pipeline_mode<synchronous>, transform_indices = @transform_2, window_bounds = array<i64: 640, 128>}, {pipeline_mode = #tpu.pipeline_mode<synchronous>, transform_indices = @transform_3, window_bounds = array<i64: 1, 128>}, {pipeline_mode = #tpu.pipeline_mode<synchronous>, transform_indices = @transform_4, window_bounds = array<i64: 640, 128>}, {pipeline_mode = #tpu.pipeline_mode<synchronous>, transform_indices = @transform_5, window_bounds = array<i64: 1, 128>}, {pipeline_mode = #tpu.pipeline_mode<synchronous>, transform_indices = @transform_6, window_bounds = array<i64: 640, 128>}, {pipeline_mode = #tpu.pipeline_mode<synchronous>, transform_indices = @transform_7, window_bounds = array<i64: 1, 128>}, {pipeline_mode = #tpu.pipeline_mode<synchronous>, transform_indices = @transform_8, window_bounds = array<i64: 128, 128>}, {pipeline_mode = #tpu.pipeline_mode<synchronous>, transform_indices = @transform_9, window_bounds = array<i64: 1, 128>}, {pipeline_mode = #tpu.pipeline_mode<synchronous>, transform_indices = @transform_10, window_bounds = array<i64: 128, 128>}, {pipeline_mode = #tpu.pipeline_mode<synchronous>, transform_indices = @transform_11, window_bounds = array<i64: 1, 128>}, {transform_indices = @transform_12, window_bounds = array<i64: 1, 1, 128>}]} {
    %c0 = arith.constant 0 : index
    %c0_0 = arith.constant 0 : index
    %c0_1 = arith.constant 0 : index
    %0 = vector.load %arg1[%c0, %c0_0, %c0_1] : memref<1x200x1xi32, #tpu.memory_space<vmem>>, vector<1x200x1xi32>
    %1 = vector.shape_cast %0 : vector<1x200x1xi32> to vector<200x1xi32>
    %2 = tpu.iota {dimensions = array<i32: 1>} : vector<200x128xi32>
    %3 = vector.broadcast %1 : vector<200x1xi32> to vector<200x128xi32>
    %4 = arith.cmpi eq, %2, %3 : vector<200x128xi32>
    %cst = arith.constant 1.000000e+00 : f32
    %cst_2 = arith.constant 0.000000e+00 : f32
    %5 = vector.broadcast %cst : f32 to vector<200x128xf32>
    %6 = vector.broadcast %cst_2 : f32 to vector<200x128xf32>
    %7 = arith.select %4, %5, %6 : vector<200x128xi1>, vector<200x128xf32>
    %8 = arith.truncf %7 : vector<200x128xf32> to vector<200x128xbf16>
    %c0_3 = arith.constant 0 : index
    %c0_4 = arith.constant 0 : index
    %9 = vector.load %arg2[%c0_3, %c0_4] : memref<128x128xbf16, #tpu.memory_space<vmem>>, vector<128x128xbf16>
    %cst_5 = arith.constant dense<0.000000e+00> : vector<200x128xf32>
    %10 = tpu.matmul %8, %9, %cst_5 {dimension_numbers = #tpu.dot_dimension_numbers<[1], [0], [0], [1], [0, 0, 1, 1], [], []>} : vector<200x128xbf16>, vector<128x128xbf16>, vector<200x128xf32> -> vector<200x128xf32>
    %11 = arith.truncf %10 : vector<200x128xf32> to vector<200x128xbf16>
    %12 = vector.extract_strided_slice %11 {offsets = [0, 0], sizes = [196, 128], strides = [1, 1]} : vector<200x128xbf16> to vector<196x128xbf16>
    %c0_6 = arith.constant 0 : index
    %c0_7 = arith.constant 0 : index
    %13 = vector.load %arg3[%c0_6, %c0_7] : memref<640x128xbf16, #tpu.memory_space<vmem>>, vector<128x128xbf16>
    %cst_8 = arith.constant dense<0.000000e+00> : vector<196x128xf32>
    %14 = tpu.matmul %12, %13, %cst_8 {dimension_numbers = #tpu.dot_dimension_numbers<[1], [0], [0], [1], [0, 0, 1, 1], [], []>} : vector<196x128xbf16>, vector<128x128xbf16>, vector<196x128xf32> -> vector<196x128xf32>
    %15 = vector.extract_strided_slice %11 {offsets = [1, 0], sizes = [196, 128], strides = [1, 1]} : vector<200x128xbf16> to vector<196x128xbf16>
    %c128 = arith.constant 128 : index
    %c0_9 = arith.constant 0 : index
    %16 = vector.load %arg3[%c128, %c0_9] : memref<640x128xbf16, #tpu.memory_space<vmem>>, vector<128x128xbf16>
    %cst_10 = arith.constant dense<0.000000e+00> : vector<196x128xf32>
    %17 = tpu.matmul %15, %16, %cst_10 {dimension_numbers = #tpu.dot_dimension_numbers<[1], [0], [0], [1], [0, 0, 1, 1], [], []>} : vector<196x128xbf16>, vector<128x128xbf16>, vector<196x128xf32> -> vector<196x128xf32>
    %18 = arith.addf %14, %17 : vector<196x128xf32>
    %19 = vector.extract_strided_slice %11 {offsets = [2, 0], sizes = [196, 128], strides = [1, 1]} : vector<200x128xbf16> to vector<196x128xbf16>
    %c256 = arith.constant 256 : index
    %c0_11 = arith.constant 0 : index
    %20 = vector.load %arg3[%c256, %c0_11] : memref<640x128xbf16, #tpu.memory_space<vmem>>, vector<128x128xbf16>
    %cst_12 = arith.constant dense<0.000000e+00> : vector<196x128xf32>
    %21 = tpu.matmul %19, %20, %cst_12 {dimension_numbers = #tpu.dot_dimension_numbers<[1], [0], [0], [1], [0, 0, 1, 1], [], []>} : vector<196x128xbf16>, vector<128x128xbf16>, vector<196x128xf32> -> vector<196x128xf32>
    %22 = arith.addf %18, %21 : vector<196x128xf32>
    %23 = vector.extract_strided_slice %11 {offsets = [3, 0], sizes = [196, 128], strides = [1, 1]} : vector<200x128xbf16> to vector<196x128xbf16>
    %c384 = arith.constant 384 : index
    %c0_13 = arith.constant 0 : index
    %24 = vector.load %arg3[%c384, %c0_13] : memref<640x128xbf16, #tpu.memory_space<vmem>>, vector<128x128xbf16>
    %cst_14 = arith.constant dense<0.000000e+00> : vector<196x128xf32>
    %25 = tpu.matmul %23, %24, %cst_14 {dimension_numbers = #tpu.dot_dimension_numbers<[1], [0], [0], [1], [0, 0, 1, 1], [], []>} : vector<196x128xbf16>, vector<128x128xbf16>, vector<196x128xf32> -> vector<196x128xf32>
    %26 = arith.addf %22, %25 : vector<196x128xf32>
    %27 = vector.extract_strided_slice %11 {offsets = [4, 0], sizes = [196, 128], strides = [1, 1]} : vector<200x128xbf16> to vector<196x128xbf16>
    %c512 = arith.constant 512 : index
    %c0_15 = arith.constant 0 : index
    %28 = vector.load %arg3[%c512, %c0_15] : memref<640x128xbf16, #tpu.memory_space<vmem>>, vector<128x128xbf16>
    %cst_16 = arith.constant dense<0.000000e+00> : vector<196x128xf32>
    %29 = tpu.matmul %27, %28, %cst_16 {dimension_numbers = #tpu.dot_dimension_numbers<[1], [0], [0], [1], [0, 0, 1, 1], [], []>} : vector<196x128xbf16>, vector<128x128xbf16>, vector<196x128xf32> -> vector<196x128xf32>
    %30 = arith.addf %26, %29 : vector<196x128xf32>
    %c0_17 = arith.constant 0 : index
    %c0_18 = arith.constant 0 : index
    %31 = vector.load %arg4[%c0_17, %c0_18] : memref<1x128xf32, #tpu.memory_space<vmem>>, vector<1x128xf32>
    %32 = vector.broadcast %31 : vector<1x128xf32> to vector<196x128xf32>
    %33 = arith.addf %30, %32 : vector<196x128xf32>
    %cst_19 = arith.constant 0.000000e+00 : f32
    %34 = vector.broadcast %cst_19 : f32 to vector<196x128xf32>
    %35 = arith.maximumf %33, %34 : vector<196x128xf32>
    %c0_20 = arith.constant 0 : index
    %c0_21 = arith.constant 0 : index
    %36 = vector.load %arg14[%c0_20, %c0_21] : memref<196x128xf32, #tpu.memory_space<vmem>>, vector<196x128xf32>
    tpu.vector_store %arg14[%c0_20, %c0_21], %35 {strides = array<i32>} : memref<196x128xf32, #tpu.memory_space<vmem>>, vector<196x128xf32>,
    %c0_22 = arith.constant 0 : index
    %c0_23 = arith.constant 0 : index
    %37 = tpu.strided_load %arg14[%c0_22, %c0_23] {strides = array<i32: 5, 1>} : memref<196x128xf32, #tpu.memory_space<vmem>>, vector<39x128xf32>
    %c1 = arith.constant 1 : index
    %c0_24 = arith.constant 0 : index
    %38 = tpu.strided_load %arg14[%c1, %c0_24] {strides = array<i32: 5, 1>} : memref<196x128xf32, #tpu.memory_space<vmem>>, vector<39x128xf32>
    %39 = arith.maximumf %37, %38 : vector<39x128xf32>
    %c2 = arith.constant 2 : index
    %c0_25 = arith.constant 0 : index
    %40 = tpu.strided_load %arg14[%c2, %c0_25] {strides = array<i32: 5, 1>} : memref<196x128xf32, #tpu.memory_space<vmem>>, vector<39x128xf32>
    %41 = arith.maximumf %39, %40 : vector<39x128xf32>
    %c3 = arith.constant 3 : index
    %c0_26 = arith.constant 0 : index
    %42 = tpu.strided_load %arg14[%c3, %c0_26] {strides = array<i32: 5, 1>} : memref<196x128xf32, #tpu.memory_space<vmem>>, vector<39x128xf32>
    %43 = arith.maximumf %41, %42 : vector<39x128xf32>
    %c4 = arith.constant 4 : index
    %c0_27 = arith.constant 0 : index
    %44 = tpu.strided_load %arg14[%c4, %c0_27] {strides = array<i32: 5, 1>} : memref<196x128xf32, #tpu.memory_space<vmem>>, vector<39x128xf32>
    %45 = arith.maximumf %43, %44 : vector<39x128xf32>
    %46 = arith.truncf %45 : vector<39x128xf32> to vector<39x128xbf16>
    %47 = vector.extract_strided_slice %46 {offsets = [0, 0], sizes = [35, 128], strides = [1, 1]} : vector<39x128xbf16> to vector<35x128xbf16>
    %c0_28 = arith.constant 0 : index
    %c0_29 = arith.constant 0 : index
    %48 = vector.load %arg5[%c0_28, %c0_29] : memref<640x128xbf16, #tpu.memory_space<vmem>>, vector<128x128xbf16>
    %cst_30 = arith.constant dense<0.000000e+00> : vector<35x128xf32>
    %49 = tpu.matmul %47, %48, %cst_30 {dimension_numbers = #tpu.dot_dimension_numbers<[1], [0], [0], [1], [0, 0, 1, 1], [], []>} : vector<35x128xbf16>, vector<128x128xbf16>, vector<35x128xf32> -> vector<35x128xf32>
    %50 = vector.extract_strided_slice %46 {offsets = [1, 0], sizes = [35, 128], strides = [1, 1]} : vector<39x128xbf16> to vector<35x128xbf16>
    %c128_31 = arith.constant 128 : index
    %c0_32 = arith.constant 0 : index
    %51 = vector.load %arg5[%c128_31, %c0_32] : memref<640x128xbf16, #tpu.memory_space<vmem>>, vector<128x128xbf16>
    %cst_33 = arith.constant dense<0.000000e+00> : vector<35x128xf32>
    %52 = tpu.matmul %50, %51, %cst_33 {dimension_numbers = #tpu.dot_dimension_numbers<[1], [0], [0], [1], [0, 0, 1, 1], [], []>} : vector<35x128xbf16>, vector<128x128xbf16>, vector<35x128xf32> -> vector<35x128xf32>
    %53 = arith.addf %49, %52 : vector<35x128xf32>
    %54 = vector.extract_strided_slice %46 {offsets = [2, 0], sizes = [35, 128], strides = [1, 1]} : vector<39x128xbf16> to vector<35x128xbf16>
    %c256_34 = arith.constant 256 : index
    %c0_35 = arith.constant 0 : index
    %55 = vector.load %arg5[%c256_34, %c0_35] : memref<640x128xbf16, #tpu.memory_space<vmem>>, vector<128x128xbf16>
    %cst_36 = arith.constant dense<0.000000e+00> : vector<35x128xf32>
    %56 = tpu.matmul %54, %55, %cst_36 {dimension_numbers = #tpu.dot_dimension_numbers<[1], [0], [0], [1], [0, 0, 1, 1], [], []>} : vector<35x128xbf16>, vector<128x128xbf16>, vector<35x128xf32> -> vector<35x128xf32>
    %57 = arith.addf %53, %56 : vector<35x128xf32>
    %58 = vector.extract_strided_slice %46 {offsets = [3, 0], sizes = [35, 128], strides = [1, 1]} : vector<39x128xbf16> to vector<35x128xbf16>
    %c384_37 = arith.constant 384 : index
    %c0_38 = arith.constant 0 : index
    %59 = vector.load %arg5[%c384_37, %c0_38] : memref<640x128xbf16, #tpu.memory_space<vmem>>, vector<128x128xbf16>
    %cst_39 = arith.constant dense<0.000000e+00> : vector<35x128xf32>
    %60 = tpu.matmul %58, %59, %cst_39 {dimension_numbers = #tpu.dot_dimension_numbers<[1], [0], [0], [1], [0, 0, 1, 1], [], []>} : vector<35x128xbf16>, vector<128x128xbf16>, vector<35x128xf32> -> vector<35x128xf32>
    %61 = arith.addf %57, %60 : vector<35x128xf32>
    %62 = vector.extract_strided_slice %46 {offsets = [4, 0], sizes = [35, 128], strides = [1, 1]} : vector<39x128xbf16> to vector<35x128xbf16>
    %c512_40 = arith.constant 512 : index
    %c0_41 = arith.constant 0 : index
    %63 = vector.load %arg5[%c512_40, %c0_41] : memref<640x128xbf16, #tpu.memory_space<vmem>>, vector<128x128xbf16>
    %cst_42 = arith.constant dense<0.000000e+00> : vector<35x128xf32>
    %64 = tpu.matmul %62, %63, %cst_42 {dimension_numbers = #tpu.dot_dimension_numbers<[1], [0], [0], [1], [0, 0, 1, 1], [], []>} : vector<35x128xbf16>, vector<128x128xbf16>, vector<35x128xf32> -> vector<35x128xf32>
    %65 = arith.addf %61, %64 : vector<35x128xf32>
    %c0_43 = arith.constant 0 : index
    %c0_44 = arith.constant 0 : index
    %66 = vector.load %arg6[%c0_43, %c0_44] : memref<1x128xf32, #tpu.memory_space<vmem>>, vector<1x128xf32>
    %67 = vector.broadcast %66 : vector<1x128xf32> to vector<35x128xf32>
    %68 = arith.addf %65, %67 : vector<35x128xf32>
    %cst_45 = arith.constant 0.000000e+00 : f32
    %69 = vector.broadcast %cst_45 : f32 to vector<35x128xf32>
    %70 = arith.maximumf %68, %69 : vector<35x128xf32>
    %c0_46 = arith.constant 0 : index
    %c0_47 = arith.constant 0 : index
    %71 = vector.load %arg15[%c0_46, %c0_47] : memref<35x128xf32, #tpu.memory_space<vmem>>, vector<35x128xf32>
    tpu.vector_store %arg15[%c0_46, %c0_47], %70 {strides = array<i32>} : memref<35x128xf32, #tpu.memory_space<vmem>>, vector<35x128xf32>,
    %c0_48 = arith.constant 0 : index
    %c0_49 = arith.constant 0 : index
    %72 = tpu.strided_load %arg15[%c0_48, %c0_49] {strides = array<i32: 5, 1>} : memref<35x128xf32, #tpu.memory_space<vmem>>, vector<7x128xf32>
    %c1_50 = arith.constant 1 : index
    %c0_51 = arith.constant 0 : index
    %73 = tpu.strided_load %arg15[%c1_50, %c0_51] {strides = array<i32: 5, 1>} : memref<35x128xf32, #tpu.memory_space<vmem>>, vector<7x128xf32>
    %74 = arith.maximumf %72, %73 : vector<7x128xf32>
    %c2_52 = arith.constant 2 : index
    %c0_53 = arith.constant 0 : index
    %75 = tpu.strided_load %arg15[%c2_52, %c0_53] {strides = array<i32: 5, 1>} : memref<35x128xf32, #tpu.memory_space<vmem>>, vector<7x128xf32>
    %76 = arith.maximumf %74, %75 : vector<7x128xf32>
    %c3_54 = arith.constant 3 : index
    %c0_55 = arith.constant 0 : index
    %77 = tpu.strided_load %arg15[%c3_54, %c0_55] {strides = array<i32: 5, 1>} : memref<35x128xf32, #tpu.memory_space<vmem>>, vector<7x128xf32>
    %78 = arith.maximumf %76, %77 : vector<7x128xf32>
    %c4_56 = arith.constant 4 : index
    %c0_57 = arith.constant 0 : index
    %79 = tpu.strided_load %arg15[%c4_56, %c0_57] {strides = array<i32: 5, 1>} : memref<35x128xf32, #tpu.memory_space<vmem>>, vector<7x128xf32>
    %80 = arith.maximumf %78, %79 : vector<7x128xf32>
    %81 = arith.truncf %80 : vector<7x128xf32> to vector<7x128xbf16>
    %82 = vector.extract_strided_slice %81 {offsets = [0, 0], sizes = [3, 128], strides = [1, 1]} : vector<7x128xbf16> to vector<3x128xbf16>
    %c0_58 = arith.constant 0 : index
    %c0_59 = arith.constant 0 : index
    %83 = vector.load %arg7[%c0_58, %c0_59] : memref<640x128xbf16, #tpu.memory_space<vmem>>, vector<128x128xbf16>
    %cst_60 = arith.constant dense<0.000000e+00> : vector<3x128xf32>
    %84 = tpu.matmul %82, %83, %cst_60 {dimension_numbers = #tpu.dot_dimension_numbers<[1], [0], [0], [1], [0, 0, 1, 1], [], []>} : vector<3x128xbf16>, vector<128x128xbf16>, vector<3x128xf32> -> vector<3x128xf32>
    %85 = vector.extract_strided_slice %81 {offsets = [1, 0], sizes = [3, 128], strides = [1, 1]} : vector<7x128xbf16> to vector<3x128xbf16>
    %c128_61 = arith.constant 128 : index
    %c0_62 = arith.constant 0 : index
    %86 = vector.load %arg7[%c128_61, %c0_62] : memref<640x128xbf16, #tpu.memory_space<vmem>>, vector<128x128xbf16>
    %cst_63 = arith.constant dense<0.000000e+00> : vector<3x128xf32>
    %87 = tpu.matmul %85, %86, %cst_63 {dimension_numbers = #tpu.dot_dimension_numbers<[1], [0], [0], [1], [0, 0, 1, 1], [], []>} : vector<3x128xbf16>, vector<128x128xbf16>, vector<3x128xf32> -> vector<3x128xf32>
    %88 = arith.addf %84, %87 : vector<3x128xf32>
    %89 = vector.extract_strided_slice %81 {offsets = [2, 0], sizes = [3, 128], strides = [1, 1]} : vector<7x128xbf16> to vector<3x128xbf16>
    %c256_64 = arith.constant 256 : index
    %c0_65 = arith.constant 0 : index
    %90 = vector.load %arg7[%c256_64, %c0_65] : memref<640x128xbf16, #tpu.memory_space<vmem>>, vector<128x128xbf16>
    %cst_66 = arith.constant dense<0.000000e+00> : vector<3x128xf32>
    %91 = tpu.matmul %89, %90, %cst_66 {dimension_numbers = #tpu.dot_dimension_numbers<[1], [0], [0], [1], [0, 0, 1, 1], [], []>} : vector<3x128xbf16>, vector<128x128xbf16>, vector<3x128xf32> -> vector<3x128xf32>
    %92 = arith.addf %88, %91 : vector<3x128xf32>
    %93 = vector.extract_strided_slice %81 {offsets = [3, 0], sizes = [3, 128], strides = [1, 1]} : vector<7x128xbf16> to vector<3x128xbf16>
    %c384_67 = arith.constant 384 : index
    %c0_68 = arith.constant 0 : index
    %94 = vector.load %arg7[%c384_67, %c0_68] : memref<640x128xbf16, #tpu.memory_space<vmem>>, vector<128x128xbf16>
    %cst_69 = arith.constant dense<0.000000e+00> : vector<3x128xf32>
    %95 = tpu.matmul %93, %94, %cst_69 {dimension_numbers = #tpu.dot_dimension_numbers<[1], [0], [0], [1], [0, 0, 1, 1], [], []>} : vector<3x128xbf16>, vector<128x128xbf16>, vector<3x128xf32> -> vector<3x128xf32>
    %96 = arith.addf %92, %95 : vector<3x128xf32>
    %97 = vector.extract_strided_slice %81 {offsets = [4, 0], sizes = [3, 128], strides = [1, 1]} : vector<7x128xbf16> to vector<3x128xbf16>
    %c512_70 = arith.constant 512 : index
    %c0_71 = arith.constant 0 : index
    %98 = vector.load %arg7[%c512_70, %c0_71] : memref<640x128xbf16, #tpu.memory_space<vmem>>, vector<128x128xbf16>
    %cst_72 = arith.constant dense<0.000000e+00> : vector<3x128xf32>
    %99 = tpu.matmul %97, %98, %cst_72 {dimension_numbers = #tpu.dot_dimension_numbers<[1], [0], [0], [1], [0, 0, 1, 1], [], []>} : vector<3x128xbf16>, vector<128x128xbf16>, vector<3x128xf32> -> vector<3x128xf32>
    %100 = arith.addf %96, %99 : vector<3x128xf32>
    %c0_73 = arith.constant 0 : index
    %c0_74 = arith.constant 0 : index
    %101 = vector.load %arg8[%c0_73, %c0_74] : memref<1x128xf32, #tpu.memory_space<vmem>>, vector<1x128xf32>
    %102 = vector.broadcast %101 : vector<1x128xf32> to vector<3x128xf32>
    %103 = arith.addf %100, %102 : vector<3x128xf32>
    %cst_75 = arith.constant 0.000000e+00 : f32
    %104 = vector.broadcast %cst_75 : f32 to vector<3x128xf32>
    %105 = arith.maximumf %103, %104 : vector<3x128xf32>
    %cst_76 = arith.constant dense<0xFF800000> : vector<128xf32>
    %106 = vector.multi_reduction <maximumf>, %105, %cst_76 [0] : vector<3x128xf32> to vector<128xf32>
    %107 = vector.shape_cast %106 : vector<128xf32> to vector<1x128xf32>
    %108 = arith.truncf %107 : vector<1x128xf32> to vector<1x128xbf16>
    %c0_77 = arith.constant 0 : index
    %c0_78 = arith.constant 0 : index
    %109 = vector.load %arg9[%c0_77, %c0_78] : memref<128x128xbf16, #tpu.memory_space<vmem>>, vector<128x128xbf16>
    %cst_79 = arith.constant dense<0.000000e+00> : vector<1x128xf32>
    %110 = tpu.matmul %108, %109, %cst_79 {dimension_numbers = #tpu.dot_dimension_numbers<[1], [0], [0], [1], [0, 0, 1, 1], [], []>} : vector<1x128xbf16>, vector<128x128xbf16>, vector<1x128xf32> -> vector<1x128xf32>
    %c0_80 = arith.constant 0 : index
    %c0_81 = arith.constant 0 : index
    %111 = vector.load %arg10[%c0_80, %c0_81] : memref<1x128xf32, #tpu.memory_space<vmem>>, vector<1x128xf32>
    %112 = arith.addf %110, %111 : vector<1x128xf32>
    %cst_82 = arith.constant 0.000000e+00 : f32
    %113 = vector.broadcast %cst_82 : f32 to vector<1x128xf32>
    %114 = arith.maximumf %112, %113 : vector<1x128xf32>
    %115 = arith.truncf %114 : vector<1x128xf32> to vector<1x128xbf16>
    %c0_83 = arith.constant 0 : index
    %c0_84 = arith.constant 0 : index
    %116 = vector.load %arg11[%c0_83, %c0_84] : memref<128x128xbf16, #tpu.memory_space<vmem>>, vector<128x128xbf16>
    %cst_85 = arith.constant dense<0.000000e+00> : vector<1x128xf32>
    %117 = tpu.matmul %115, %116, %cst_85 {dimension_numbers = #tpu.dot_dimension_numbers<[1], [0], [0], [1], [0, 0, 1, 1], [], []>} : vector<1x128xbf16>, vector<128x128xbf16>, vector<1x128xf32> -> vector<1x128xf32>
    %c0_86 = arith.constant 0 : index
    %c0_87 = arith.constant 0 : index
    %118 = vector.load %arg12[%c0_86, %c0_87] : memref<1x128xf32, #tpu.memory_space<vmem>>, vector<1x128xf32>
    %119 = arith.addf %117, %118 : vector<1x128xf32>
    %c0_88 = arith.constant 0 : index
    %c0_89 = arith.constant 0 : index
    %c0_90 = arith.constant 0 : index
    %120 = vector.load %arg13[%c0_88, %c0_89, %c0_90] : memref<1x1x128xf32, #tpu.memory_space<vmem>>, vector<1x1x128xf32>
    %121 = vector.shape_cast %120 : vector<1x1x128xf32> to vector<1x128xf32>
    %122 = vector.shape_cast %119 : vector<1x128xf32> to vector<1x1x128xf32>
    tpu.vector_store %arg13[%c0_88, %c0_89, %c0_90], %122 {strides = array<i32>} : memref<1x1x128xf32, #tpu.memory_space<vmem>>, vector<1x1x128xf32>,
    return
  }
  func.func @transform_0(%arg0: i32) -> (i32, i32, i32) {
    %c0_i32 = arith.constant 0 : i32
    %c0_i32_0 = arith.constant 0 : i32
    %c0_i32_1 = arith.constant 0 : i32
    return %arg0, %c0_i32, %c0_i32_0 : i32, i32, i32
  }
  func.func @transform_1(%arg0: i32) -> (i32, i32) {
    %c0_i32 = arith.constant 0 : i32
    %c0_i32_0 = arith.constant 0 : i32
    %c0_i32_1 = arith.constant 0 : i32
    return %c0_i32, %c0_i32_0 : i32, i32
  }
  func.func @transform_2(%arg0: i32) -> (i32, i32) {
    %c0_i32 = arith.constant 0 : i32
    %c0_i32_0 = arith.constant 0 : i32
    %c0_i32_1 = arith.constant 0 : i32
    return %c0_i32, %c0_i32_0 : i32, i32
  }
  func.func @transform_3(%arg0: i32) -> (i32, i32) {
    %c0_i32 = arith.constant 0 : i32
    %c0_i32_0 = arith.constant 0 : i32
    %c0_i32_1 = arith.constant 0 : i32
    return %c0_i32, %c0_i32_0 : i32, i32
  }
  func.func @transform_4(%arg0: i32) -> (i32, i32) {
    %c0_i32 = arith.constant 0 : i32
    %c0_i32_0 = arith.constant 0 : i32
    %c0_i32_1 = arith.constant 0 : i32
    return %c0_i32, %c0_i32_0 : i32, i32
  }
  func.func @transform_5(%arg0: i32) -> (i32, i32) {
    %c0_i32 = arith.constant 0 : i32
    %c0_i32_0 = arith.constant 0 : i32
    %c0_i32_1 = arith.constant 0 : i32
    return %c0_i32, %c0_i32_0 : i32, i32
  }
  func.func @transform_6(%arg0: i32) -> (i32, i32) {
    %c0_i32 = arith.constant 0 : i32
    %c0_i32_0 = arith.constant 0 : i32
    %c0_i32_1 = arith.constant 0 : i32
    return %c0_i32, %c0_i32_0 : i32, i32
  }
  func.func @transform_7(%arg0: i32) -> (i32, i32) {
    %c0_i32 = arith.constant 0 : i32
    %c0_i32_0 = arith.constant 0 : i32
    %c0_i32_1 = arith.constant 0 : i32
    return %c0_i32, %c0_i32_0 : i32, i32
  }
  func.func @transform_8(%arg0: i32) -> (i32, i32) {
    %c0_i32 = arith.constant 0 : i32
    %c0_i32_0 = arith.constant 0 : i32
    %c0_i32_1 = arith.constant 0 : i32
    return %c0_i32, %c0_i32_0 : i32, i32
  }
  func.func @transform_9(%arg0: i32) -> (i32, i32) {
    %c0_i32 = arith.constant 0 : i32
    %c0_i32_0 = arith.constant 0 : i32
    %c0_i32_1 = arith.constant 0 : i32
    return %c0_i32, %c0_i32_0 : i32, i32
  }
  func.func @transform_10(%arg0: i32) -> (i32, i32) {
    %c0_i32 = arith.constant 0 : i32
    %c0_i32_0 = arith.constant 0 : i32
    %c0_i32_1 = arith.constant 0 : i32
    return %c0_i32, %c0_i32_0 : i32, i32
  }
  func.func @transform_11(%arg0: i32) -> (i32, i32) {
    %c0_i32 = arith.constant 0 : i32
    %c0_i32_0 = arith.constant 0 : i32
    %c0_i32_1 = arith.constant 0 : i32
    return %c0_i32, %c0_i32_0 : i32, i32
  }
  func.func @transform_12(%arg0: i32) -> (i32, i32, i32) {
    %c0_i32 = arith.constant 0 : i32
    %c0_i32_0 = arith.constant 0 : i32
    %c0_i32_1 = arith.constant 0 : i32
    return %arg0, %c0_i32, %c0_i32_0 : i32, i32, i32
  }
}

</mosaic_0001>

<bundles_post_ra>
// kernel: net_forward.1
= control target key start
LH: loop header
LB: loop body
LE: loop exit
PB: predicated region body
PF: predicated region fallthrough
CT: control target
= control target key end

     0   :  { %s6631_s0 = inlined_call_operand.vmem [shape: s32[2,200,1], index: 0, kind: input, shape index: {}]   ;;  %s6632_s1 = inlined_call_operand.vmem [shape: bf16[128,128], index: 1, kind: input, shape index: {}]   ;;  %s6633_s2 = inlined_call_operand.vmem [shape: bf16[640,128], index: 2, kind: input, shape index: {}]   ;;  %s6634_s3 = inlined_call_operand.vmem [shape: f32[1,128], index: 3, kind: input, shape index: {}]   ;;  %s6635_s4 = inlined_call_operand.vmem [shape: bf16[640,128], index: 4, kind: input, shape index: {}]   ;;  %s6636_s5 = inlined_call_operand.vmem [shape: f32[1,128], index: 5, kind: input, shape index: {}]   ;;  %s6637_s6 = inlined_call_operand.vmem [shape: bf16[640,128], index: 6, kind: input, shape index: {}]   ;;  %s6638_s7 = inlined_call_operand.vmem [shape: f32[1,128], index: 7, kind: input, shape index: {}]   ;;  %s6639_s8 = inlined_call_operand.vmem [shape: bf16[128,128], index: 8, kind: input, shape index: {}]   ;;  %s6640_s9 = inlined_call_operand.vmem [shape: f32[1,128], index: 9, kind: input, shape index: {}]   ;;  %s6641_s10 = inlined_call_operand.vmem [shape: bf16[128,128], index: 10, kind: input, shape index: {}]   ;;  %s6642_s11 = inlined_call_operand.vmem [shape: f32[1,128], index: 11, kind: input, shape index: {}]   ;;  %s6643_s12 = inlined_call_operand.hbm [shape: f32[2,1,128], index: 12, kind: output, shape index: {}]  }
   0x1   :  { %6644 = sst [smem:[#allocation7_spill]] %s6631_s0 }
   0x2   :  { %17 = vsyncpa [#allocation5], 0 }
   0x3   :  { %19 = vsyncpa [#allocation5 + $0x1], 0  ;;  %s5278_s21 = smov 0   ;;  %s5280_s22 = smov 0  }
   0x4   :  { %s5282_s23 = smov 0   ;;  %s5284_s24 = smov 0  }
   0x5 LB: > { %s5299_s25 = sadd.s32 4294967295, %s5206_s24   ;;  %s3841_s26 = sadd.s32 4294967294, %s5206_s24   ;;  %s5206_s24 = sphi %s5284_s24, %s6651_s24   ;;  %s5202_s23 = sphi %s5282_s23, %s6650_s23   ;;  %s5198_s22 = sphi %s5280_s22, %s6649_s22   ;;  %s5194_s21 = sphi %s5278_s21, %s6648_s21  }
   0x6   : > { %s5303_s27 = sadd.s32 1, %s5206_s24   ;;  %s289_s28 = sadd.s32 1, %s5202_s23 }
   0x7   : > { %s286_s29 = ssub.s32 %s5206_s24, %s5303_s27  ;;  %p299_p0 = scmp.ne.s32.totalorder %s5202_s23, %s5198_s22 }
   0x8   : > { %p287_p1 = scmp.eq.s32.totalorder %s286_s29, 0  ;;  %p300_p2 = scmp.eq.s32.totalorder %s5299_s25, 1 }
   0x9   : > { %p305_p3 = scmp.ne.s32.totalorder %s5198_s22, %s5194_s21  ;;  %p306_p4 = scmp.eq.s32.totalorder %s3841_s26, 1 }
   0xa   : > { %s5314_s30 = scalar_select %p287_p1, %s5202_s23, %s289_s28  }
   0xb   : > { %p5316_p5 = por %p300_p2, %p299_p0  ;;  %p5320_p6 = por %p306_p4, %p305_p3 }
   0xc   : > { %p3844_p7 = scmp.ge.s32.totalorder %s5206_s24, 1  ;;  %p365_p8 = scmp.lt.s32.totalorder %s5206_s24, 3 }
   0xe   : > { %p366_p9 = pnand %p3844_p7, %p365_p8 }
   0xf   : > { %p406_p10 = scmp.lt.s32.totalorder (!%p366_p9), %s5299_s25, 1  ;;  %v5000_v0 = vld [vmem:[%s6632_s1] sm:$0xff] (!%p366_p9)   ;;  %v5208_v1 = vmov (!%p366_p9), 0   ;;  %v5209_v2 = vmov (!%p366_p9), 0.0   ;;  %v5001_v3 = vld [vmem:[%s6632_s1 + $0x8] sm:$0xff] (!%p366_p9)   ;;  %s6647_s0 = sld [smem:[#allocation7_spill]] (!%p366_p9)  ;;  %v437_v39 = vlaneseq (!%p366_p9) }
  0x10   : > { %369 = sbr.rel (%p366_p9) target bundleno = 1982 (0x7be), region = 68  ;;  %4999 = vset.pattern.permute.xlu1 (!%p366_p9), %v5208_v1  ;;  %4998 = vset.pattern.permute.xlu0 (!%p366_p9), %v5208_v1  ;;  %v5002_v6 = vld [vmem:[%s6632_s1 + $0x10] sm:$0xff] (!%p366_p9)   ;;  %v5003_v9 = vld [vmem:[%s6632_s1 + $0x18] sm:$0xff] (!%p366_p9)   ;;  %vm5210_vm0 = vmmov (!%p366_p9), 0   ;;  %v5004_v13 = vld [vmem:[%s6632_s1 + $0x20] sm:$0xff] (!%p366_p9)   ;;  %s4019_s15 = sshll.u32 (!%p366_p9), %s5299_s25, 4 }
  0x11   : > { %4266 = vmatprep.subr.bf16.mxu0 (!%p366_p9), %v5209_v2  ;;  %4334 = vmatprep.subr.bf16.mxu1 (!%p366_p9), %v5209_v2  ;;  %v5005_v15 = vld [vmem:[%s6632_s1 + $0x28] sm:$0xff] (!%p366_p9)   ;;  %v5006_v18 = vld [vmem:[%s6632_s1 + $0x30] sm:$0xff] (!%p366_p9)   ;;  %v5007_v21 = vld [vmem:[%s6632_s1 + $0x38] sm:$0xff] (!%p366_p9)   ;;  %v5412_v41 = vand.u32 (!%p366_p9), 127, %v437_v39  ;;  %v5211_v45 = vmov (!%p366_p9), 1.0|1.0   ;;  %s6589_s19 = scalar_lea.hbm (!%p366_p9), %s6643_s12, %s4019_s15 }
  0x12   : > { %4267 = vmatpush3.bf16.msra.mxu0 (!%p366_p9), %v5000_v0  ;;  %4282 = vmatprep.mubr.msk.bf16.mxu0 (!%p366_p9), %vm5210_vm0, %v5209_v2  ;;  %v5011_v35 = vld [vmem:[%s6633_s2 + $0x40] sm:$0xff] (!%p366_p9)   ;;  %v5013_v36 = vld [vmem:[%s6633_s2 + $0x48] sm:$0xff] (!%p366_p9)   ;;  %v5015_v37 = vld [vmem:[%s6633_s2 + $0x50] sm:$0xff] (!%p366_p9)   ;;  %s5212_s28 = smov (!%p366_p9), [#allocation4]  }
  0x13   : > { %4268 = vmatprep.subr.bf16.mxu0 (!%p366_p9), %v5209_v2  ;;  %4350 = vmatprep.mubr.msk.bf16.mxu1 (!%p366_p9), %vm5210_vm0, %v5209_v2  ;;  %v5017_v38 = vld [vmem:[%s6633_s2 + $0x58] sm:$0xff] (!%p366_p9)   ;;  %v5008_v44 = vld [vmem:[%s6633_s2] sm:$0xff] (!%p366_p9)   ;;  %v5009_v46 = vld [vmem:[%s6633_s2 + $0x8] sm:$0xff] (!%p366_p9)  }
  0x14   : > { %4335 = vmatpush3.bf16.msra.mxu1 (!%p366_p9), %v5011_v35  ;;  %v5010_v48 = vld [vmem:[%s6633_s2 + $0x10] sm:$0xff] (!%p366_p9)   ;;  %v5012_v51 = vld [vmem:[%s6633_s2 + $0x18] sm:$0xff] (!%p366_p9)   ;;  %v5014_v52 = vld [vmem:[%s6633_s2 + $0x20] sm:$0xff] (!%p366_p9)  }
  0x15   : > { %4336 = vmatprep.subr.bf16.mxu1 (!%p366_p9), %v5209_v2  ;;  %v5016_v55 = vld [vmem:[%s6633_s2 + $0x28] sm:$0xff] (!%p366_p9)   ;;  %v5018_v56 = vld [vmem:[%s6633_s2 + $0x30] sm:$0xff] (!%p366_p9)  }
  0x16   : > { %4269 = vmatpush3.bf16.msra.mxu0 (!%p366_p9), %v5001_v3 }
  0x17   : > { %s407_s17 = scalar_select %p406_p10, %s5299_s25, 1  ;;  %4270 = vmatprep.subr.bf16.mxu0 %v5209_v2 }
  0x18   : > { %4337 = vmatpush3.bf16.msra.mxu1 %v5013_v36 }
  0x19   : > { %s4954_s20 = smul.u32 200, %s407_s17  ;;  %4338 = vmatprep.subr.bf16.mxu1 %v5209_v2 }
  0x1a   : > { %4271 = vmatpush3.bf16.msra.mxu0 %v5002_v6 }
  0x1b   : > { %s5340_s29 = scalar_lea.vmem %s6647_s0, %s4954_s20  ;;  %4272 = vmatprep.subr.bf16.mxu0 %v5209_v2  ;;  %s404_s20 = sand.u32 1, %s5198_s22  }
  0x1c   : > { %v414_v4 = vld [vmem:[%s5340_s29 + $0x10] sm:$0xff]  ;;  %v412_v5 = vld [vmem:[%s5340_s29] sm:$0xff]  ;;  %v415_v7 = vld [vmem:[%s5340_s29 + $0x18] sm:$0xff]  ;;  %4339 = vmatpush3.bf16.msra.mxu1 %v5015_v37  ;;  %s405_s16 = scalar_lea.vmem [#allocation4], %s404_s20  ;;  %s3774_s26 = scalar_lea.sflag [#allocation5], %s404_s20 }
  0x1d   : > { %446 = vperm.xlu1 %4999, %v414_v4   ;;  %440 = vperm.xlu0 %4998, %v412_v5   ;;  %v413_v8 = vld [vmem:[%s5340_s29 + $0x8] sm:$0xff]  ;;  %v416_v11 = vld [vmem:[%s5340_s29 + $0x20] sm:$0xff]  ;;  %v419_v12 = vld [vmem:[%s5340_s29 + $0x38] sm:$0xff]  ;;  %s5148_s0 = sshll.u32 %s5212_s28, 4  ;;  %s5149_s0 = int_to_ptr.vmem [resolvable:$false] %s5148_s0 }
  0x1e   : > { %v417_v10 = vld [vmem:[%s5340_s29 + $0x28] sm:$0xff]  ;;  %4273 = vmatpush3.bf16.msra.mxu0 %v5003_v9  ;;  %v418_v14 = vld [vmem:[%s5340_s29 + $0x30] sm:$0xff]  ;;  %v420_v17 = vld [vmem:[%s5340_s29 + $0x40] sm:$0xff]  ;;  %4340 = vmatprep.subr.bf16.mxu1 %v5209_v2  ;;  %s5150_s17 = scalar_lea.vmem %s5149_s0, 32 }
  0x1f   : > { %4274 = vmatprep.subr.bf16.mxu0 %v5209_v2  ;;  %v421_v16 = vld [vmem:[%s5340_s29 + $0x48] sm:$0xff]  ;;  %v423_v19 = vld [vmem:[%s5340_s29 + $0x58] sm:$0xff]  ;;  %v422_v20 = vld [vmem:[%s5340_s29 + $0x50] sm:$0xff] }
  0x20   : > { %v425_v22 = vld [vmem:[%s5340_s29 + $0x68] sm:$0xff]  ;;  %v424_v23 = vld [vmem:[%s5340_s29 + $0x60] sm:$0xff]  ;;  %v427_v24 = vld [vmem:[%s5340_s29 + $0x78] sm:$0xff]  ;;  %4341 = vmatpush3.bf16.msra.mxu1 %v5017_v38 }
  0x21   : > { %449 = vperm.xlu1 %4999, %v415_v7   ;;  %443 = vperm.xlu0 %4998, %v413_v8   ;;  %v426_v25 = vld [vmem:[%s5340_s29 + $0x70] sm:$0xff]  ;;  %v429_v26 = vld [vmem:[%s5340_s29 + $0x88] sm:$0xff]  ;;  %v428_v27 = vld [vmem:[%s5340_s29 + $0x80] sm:$0xff] }
  0x22   : > { %4275 = vmatpush3.bf16.msra.mxu0 %v5004_v13  ;;  %v431_v28 = vld [vmem:[%s5340_s29 + $0x98] sm:$0xff]  ;;  %v430_v29 = vld [vmem:[%s5340_s29 + $0x90] sm:$0xff]  ;;  %v433_v30 = vld [vmem:[%s5340_s29 + $0xa8] sm:$0xff]  ;;  %4342 = vmatprep.subr.bf16.mxu1 %v5209_v2 }
  0x23   : > { %4276 = vmatprep.subr.bf16.mxu0 %v5209_v2  ;;  %v432_v31 = vld [vmem:[%s5340_s29 + $0xa0] sm:$0xff]  ;;  %v435_v32 = vld [vmem:[%s5340_s29 + $0xb8] sm:$0xff]  ;;  %v434_v33 = vld [vmem:[%s5340_s29 + $0xb0] sm:$0xff] }
  0x24   : > { %v436_v34 = vld [vmem:[%s5340_s29 + $0xc0] sm:$0xff]  ;;  %s3786_s29 = sshll.u32 %s405_s16, 4  ;;  %s6591_s29 = int_to_ptr.vmem [resolvable:$true] %s3786_s29 }
  0x25   : > { %455 = vperm.xlu1 %4999, %v417_v10   ;;  %452 = vperm.xlu0 %4998, %v416_v11   ;;  %v5020_v10 = vld [vmem:[%s6633_s2 + $0x38] sm:$0xff]   ;;  %v5019_v11 = vld [vmem:[%s6633_s2 + $0x60] sm:$0xff]   ;;  %s5144_s25 = scalar_lea.vmem %s6591_s29, 16  ;;  %p5151_p0 = scmp.lt.s32.totalorder %s6591_s29, %s5149_s0 }
  0x26   : > { %4277 = vmatpush3.bf16.msra.mxu0 %v5005_v15  ;;  %4343 = vmatpush3.bf16.msra.mxu1 %v5019_v11  ;;  %v5023_v15 = vld [vmem:[%s6633_s2 + $0x78] sm:$0xff]   ;;  %p5145_p11 = scmp.ne.s32.totalorder %s6591_s29, %s5144_s25  ;;  %p5152_p1 = scmp.lt.s32.totalorder %s5150_s17, %s5144_s25 }
  0x27   : > { %4278 = vmatprep.subr.bf16.mxu0 %v5209_v2  ;;  %4344 = vmatprep.subr.bf16.mxu1 %v5209_v2 }
  0x28   : > { %p5146_p12 = pnand %p5145_p11, %p5316_p5  ;;  %p5153_p2 = por %p5152_p1, %p5151_p0 }
  0x29   : > { %461 = vperm.xlu1 %4999, %v419_v12   ;;  %458 = vperm.xlu0 %4998, %v418_v14   ;;  %v5021_v12 = vld [vmem:[%s6633_s2 + $0x68] sm:$0xff]   ;;  %v5022_v14 = vld [vmem:[%s6633_s2 + $0x70] sm:$0xff]  }
  0x2a   : > { %4279 = vmatpush3.bf16.msra.mxu0 %v5006_v18  ;;  %4345 = vmatpush3.bf16.msra.mxu1 %v5021_v12  ;;  %p5147_p13 = pneg %p5146_p12 }
  0x2b   : > { %4280 = vmatprep.subr.bf16.mxu0 %v5209_v2  ;;  %4346 = vmatprep.subr.bf16.mxu1 %v5209_v2 }
  0x2c   : > { %p5154_p3 = pnand %p5153_p2, %p5147_p13 }
  0x2d   : > { %467 = vperm.xlu1 %4999, %v421_v16   ;;  %464 = vperm.xlu0 %4998, %v420_v17  }
  0x2e   : > { %4281 = vmatpush3.bf16.msra.mxu0 %v5007_v21  ;;  %4347 = vmatpush3.bf16.msra.mxu1 %v5022_v14 }
  0x2f   : > { %4402 = vmatprep.subr.bf16.mxu0 %v5209_v2  ;;  %4348 = vmatprep.subr.bf16.mxu1 %v5209_v2 }
  0x31   : > { %473 = vperm.xlu1 %4999, %v423_v19   ;;  %470 = vperm.xlu0 %4998, %v422_v20   ;;  %v5029_v19 = vld [vmem:[%s6633_s2 + $0xc0] sm:$0xff]  }
  0x32   : > { %4349 = vmatpush3.bf16.msra.mxu1 %v5023_v15 }
  0x33   : > { %4470 = vmatprep.subr.bf16.mxu1 %v5209_v2 }
  0x35   : > { %479 = vperm.xlu1 %4999, %v425_v22   ;;  %476 = vperm.xlu0 %4998, %v424_v23  }
  0x39   : > { %485 = vperm.xlu1 %4999, %v427_v24   ;;  %482 = vperm.xlu0 %4998, %v426_v25   ;;  %v5030_v24 = vld [vmem:[%s6633_s2 + $0xc8] sm:$0xff]  }
  0x3d   : > { %491 = vperm.xlu1 %4999, %v429_v26   ;;  %488 = vperm.xlu0 %4998, %v428_v27  }
  0x41   : > { %497 = vperm.xlu1 %4999, %v431_v28   ;;  %494 = vperm.xlu0 %4998, %v430_v29  }
  0x45   : > { %503 = vperm.xlu1 %4999, %v433_v30   ;;  %500 = vperm.xlu0 %4998, %v432_v31  }
  0x49   : > { %509 = vperm.xlu1 %4999, %v435_v32   ;;  %506 = vperm.xlu0 %4998, %v434_v33   ;;  %v5032_v32 = vld [vmem:[%s6633_s2 + $0xd0] sm:$0xff]  }
  0x4d   : > { %512 = vperm.xlu0 %4998, %v436_v34  }
  0x9c   : > { %v441_v40 = vpop.permute.xlu0 %440  ;;  %v447_v43 = vpop.permute.xlu1 %446 }
  0x9d   : > { %vm514_vm2 = vcmp.eq.s32.totalorder %v5412_v41, %v441_v40  ;;  %vm516_vm4 = vcmp.eq.s32.totalorder %v5412_v41, %v447_v43 }
  0xa0   : > { %v444_v42 = vpop.permute.xlu0 %443  ;;  %v450_v47 = vpop.permute.xlu1 %449 }
  0xa1   : > { %vm515_vm1 = vcmp.eq.s32.totalorder %v5412_v41, %v444_v42  ;;  %vm517_vm5 = vcmp.eq.s32.totalorder %v5412_v41, %v450_v47 }
  0xa2   : > { %vm3854_vm3 = vmpackc.low %vm515_vm1, %vm514_vm2 }
  0xa3   : > { %4283 = vmatmul.mubr.msk.bf16.vlgmr.msra.gmra.mrb[0].mxu0 %vm3854_vm3, %v5211_v45  ;;  %vm3856_vm6 = vmpackc.low %vm517_vm5, %vm516_vm4 }
  0xa4   : > { %4286 = vmatprep.mubr.msk.bf16.mxu0 %vm5210_vm0, %v5209_v2  ;;  %4403 = vmatpush3.bf16.msra.mxu0 %v5008_v44  ;;  %v456_v49 = vpop.permute.xlu1 %455  ;;  %v453_v50 = vpop.permute.xlu0 %452 }
  0xa5   : > { %4404 = vmatprep.subr.bf16.mxu0 %v5209_v2  ;;  %vm519_vm7 = vcmp.eq.s32.totalorder %v5412_v41, %v456_v49  ;;  %vm518_vm8 = vcmp.eq.s32.totalorder %v5412_v41, %v453_v50 }
  0xa6   : > { %vm3858_vm9 = vmpackc.low %vm519_vm7, %vm518_vm8 }
  0xa8   : > { %4405 = vmatpush3.bf16.msra.mxu0 %v5009_v46  ;;  %v462_v53 = vpop.permute.xlu1 %461  ;;  %v459_v54 = vpop.permute.xlu0 %458 }
  0xa9   : > { %4406 = vmatprep.subr.bf16.mxu0 %v5209_v2  ;;  %vm521_vm10 = vcmp.eq.s32.totalorder %v5412_v41, %v462_v53  ;;  %vm520_vm11 = vcmp.eq.s32.totalorder %v5412_v41, %v459_v54  ;;  %v5034_v54 = vld [vmem:[%s6633_s2 + $0xe0] sm:$0xff]  }
  0xaa   : > { %vm3860_vm12 = vmpackc.low %vm521_vm10, %vm520_vm11 }
  0xab   : > { %4287 = vmatmul.mubr.msk.bf16.gmra.mrb[4].mxu0 %vm3856_vm6, %v5211_v45 }
  0xac   : > { %4290 = vmatprep.mubr.msk.bf16.mxu0 %vm5210_vm0, %v5209_v2  ;;  %4407 = vmatpush3.bf16.msra.mxu0 %v5010_v48  ;;  %v468_v57 = vpop.permute.xlu1 %467  ;;  %v465_v58 = vpop.permute.xlu0 %464 }
  0xad   : > { %4408 = vmatprep.subr.bf16.mxu0 %v5209_v2  ;;  %vm523_vm13 = vcmp.eq.s32.totalorder %v5412_v41, %v468_v57  ;;  %vm522_vm14 = vcmp.eq.s32.totalorder %v5412_v41, %v465_v58  ;;  %v5025_v57 = vld [vmem:[%s6633_s2 + $0x88] sm:$0xff]  }
  0xae   : > { %vm3862_vm15 = vmpackc.low %vm523_vm13, %vm522_vm14 }
  0xb0   : > { %4409 = vmatpush3.bf16.msra.mxu0 %v5012_v51  ;;  %v474_v59 = vpop.permute.xlu1 %473  ;;  %v471_v60 = vpop.permute.xlu0 %470 }
  0xb1   : > { %4410 = vmatprep.subr.bf16.mxu0 %v5209_v2  ;;  %vm525_vm1 = vcmp.eq.s32.totalorder %v5412_v41, %v474_v59  ;;  %vm524_vm2 = vcmp.eq.s32.totalorder %v5412_v41, %v471_v60 }
  0xb2   : > { %vm3864_vm3 = vmpackc.low %vm525_vm1, %vm524_vm2 }
  0xb3   : > { %4291 = vmatmul.mubr.msk.bf16.gmra.mrb[8].mxu0 %vm3858_vm9, %v5211_v45 }
  0xb4   : > { %4294 = vmatprep.mubr.msk.bf16.mxu0 %vm5210_vm0, %v5209_v2  ;;  %4411 = vmatpush3.bf16.msra.mxu0 %v5014_v52  ;;  %v480_v61 = vpop.permute.xlu1 %479  ;;  %v477_v62 = vpop.permute.xlu0 %476 }
  0xb5   : > { %4412 = vmatprep.subr.bf16.mxu0 %v5209_v2  ;;  %vm527_vm4 = vcmp.eq.s32.totalorder %v5412_v41, %v480_v61  ;;  %vm526_vm5 = vcmp.eq.s32.totalorder %v5412_v41, %v477_v62 }
  0xb6   : > { %vm3866_vm6 = vmpackc.low %vm527_vm4, %vm526_vm5 }
  0xb8   : > { %4413 = vmatpush3.bf16.msra.mxu0 %v5016_v55  ;;  %v486_v63 = vpop.permute.xlu1 %485  ;;  %v483_v0 = vpop.permute.xlu0 %482 }
  0xb9   : > { %4414 = vmatprep.subr.bf16.mxu0 %v5209_v2  ;;  %vm529_vm7 = vcmp.eq.s32.totalorder %v5412_v41, %v486_v63  ;;  %vm528_vm8 = vcmp.eq.s32.totalorder %v5412_v41, %v483_v0  ;;  %v5036_v0 = vld [vmem:[%s6633_s2 + $0xe8] sm:$0xff]  }
  0xba   : > { %vm3868_vm9 = vmpackc.low %vm529_vm7, %vm528_vm8 }
  0xbb   : > { %4295 = vmatmul.mubr.msk.bf16.gmra.mrb[12].mxu0 %vm3860_vm12, %v5211_v45 }
  0xbc   : > { %4298 = vmatprep.mubr.msk.bf16.mxu0 %vm5210_vm0, %v5209_v2  ;;  %4415 = vmatpush3.bf16.msra.mxu0 %v5018_v56  ;;  %v492_v1 = vpop.permute.xlu1 %491  ;;  %v489_v3 = vpop.permute.xlu0 %488 }
  0xbd   : > { %4416 = vmatprep.subr.bf16.mxu0 %v5209_v2  ;;  %vm531_vm10 = vcmp.eq.s32.totalorder %v5412_v41, %v492_v1  ;;  %vm530_vm11 = vcmp.eq.s32.totalorder %v5412_v41, %v489_v3  ;;  %v5026_v3 = vld [vmem:[%s6633_s2 + $0x90] sm:$0xff]  }
  0xbe   : > { %vm3870_vm12 = vmpackc.low %vm531_vm10, %vm530_vm11  ;;  %vm1890_vm10 = vcmask 1045504   ;;  %vm822_vm11 = vsmask.f32 7424 }
  0xc0   : > { %v498_v4 = vpop.permute.xlu1 %497  ;;  %v495_v5 = vpop.permute.xlu0 %494  ;;  %4417 = vmatpush3.bf16.msra.mxu0 %v5020_v10 }
  0xc1   : > { %vm533_vm13 = vcmp.eq.s32.totalorder %v5412_v41, %v498_v4  ;;  %vm532_vm14 = vcmp.eq.s32.totalorder %v5412_v41, %v495_v5  ;;  %4538 = vmatprep.subr.bf16.mxu0 %v5209_v2 }
  0xc3   : > { %4299 = vmatmul.mubr.msk.bf16.gmra.mrb[16].mxu0 %vm3862_vm15, %v5211_v45  ;;  %vm3872_vm15 = vmpackc.low %vm533_vm13, %vm532_vm14 }
  0xc4   : > { %4302 = vmatprep.mubr.msk.bf16.mxu0 %vm5210_vm0, %v5209_v2  ;;  %v504_v6 = vpop.permute.xlu1 %503  ;;  %v501_v7 = vpop.permute.xlu0 %500 }
  0xc5   : > { %vm535_vm1 = vcmp.eq.s32.totalorder %v5412_v41, %v504_v6  ;;  %vm534_vm2 = vcmp.eq.s32.totalorder %v5412_v41, %v501_v7 }
  0xc8   : > { %v510_v8 = vpop.permute.xlu1 %509  ;;  %v507_v9 = vpop.permute.xlu0 %506 }
  0xc9   : > { %vm537_vm4 = vcmp.eq.s32.totalorder %v5412_v41, %v510_v8  ;;  %vm536_vm5 = vcmp.eq.s32.totalorder %v5412_v41, %v507_v9 }
  0xcb   : > { %4303 = vmatmul.mubr.msk.bf16.gmra.mrb[20].mxu0 %vm3864_vm3, %v5211_v45  ;;  %vm3874_vm3 = vmpackc.low %vm535_vm1, %vm534_vm2 }
  0xcc   : > { %4306 = vmatprep.mubr.msk.bf16.mxu0 %vm5210_vm0, %v5209_v2  ;;  %v513_v13 = vpop.permute.xlu0 %512 }
  0xcd   : > { %vm538_vm7 = vcmp.eq.s32.totalorder %v5412_v41, %v513_v13  ;;  %v5033_v41 = vld [vmem:[%s6633_s2 + $0xd8] sm:$0xff]   ;;  %v5037_v13 = vld [vmem:[%s6633_s2 + $0xf0] sm:$0xff]  }
  0xce   : > { %vm3878_vm8 = vmpackc.low %vm538_vm7, %vm538_vm7 }
  0xd3   : > { %4307 = vmatmul.mubr.msk.bf16.gmra.mrb[24].mxu0 %vm3866_vm6, %v5211_v45  ;;  %vm3876_vm6 = vmpackc.low %vm537_vm4, %vm536_vm5 }
  0xd4   : > { %4310 = vmatprep.mubr.msk.bf16.mxu0 %vm5210_vm0, %v5209_v2 }
  0xdb   : > { %4311 = vmatmul.mubr.msk.bf16.gmra.mrb[28].mxu0 %vm3868_vm9, %v5211_v45  ;;  %vm1336_vm9 = vcmask 1046528  }
  0xdc   : > { %4314 = vmatprep.mubr.msk.bf16.mxu0 %vm5210_vm0, %v5209_v2 }
  0xe3   : > { %4315 = vmatmul.mubr.msk.bf16.gmra.mrb[32].mxu0 %vm3870_vm12, %v5211_v45  ;;  %vm1600_vm12 = vsmask.f32 6400 }
  0xe4   : > { %4318 = vmatprep.mubr.msk.bf16.mxu0 %vm5210_vm0, %v5209_v2 }
  0xeb   : > { %4319 = vmatmul.mubr.msk.bf16.gmra.mrb[36].mxu0 %vm3872_vm15, %v5211_v45 }
  0xec   : > { %4322 = vmatprep.mubr.msk.bf16.mxu0 %vm5210_vm0, %v5209_v2 }
  0xf3   : > { %4323 = vmatmul.mubr.msk.bf16.gmra.mrb[40].mxu0 %vm3874_vm3, %v5211_v45 }
  0xf4   : > { %4326 = vmatprep.mubr.msk.bf16.mxu0 %vm5210_vm0, %v5209_v2 }
  0xfb   : > { %4327 = vmatmul.mubr.msk.bf16.gmra.mrb[44].mxu0 %vm3876_vm6, %v5211_v45 }
  0xfc   : > { %4330 = vmatprep.mubr.msk.bf16.mxu0 %vm5210_vm0, %v5209_v2 }
 0x103   : > { %4331 = vmatmul.mubr.msk.bf16.gmra.mrb[48].mxu0 %vm3878_vm8, %v5211_v45  ;;  %v5024_v45 = vld [vmem:[%s6633_s2 + $0x80] sm:$0xff]  }
 0x104   : > { %4418 = vmatprep.mubr.msk.bf16.mxu0 %vm5210_vm0, %v5209_v2 }
 0x176   : > { %v675_v16 = vpop.f32.mrb[0].mxu0 }
 0x177   : > { %v4284_v17 = vpop.f32.mrb[1].mxu0 }
 0x178   : > { %v678_v18 = vpop.f32.mrb[2].mxu0 }
 0x179   : > { %v777_v20 = vpack.c.bf16 %v678_v18, %v675_v16  ;;  %v4285_v21 = vpop.f32.mrb[3].mxu0  ;;  %v5027_v16 = vld [vmem:[%s6633_s2 + $0x98] sm:$0xff]  }
 0x17b   : > { %4419 = vmatmul.mubr.bf16.vlgmr.msra.gmra.mrb[52].mxu0 %v777_v20  ;;  %v824_v22 = vshrl.u32 %v777_v20, 16  ;;  %v826_v23 = vshll.u32 %v777_v20, 16  ;;  %v1337_v35 = vrot.slane %v777_v20, 1  ;;  %v1891_v42 = vrot.slane %v777_v20, 2 }
 0x17c   : > { %4422 = vmatprep.mubr.msk.bf16.mxu0 %vm5210_vm0, %v5209_v2  ;;  %4539 = vmatpush3.bf16.msra.mxu0 %v5029_v19 }
 0x17d   : > { %v1601_v25 = vrot.slane %v824_v22, 1  ;;  %4540 = vmatprep.subr.bf16.mxu0 %v5209_v2  ;;  %v1602_v26 = vrot.slane %v826_v23, 2  ;;  %v828_v31 = vrot.slane %v826_v23, 1  ;;  %v5038_v23 = vld [vmem:[%s6633_s2 + $0xf8] sm:$0xff]  }
 0x17e   : > { %v683_v27 = vpop.f32.mrb[4].mxu0 }
 0x17f   : > { %v4288_v28 = vpop.f32.mrb[5].mxu0  ;;  %v1603_v29 = vor.u32 %v1602_v26, %v1601_v25  ;;  %v829_v40 = vor.u32 %v828_v31, %v824_v22  ;;  %v5028_v25 = vld [vmem:[%s6633_s2 + $0xa0] sm:$0xff]  }
 0x180   : > { %v686_v30 = vpop.f32.mrb[6].mxu0  ;;  %4541 = vmatpush3.bf16.msra.mxu0 %v5030_v24 }
 0x181   : > { %v778_v33 = vpack.c.bf16 %v686_v30, %v683_v27  ;;  %v4289_v34 = vpop.f32.mrb[7].mxu0  ;;  %4542 = vmatprep.subr.bf16.mxu0 %v5209_v2 }
 0x183   : > { %4423 = vmatmul.mubr.bf16.gmra.mrb[56].mxu0 %v778_v33  ;;  %v831_v36 = vshll.u32 %v778_v33, 16  ;;  %v835_v37 = vshrl.u32 %v778_v33, 16  ;;  %v1338_v38 = vrot.slane %v778_v33, 1  ;;  %v1892_v39 = vrot.slane %v778_v33, 2 }
 0x184   : > { %4426 = vmatprep.mubr.msk.bf16.mxu0 %vm5210_vm0, %v5209_v2  ;;  %4543 = vmatpush3.bf16.msra.mxu0 %v5032_v32 }
 0x185   : > { %v833_v43 = vrot.slane %v831_v36, 1  ;;  %v1605_v44 = vrot.slane %v831_v36, 2  ;;  %v1604_v46 = vrot.slane %v835_v37, 1  ;;  %4544 = vmatprep.subr.bf16.mxu0 %v5209_v2  ;;  %v5549_v47 = vsel %vm1336_vm9, %v1337_v35, %v1338_v38 }
 0x186   : > { %v691_v48 = vpop.f32.mrb[8].mxu0  ;;  %v5552_v49 = vsel %vm1890_vm10, %v1891_v42, %v1892_v39 }
 0x187   : > { %v4292_v50 = vpop.f32.mrb[9].mxu0  ;;  %v834_v51 = vsel %vm822_vm11, %v829_v40, %v833_v43  ;;  %v1606_v52 = vor.u32 %v1605_v44, %v1604_v46  ;;  %v837_v63 = vor.u32 %v835_v37, %v833_v43  ;;  %v5031_v37 = vld [vmem:[%s6633_s2 + $0xa8] sm:$0xff]  }
 0x188   : > { %v694_v53 = vpop.f32.mrb[10].mxu0  ;;  %4351 = vmatmul.mubr.bf16.vlgmr.msra.gmra.mrb[0].mxu1 %v834_v51  ;;  %4545 = vmatpush3.bf16.msra.mxu0 %v5033_v41 }
 0x189   : > { %v779_v55 = vpack.c.bf16 %v694_v53, %v691_v48  ;;  %4471 = vmatpush3.bf16.msra.mxu1 %v5024_v45  ;;  %v4293_v56 = vpop.f32.mrb[11].mxu0  ;;  %4354 = vmatprep.mubr.msk.bf16.mxu1 %vm5210_vm0, %v5209_v2  ;;  %v5564_v58 = vsel %vm1600_vm12, %v1603_v29, %v1606_v52  ;;  %v5035_v45 = vld [vmem:[%s6633_s2 + $0xb0] sm:$0xff]  }
 0x18a   : > { %4472 = vmatprep.subr.bf16.mxu1 %v5209_v2  ;;  %4546 = vmatprep.subr.bf16.mxu0 %v5209_v2 }
 0x18b   : > { %4427 = vmatmul.mubr.bf16.gmra.mrb[60].mxu0 %v779_v55  ;;  %v839_v59 = vshll.u32 %v779_v55, 16  ;;  %v843_v60 = vshrl.u32 %v779_v55, 16  ;;  %v1340_v61 = vrot.slane %v779_v55, 1  ;;  %v1894_v62 = vrot.slane %v779_v55, 2 }
 0x18c   : > { %4430 = vmatprep.mubr.msk.bf16.mxu0 %vm5210_vm0, %v5209_v2  ;;  %4547 = vmatpush3.bf16.msra.mxu0 %v5034_v54 }
 0x18d   : > { %v841_v1 = vrot.slane %v839_v59, 1  ;;  %4473 = vmatpush3.bf16.msra.mxu1 %v5025_v57  ;;  %4548 = vmatprep.subr.bf16.mxu0 %v5209_v2  ;;  %v1608_v4 = vrot.slane %v843_v60, 1  ;;  %v1609_v5 = vrot.slane %v839_v59, 2  ;;  %v5578_v6 = vsel %vm1336_vm9, %v1338_v38, %v1340_v61 }
 0x18e   : > { %v699_v7 = vpop.f32.mrb[12].mxu0  ;;  %4474 = vmatprep.subr.bf16.mxu1 %v5209_v2  ;;  %v5582_v8 = vsel %vm1890_vm10, %v1892_v39, %v1894_v62 }
 0x18f   : > { %v4296_v9 = vpop.f32.mrb[13].mxu0  ;;  %v842_v10 = vsel %vm822_vm11, %v837_v63, %v841_v1  ;;  %v1610_v11 = vor.u32 %v1609_v5, %v1608_v4  ;;  %v845_v22 = vor.u32 %v843_v60, %v841_v1  ;;  %v5039_v60 = vld [vmem:[%s6633_s2 + $0xb8] sm:$0xff]  }
 0x190   : > { %v702_v12 = vpop.f32.mrb[14].mxu0  ;;  %4355 = vmatmul.mubr.bf16.gmra.mrb[4].mxu1 %v842_v10  ;;  %4549 = vmatpush3.bf16.msra.mxu0 %v5036_v0 }
 0x191   : > { %v780_v14 = vpack.c.bf16 %v702_v12, %v699_v7  ;;  %v4297_v15 = vpop.f32.mrb[15].mxu0  ;;  %4358 = vmatprep.mubr.msk.bf16.mxu1 %vm5210_vm0, %v5209_v2  ;;  %4475 = vmatpush3.bf16.msra.mxu1 %v5026_v3  ;;  %v5594_v17 = vsel %vm1600_vm12, %v1606_v52, %v1610_v11 }
 0x192   : > { %4476 = vmatprep.subr.bf16.mxu1 %v5209_v2  ;;  %4550 = vmatprep.subr.bf16.mxu0 %v5209_v2 }
 0x193   : > { %4431 = vmatmul.mubr.bf16.gmra.mrb[64].mxu0 %v780_v14  ;;  %v847_v18 = vshll.u32 %v780_v14, 16  ;;  %v851_v19 = vshrl.u32 %v780_v14, 16  ;;  %v1342_v20 = vrot.slane %v780_v14, 1  ;;  %v1896_v21 = vrot.slane %v780_v14, 2 }
 0x194   : > { %4434 = vmatprep.mubr.msk.bf16.mxu0 %vm5210_vm0, %v5209_v2  ;;  %4551 = vmatpush3.bf16.msra.mxu0 %v5037_v13 }
 0x195   : > { %v849_v24 = vrot.slane %v847_v18, 1  ;;  %4477 = vmatpush3.bf16.msra.mxu1 %v5027_v16  ;;  %4552 = vmatprep.subr.bf16.mxu0 %v5209_v2  ;;  %v1612_v26 = vrot.slane %v851_v19, 1  ;;  %v1613_v27 = vrot.slane %v847_v18, 2  ;;  %v5608_v28 = vsel %vm1336_vm9, %v1340_v61, %v1342_v20 }
 0x196   : > { %v707_v29 = vpop.f32.mrb[16].mxu0  ;;  %4478 = vmatprep.subr.bf16.mxu1 %v5209_v2  ;;  %v5612_v30 = vsel %vm1890_vm10, %v1894_v62, %v1896_v21 }
 0x197   : > { %v4300_v31 = vpop.f32.mrb[17].mxu0  ;;  %v850_v32 = vsel %vm822_vm11, %v845_v22, %v849_v24  ;;  %v1614_v33 = vor.u32 %v1613_v27, %v1612_v26  ;;  %v853_v43 = vor.u32 %v851_v19, %v849_v24 }
 0x198   : > { %v710_v34 = vpop.f32.mrb[18].mxu0  ;;  %4359 = vmatmul.mubr.bf16.gmra.mrb[8].mxu1 %v850_v32  ;;  %4553 = vmatpush3.bf16.msra.mxu0 %v5038_v23 }
 0x199   : > { %v781_v35 = vpack.c.bf16 %v710_v34, %v707_v29  ;;  %v4301_v36 = vpop.f32.mrb[19].mxu0  ;;  %4362 = vmatprep.mubr.msk.bf16.mxu1 %vm5210_vm0, %v5209_v2  ;;  %4479 = vmatpush3.bf16.msra.mxu1 %v5028_v25  ;;  %v5621_v38 = vsel %vm1600_vm12, %v1610_v11, %v1614_v33 }
 0x19a   : > { %4480 = vmatprep.subr.bf16.mxu1 %v5209_v2  ;;  %4674 = vmatprep.subr.bf16.mxu0 %v5209_v2 }
 0x19b   : > { %4435 = vmatmul.mubr.bf16.gmra.mrb[68].mxu0 %v781_v35  ;;  %v855_v39 = vshll.u32 %v781_v35, 16  ;;  %v859_v40 = vshrl.u32 %v781_v35, 16  ;;  %v1344_v41 = vrot.slane %v781_v35, 1  ;;  %v1898_v42 = vrot.slane %v781_v35, 2 }
 0x19c   : > { %4438 = vmatprep.mubr.msk.bf16.mxu0 %vm5210_vm0, %v5209_v2 }
 0x19d   : > { %v857_v44 = vrot.slane %v855_v39, 1  ;;  %4481 = vmatpush3.bf16.msra.mxu1 %v5031_v37  ;;  %v1616_v46 = vrot.slane %v859_v40, 1  ;;  %v1617_v48 = vrot.slane %v855_v39, 2  ;;  %v5631_v50 = vsel %vm1336_vm9, %v1342_v20, %v1344_v41 }
 0x19e   : > { %v715_v51 = vpop.f32.mrb[20].mxu0  ;;  %4482 = vmatprep.subr.bf16.mxu1 %v5209_v2  ;;  %v5635_v52 = vsel %vm1890_vm10, %v1896_v21, %v1898_v42 }
 0x19f   : > { %v4304_v53 = vpop.f32.mrb[21].mxu0  ;;  %v858_v54 = vsel %vm822_vm11, %v853_v43, %v857_v44  ;;  %v1618_v55 = vor.u32 %v1617_v48, %v1616_v46  ;;  %v861_v3 = vor.u32 %v859_v40, %v857_v44 }
 0x1a0   : > { %v718_v56 = vpop.f32.mrb[22].mxu0  ;;  %4363 = vmatmul.mubr.bf16.gmra.mrb[12].mxu1 %v858_v54 }
 0x1a1   : > { %v782_v57 = vpack.c.bf16 %v718_v56, %v715_v51  ;;  %v4305_v59 = vpop.f32.mrb[23].mxu0  ;;  %4366 = vmatprep.mubr.msk.bf16.mxu1 %vm5210_vm0, %v5209_v2  ;;  %4483 = vmatpush3.bf16.msra.mxu1 %v5035_v45  ;;  %v5644_v61 = vsel %vm1600_vm12, %v1614_v33, %v1618_v55 }
 0x1a2   : > { %4484 = vmatprep.subr.bf16.mxu1 %v5209_v2 }
 0x1a3   : > { %4439 = vmatmul.mubr.bf16.gmra.mrb[72].mxu0 %v782_v57  ;;  %v863_v62 = vshll.u32 %v782_v57, 16  ;;  %v867_v63 = vshrl.u32 %v782_v57, 16  ;;  %v1346_v0 = vrot.slane %v782_v57, 1  ;;  %v1900_v1 = vrot.slane %v782_v57, 2 }
 0x1a4   : > { %4442 = vmatprep.mubr.msk.bf16.mxu0 %vm5210_vm0, %v5209_v2 }
 0x1a5   : > { %v865_v4 = vrot.slane %v863_v62, 1  ;;  %4485 = vmatpush3.bf16.msra.mxu1 %v5039_v60  ;;  %v1620_v5 = vrot.slane %v867_v63, 1  ;;  %v1621_v7 = vrot.slane %v863_v62, 2  ;;  %v5650_v9 = vsel %vm1336_vm9, %v1344_v41, %v1346_v0 }
 0x1a6   : > { %v723_v10 = vpop.f32.mrb[24].mxu0  ;;  %4606 = vmatprep.subr.bf16.mxu1 %v5209_v2  ;;  %v5654_v11 = vsel %vm1890_vm10, %v1898_v42, %v1900_v1 }
 0x1a7   : > { %v4308_v12 = vpop.f32.mrb[25].mxu0  ;;  %v866_v13 = vsel %vm822_vm11, %v861_v3, %v865_v4  ;;  %v1622_v14 = vor.u32 %v1621_v7, %v1620_v5  ;;  %v869_v24 = vor.u32 %v867_v63, %v865_v4 }
 0x1a8   : > { %v726_v15 = vpop.f32.mrb[26].mxu0  ;;  %4367 = vmatmul.mubr.bf16.gmra.mrb[16].mxu1 %v866_v13 }
 0x1a9   : > { %v783_v16 = vpack.c.bf16 %v726_v15, %v723_v10  ;;  %v4309_v18 = vpop.f32.mrb[27].mxu0  ;;  %4370 = vmatprep.mubr.msk.bf16.mxu1 %vm5210_vm0, %v5209_v2  ;;  %v5660_v19 = vsel %vm1600_vm12, %v1618_v55, %v1622_v14 }
 0x1ab   : > { %4443 = vmatmul.mubr.bf16.gmra.mrb[76].mxu0 %v783_v16  ;;  %v871_v20 = vshll.u32 %v783_v16, 16  ;;  %v875_v21 = vshrl.u32 %v783_v16, 16  ;;  %v1348_v22 = vrot.slane %v783_v16, 1  ;;  %v1902_v23 = vrot.slane %v783_v16, 2 }
 0x1ac   : > { %4446 = vmatprep.mubr.msk.bf16.mxu0 %vm5210_vm0, %v5209_v2 }
 0x1ad   : > { %v873_v25 = vrot.slane %v871_v20, 1  ;;  %v1624_v26 = vrot.slane %v875_v21, 1  ;;  %v1625_v27 = vrot.slane %v871_v20, 2  ;;  %v5665_v29 = vsel %vm1336_vm9, %v1346_v0, %v1348_v22 }
 0x1ae   : > { %v731_v31 = vpop.f32.mrb[28].mxu0  ;;  %v5668_v32 = vsel %vm1890_vm10, %v1900_v1, %v1902_v23 }
 0x1af   : > { %v4312_v33 = vpop.f32.mrb[29].mxu0  ;;  %v874_v34 = vsel %vm822_vm11, %v869_v24, %v873_v25  ;;  %v1626_v35 = vor.u32 %v1625_v27, %v1624_v26  ;;  %v877_v45 = vor.u32 %v875_v21, %v873_v25 }
 0x1b0   : > { %v734_v36 = vpop.f32.mrb[30].mxu0  ;;  %4371 = vmatmul.mubr.bf16.gmra.mrb[20].mxu1 %v874_v34 }
 0x1b1   : > { %v784_v37 = vpack.c.bf16 %v734_v36, %v731_v31  ;;  %v4313_v39 = vpop.f32.mrb[31].mxu0  ;;  %4374 = vmatprep.mubr.msk.bf16.mxu1 %vm5210_vm0, %v5209_v2  ;;  %v5674_v40 = vsel %vm1600_vm12, %v1622_v14, %v1626_v35 }
 0x1b3   : > { %4447 = vmatmul.mubr.bf16.gmra.mrb[80].mxu0 %v784_v37  ;;  %v879_v41 = vshll.u32 %v784_v37, 16  ;;  %v883_v42 = vshrl.u32 %v784_v37, 16  ;;  %v1350_v43 = vrot.slane %v784_v37, 1  ;;  %v1904_v44 = vrot.slane %v784_v37, 2 }
 0x1b4   : > { %4450 = vmatprep.mubr.msk.bf16.mxu0 %vm5210_vm0, %v5209_v2 }
 0x1b5   : > { %v881_v46 = vrot.slane %v879_v41, 1  ;;  %v1628_v48 = vrot.slane %v883_v42, 1  ;;  %v1629_v51 = vrot.slane %v879_v41, 2  ;;  %v5679_v53 = vsel %vm1336_vm9, %v1348_v22, %v1350_v43 }
 0x1b6   : > { %v739_v54 = vpop.f32.mrb[32].mxu0  ;;  %v5682_v55 = vsel %vm1890_vm10, %v1902_v23, %v1904_v44 }
 0x1b7   : > { %v4316_v56 = vpop.f32.mrb[33].mxu0  ;;  %v882_v57 = vsel %vm822_vm11, %v877_v45, %v881_v46  ;;  %v1630_v59 = vor.u32 %v1629_v51, %v1628_v48  ;;  %v885_v7 = vor.u32 %v883_v42, %v881_v46 }
 0x1b8   : > { %v742_v60 = vpop.f32.mrb[34].mxu0  ;;  %4375 = vmatmul.mubr.bf16.gmra.mrb[24].mxu1 %v882_v57 }
 0x1b9   : > { %v785_v62 = vpack.c.bf16 %v742_v60, %v739_v54  ;;  %v4317_v63 = vpop.f32.mrb[35].mxu0  ;;  %4378 = vmatprep.mubr.msk.bf16.mxu1 %vm5210_vm0, %v5209_v2  ;;  %v5688_v0 = vsel %vm1600_vm12, %v1626_v35, %v1630_v59 }
 0x1bb   : > { %4451 = vmatmul.mubr.bf16.gmra.mrb[84].mxu0 %v785_v62  ;;  %v887_v1 = vshll.u32 %v785_v62, 16  ;;  %v891_v3 = vshrl.u32 %v785_v62, 16  ;;  %v1352_v4 = vrot.slane %v785_v62, 1  ;;  %v1906_v5 = vrot.slane %v785_v62, 2 }
 0x1bc   : > { %4454 = vmatprep.mubr.msk.bf16.mxu0 %vm5210_vm0, %v5209_v2 }
 0x1bd   : > { %v889_v10 = vrot.slane %v887_v1, 1  ;;  %v1632_v12 = vrot.slane %v891_v3, 1  ;;  %v1633_v13 = vrot.slane %v887_v1, 2  ;;  %v5693_v14 = vsel %vm1336_vm9, %v1350_v43, %v1352_v4 }
 0x1be   : > { %v747_v15 = vpop.f32.mrb[36].mxu0  ;;  %v5696_v16 = vsel %vm1890_vm10, %v1904_v44, %v1906_v5 }
 0x1bf   : > { %v4320_v18 = vpop.f32.mrb[37].mxu0  ;;  %v890_v20 = vsel %vm822_vm11, %v885_v7, %v889_v10  ;;  %v1634_v21 = vor.u32 %v1633_v13, %v1632_v12  ;;  %v893_v34 = vor.u32 %v891_v3, %v889_v10 }
 0x1c0   : > { %v750_v22 = vpop.f32.mrb[38].mxu0  ;;  %4379 = vmatmul.mubr.bf16.gmra.mrb[28].mxu1 %v890_v20 }
 0x1c1   : > { %v786_v23 = vpack.c.bf16 %v750_v22, %v747_v15  ;;  %v4321_v24 = vpop.f32.mrb[39].mxu0  ;;  %4382 = vmatprep.mubr.msk.bf16.mxu1 %vm5210_vm0, %v5209_v2  ;;  %v5702_v25 = vsel %vm1600_vm12, %v1630_v59, %v1634_v21 }
 0x1c3   : > { %4455 = vmatmul.mubr.bf16.gmra.mrb[88].mxu0 %v786_v23  ;;  %v895_v26 = vshll.u32 %v786_v23, 16  ;;  %v899_v27 = vshrl.u32 %v786_v23, 16  ;;  %v1354_v31 = vrot.slane %v786_v23, 1  ;;  %v1908_v33 = vrot.slane %v786_v23, 2 }
 0x1c4   : > { %4458 = vmatprep.mubr.msk.bf16.mxu0 %vm5210_vm0, %v5209_v2 }
 0x1c5   : > { %v897_v35 = vrot.slane %v895_v26, 1  ;;  %v1636_v36 = vrot.slane %v899_v27, 1  ;;  %v1637_v37 = vrot.slane %v895_v26, 2  ;;  %v5707_v39 = vsel %vm1336_vm9, %v1352_v4, %v1354_v31 }
 0x1c6   : > { %v755_v41 = vpop.f32.mrb[40].mxu0  ;;  %v5710_v42 = vsel %vm1890_vm10, %v1906_v5, %v1908_v33 }
 0x1c7   : > { %v4324_v43 = vpop.f32.mrb[41].mxu0  ;;  %v898_v44 = vsel %vm822_vm11, %v893_v34, %v897_v35  ;;  %v1638_v45 = vor.u32 %v1637_v37, %v1636_v36  ;;  %v901_v62 = vor.u32 %v899_v27, %v897_v35 }
 0x1c8   : > { %v758_v46 = vpop.f32.mrb[42].mxu0  ;;  %4383 = vmatmul.mubr.bf16.gmra.mrb[32].mxu1 %v898_v44 }
 0x1c9   : > { %v787_v48 = vpack.c.bf16 %v758_v46, %v755_v41  ;;  %v4325_v51 = vpop.f32.mrb[43].mxu0  ;;  %4386 = vmatprep.mubr.msk.bf16.mxu1 %vm5210_vm0, %v5209_v2  ;;  %v5716_v54 = vsel %vm1600_vm12, %v1634_v21, %v1638_v45 }
 0x1cb   : > { %4459 = vmatmul.mubr.bf16.gmra.mrb[92].mxu0 %v787_v48  ;;  %v903_v56 = vshll.u32 %v787_v48, 16  ;;  %v907_v57 = vshrl.u32 %v787_v48, 16  ;;  %v1356_v59 = vrot.slane %v787_v48, 1  ;;  %v1910_v60 = vrot.slane %v787_v48, 2 }
 0x1cc   : > { %4462 = vmatprep.mubr.msk.bf16.mxu0 %vm5210_vm0, %v5209_v2 }
 0x1cd   : > { %v905_v63 = vrot.slane %v903_v56, 1  ;;  %v1640_v1 = vrot.slane %v907_v57, 1  ;;  %v1641_v3 = vrot.slane %v903_v56, 2  ;;  %v5721_v4 = vsel %vm1336_vm9, %v1354_v31, %v1356_v59 }
 0x1ce   : > { %v763_v5 = vpop.f32.mrb[44].mxu0  ;;  %v5724_v7 = vsel %vm1890_vm10, %v1908_v33, %v1910_v60 }
 0x1cf   : > { %v4328_v10 = vpop.f32.mrb[45].mxu0  ;;  %v906_v12 = vsel %vm822_vm11, %v901_v62, %v905_v63  ;;  %v1642_v13 = vor.u32 %v1641_v3, %v1640_v1  ;;  %v909_v27 = vor.u32 %v907_v57, %v905_v63 }
 0x1d0   : > { %v766_v15 = vpop.f32.mrb[46].mxu0  ;;  %4387 = vmatmul.mubr.bf16.gmra.mrb[36].mxu1 %v906_v12 }
 0x1d1   : > { %v788_v18 = vpack.c.bf16 %v766_v15, %v763_v5  ;;  %v4329_v20 = vpop.f32.mrb[47].mxu0  ;;  %4390 = vmatprep.mubr.msk.bf16.mxu1 %vm5210_vm0, %v5209_v2  ;;  %v5730_v21 = vsel %vm1600_vm12, %v1638_v45, %v1642_v13 }
 0x1d2   : > { %v5040_v20 = vld [vmem:[%s6633_s2 + $0x100] sm:$0xff]  }
 0x1d3   : > { %4463 = vmatmul.mubr.bf16.gmra.mrb[96].mxu0 %v788_v18  ;;  %v911_v22 = vshll.u32 %v788_v18, 16  ;;  %v915_v23 = vshrl.u32 %v788_v18, 16  ;;  %v1358_v24 = vrot.slane %v788_v18, 1  ;;  %v1912_v26 = vrot.slane %v788_v18, 2 }
 0x1d4   : > { %4466 = vmatprep.mubr.msk.bf16.mxu0 %vm5210_vm0, %v5209_v2 }
 0x1d5   : > { %v913_v31 = vrot.slane %v911_v22, 1  ;;  %v1644_v33 = vrot.slane %v915_v23, 1  ;;  %v1645_v34 = vrot.slane %v911_v22, 2  ;;  %v5735_v35 = vsel %vm1336_vm9, %v1356_v59, %v1358_v24 }
 0x1d6   : > { %v771_v36 = vpop.f32.mrb[48].mxu0  ;;  %v5738_v37 = vsel %vm1890_vm10, %v1910_v60, %v1912_v26 }
 0x1d7   : > { %v5740_v41 = vpack.c.bf16 %v771_v36, %v771_v36  ;;  %v4332_v43 = vpop.f32.mrb[49].mxu0  ;;  %v914_v44 = vsel %vm822_vm11, %v909_v27, %v913_v31  ;;  %v1646_v45 = vor.u32 %v1645_v34, %v1644_v33  ;;  %v917_v60 = vor.u32 %v915_v23, %v913_v31 }
 0x1d8   : > { %v774_v46 = vpop.f32.mrb[50].mxu0  ;;  %4391 = vmatmul.mubr.bf16.gmra.mrb[40].mxu1 %v914_v44 }
 0x1d9   : > { %v4333_v48 = vpop.f32.mrb[51].mxu0  ;;  %4394 = vmatprep.mubr.msk.bf16.mxu1 %vm5210_vm0, %v5209_v2  ;;  %v919_v51 = vshll.u32 %v5740_v41, 16  ;;  %v923_v56 = vshrl.u32 %v5740_v41, 16  ;;  %v5748_v57 = vsel %vm1600_vm12, %v1642_v13, %v1646_v45  ;;  %v1360_v59 = vrot.slane %v5740_v41, 1 }
 0x1da   : > { %v1914_v62 = vrot.slane %v5740_v41, 2 }
 0x1db   : > { %4467 = vmatmul.mubr.bf16.gmra.mrb[100].mxu0 %v5740_v41  ;;  %v921_v63 = vrot.slane %v919_v51, 1  ;;  %v1648_v1 = vrot.slane %v923_v56, 1  ;;  %v1649_v3 = vrot.slane %v919_v51, 2  ;;  %v5756_v5 = vsel %vm1336_vm9, %v1358_v24, %v1360_v59 }
 0x1dc   : > { %4554 = vmatprep.mubr.msk.bf16.mxu0 %vm5210_vm0, %v5209_v2  ;;  %v5763_v10 = vsel %vm1890_vm10, %v1912_v26, %v1914_v62 }
 0x1dd   : > { %v922_v12 = vsel %vm822_vm11, %v917_v60, %v921_v63  ;;  %v5766_v13 = vor.u32 %v1649_v3, %v1648_v1  ;;  %v925_v18 = vor.u32 %v923_v56, %v921_v63 }
 0x1df   : > { %v5770_v15 = vsel %vm1600_vm12, %v1646_v45, %v5766_v13 }
 0x1e0   : > { %4395 = vmatmul.mubr.bf16.gmra.mrb[44].mxu1 %v922_v12 }
 0x1e1   : > { %4398 = vmatprep.mubr.msk.bf16.mxu1 %vm5210_vm0, %v5209_v2 }
 0x1e3   : > { %4555 = vmatmul.mubr.bf16.vlgmr.msra.gmra.mrb[104].mxu0 %v5564_v58  ;;  %v5041_v58 = vld [vmem:[%s6633_s2 + $0x108] sm:$0xff]  }
 0x1e4   : > { %4558 = vmatprep.mubr.msk.bf16.mxu0 %vm5210_vm0, %v5209_v2 }
 0x1e8   : > { %4399 = vmatmul.mubr.bf16.gmra.mrb[48].mxu1 %v925_v18 }
 0x1e9   : > { %4486 = vmatprep.mubr.msk.bf16.mxu1 %vm5210_vm0, %v5209_v2 }
 0x1eb   : > { %4559 = vmatmul.mubr.bf16.gmra.mrb[108].mxu0 %v5594_v17  ;;  %v5043_v17 = vld [vmem:[%s6633_s2 + $0x118] sm:$0xff]  }
 0x1ec   : > { %4562 = vmatprep.mubr.msk.bf16.mxu0 %vm5210_vm0, %v5209_v2 }
 0x1f0   : > { %4487 = vmatmul.mubr.bf16.vlgmr.msra.gmra.mrb[52].mxu1 %v5549_v47  ;;  %v5042_v47 = vld [vmem:[%s6633_s2 + $0x110] sm:$0xff]  }
 0x1f1   : > { %4607 = vmatpush3.bf16.msra.mxu1 %v5040_v20  ;;  %4490 = vmatprep.mubr.msk.bf16.mxu1 %vm5210_vm0, %v5209_v2 }
 0x1f2   : > { %4608 = vmatprep.subr.bf16.mxu1 %v5209_v2 }
 0x1f3   : > { %4563 = vmatmul.mubr.bf16.gmra.mrb[112].mxu0 %v5621_v38  ;;  %v5045_v38 = vld [vmem:[%s6633_s2 + $0x128] sm:$0xff]  }
 0x1f4   : > { %4566 = vmatprep.mubr.msk.bf16.mxu0 %vm5210_vm0, %v5209_v2 }
 0x1f5   : > { %4609 = vmatpush3.bf16.msra.mxu1 %v5041_v58 }
 0x1f6   : > { %4610 = vmatprep.subr.bf16.mxu1 %v5209_v2 }
 0x1f8   : > { %4491 = vmatmul.mubr.bf16.gmra.mrb[56].mxu1 %v5578_v6  ;;  %v5044_v6 = vld [vmem:[%s6633_s2 + $0x120] sm:$0xff]  }
 0x1f9   : > { %4494 = vmatprep.mubr.msk.bf16.mxu1 %vm5210_vm0, %v5209_v2  ;;  %4611 = vmatpush3.bf16.msra.mxu1 %v5042_v47 }
 0x1fa   : > { %4612 = vmatprep.subr.bf16.mxu1 %v5209_v2 }
 0x1fb   : > { %4567 = vmatmul.mubr.bf16.gmra.mrb[116].mxu0 %v5644_v61  ;;  %v5047_v61 = vld [vmem:[%s6633_s2 + $0x138] sm:$0xff]  }
 0x1fc   : > { %4570 = vmatprep.mubr.msk.bf16.mxu0 %vm5210_vm0, %v5209_v2 }
 0x1fd   : > { %4613 = vmatpush3.bf16.msra.mxu1 %v5043_v17 }
 0x1fe   : > { %4614 = vmatprep.subr.bf16.mxu1 %v5209_v2 }
 0x200   : > { %4495 = vmatmul.mubr.bf16.gmra.mrb[60].mxu1 %v5608_v28  ;;  %v5046_v28 = vld [vmem:[%s6633_s2 + $0x130] sm:$0xff]  }
 0x201   : > { %4498 = vmatprep.mubr.msk.bf16.mxu1 %vm5210_vm0, %v5209_v2  ;;  %4615 = vmatpush3.bf16.msra.mxu1 %v5044_v6 }
 0x202   : > { %4616 = vmatprep.subr.bf16.mxu1 %v5209_v2 }
 0x203   : > { %4571 = vmatmul.mubr.bf16.gmra.mrb[120].mxu0 %v5660_v19 }
 0x204   : > { %4574 = vmatprep.mubr.msk.bf16.mxu0 %vm5210_vm0, %v5209_v2 }
 0x205   : > { %4617 = vmatpush3.bf16.msra.mxu1 %v5045_v38 }
 0x206   : > { %4618 = vmatprep.subr.bf16.mxu1 %v5209_v2 }
 0x208   : > { %4499 = vmatmul.mubr.bf16.gmra.mrb[64].mxu1 %v5631_v50 }
 0x209   : > { %4502 = vmatprep.mubr.msk.bf16.mxu1 %vm5210_vm0, %v5209_v2  ;;  %4619 = vmatpush3.bf16.msra.mxu1 %v5046_v28 }
 0x20a   : > { %4620 = vmatprep.subr.bf16.mxu1 %v5209_v2 }
 0x20b   : > { %4575 = vmatmul.mubr.bf16.gmra.mrb[124].mxu0 %v5674_v40 }
 0x20c   : > { %4578 = vmatprep.mubr.msk.bf16.mxu0 %vm5210_vm0, %v5209_v2 }
 0x20d   : > { %4621 = vmatpush3.bf16.msra.mxu1 %v5047_v61 }
 0x20e   : > { %4702 = vmatprep.subr.bf16.mxu1 %v5209_v2 }
 0x210   : > { %4503 = vmatmul.mubr.bf16.gmra.mrb[68].mxu1 %v5650_v9 }
 0x211   : > { %4506 = vmatprep.mubr.msk.bf16.mxu1 %vm5210_vm0, %v5209_v2 }
 0x213   : > { %4579 = vmatmul.mubr.bf16.gmra.mrb[128].mxu0 %v5688_v0 }
 0x214   : > { %4582 = vmatprep.mubr.msk.bf16.mxu0 %vm5210_vm0, %v5209_v2 }
 0x218   : > { %4507 = vmatmul.mubr.bf16.gmra.mrb[72].mxu1 %v5665_v29 }
 0x219   : > { %4510 = vmatprep.mubr.msk.bf16.mxu1 %vm5210_vm0, %v5209_v2 }
 0x21b   : > { %4583 = vmatmul.mubr.bf16.gmra.mrb[132].mxu0 %v5702_v25 }
 0x21c   : > { %4586 = vmatprep.mubr.msk.bf16.mxu0 %vm5210_vm0, %v5209_v2 }
 0x220   : > { %4511 = vmatmul.mubr.bf16.gmra.mrb[76].mxu1 %v5679_v53 }
 0x221   : > { %4514 = vmatprep.mubr.msk.bf16.mxu1 %vm5210_vm0, %v5209_v2 }
 0x223   : > { %4587 = vmatmul.mubr.bf16.gmra.mrb[136].mxu0 %v5716_v54 }
 0x224   : > { %4590 = vmatprep.mubr.msk.bf16.mxu0 %vm5210_vm0, %v5209_v2 }
 0x228   : > { %4515 = vmatmul.mubr.bf16.gmra.mrb[80].mxu1 %v5693_v14 }
 0x229   : > { %4518 = vmatprep.mubr.msk.bf16.mxu1 %vm5210_vm0, %v5209_v2 }
 0x22b   : > { %4591 = vmatmul.mubr.bf16.gmra.mrb[140].mxu0 %v5730_v21 }
 0x22c   : > { %4594 = vmatprep.mubr.msk.bf16.mxu0 %vm5210_vm0, %v5209_v2 }
 0x230   : > { %4519 = vmatmul.mubr.bf16.gmra.mrb[84].mxu1 %v5707_v39 }
 0x231   : > { %4522 = vmatprep.mubr.msk.bf16.mxu1 %vm5210_vm0, %v5209_v2 }
 0x233   : > { %4595 = vmatmul.mubr.bf16.gmra.mrb[144].mxu0 %v5748_v57 }
 0x234   : > { %4598 = vmatprep.mubr.msk.bf16.mxu0 %vm5210_vm0, %v5209_v2 }
 0x238   : > { %4523 = vmatmul.mubr.bf16.gmra.mrb[88].mxu1 %v5721_v4 }
 0x239   : > { %4526 = vmatprep.mubr.msk.bf16.mxu1 %vm5210_vm0, %v5209_v2 }
 0x23b   : > { %4599 = vmatmul.mubr.bf16.gmra.mrb[148].mxu0 %v5770_v15 }
 0x23c   : > { %4602 = vmatprep.mubr.msk.bf16.mxu0 %vm5210_vm0, %v5209_v2 }
 0x240   : > { %4527 = vmatmul.mubr.bf16.gmra.mrb[92].mxu1 %v5735_v35 }
 0x241   : > { %4530 = vmatprep.mubr.msk.bf16.mxu1 %vm5210_vm0, %v5209_v2 }
 0x243   : > { %4603 = vmatmul.mubr.bf16.gmra.mrb[152].mxu0 %v5766_v13 }
 0x244   : > { %4690 = vmatprep.mubr.msk.bf16.mxu0 %vm5210_vm0, %v5209_v2 }
 0x248   : > { %4531 = vmatmul.mubr.bf16.gmra.mrb[96].mxu1 %v5756_v5 }
 0x249   : > { %4534 = vmatprep.mubr.msk.bf16.mxu1 %vm5210_vm0, %v5209_v2 }
 0x24e   : > { %v1205_v50 = vpop.f32.mrb[52].mxu0 }
 0x24f   : > { %v4420_v9 = vpop.f32.mrb[53].mxu0 }
 0x250   : > { %v1208_v19 = vpop.f32.mrb[54].mxu0  ;;  %4535 = vmatmul.mubr.bf16.gmra.mrb[100].mxu1 %v1360_v59 }
 0x251   : > { %v4421_v29 = vpop.f32.mrb[55].mxu0  ;;  %4622 = vmatprep.mubr.msk.bf16.mxu1 %vm5210_vm0, %v5209_v2 }
 0x256   : > { %v1213_v40 = vpop.f32.mrb[56].mxu0 }
 0x257   : > { %v4424_v53 = vpop.f32.mrb[57].mxu0 }
 0x258   : > { %v1216_v0 = vpop.f32.mrb[58].mxu0  ;;  %4623 = vmatmul.mubr.bf16.vlgmr.msra.gmra.mrb[104].mxu1 %v5552_v49 }
 0x259   : > { %v4425_v14 = vpop.f32.mrb[59].mxu0  ;;  %4626 = vmatprep.mubr.msk.bf16.mxu1 %vm5210_vm0, %v5209_v2 }
 0x25b   : > { %v1021_v25 = vpop.f32.mrb[0].mxu1 }
 0x25c   : > { %v5890_v39 = vadd.f32 %v1205_v50, %v1021_v25  ;;  %v4352_v54 = vpop.f32.mrb[1].mxu1 }
 0x25d   : > { %v1024_v4 = vpop.f32.mrb[2].mxu1 }
 0x25e   : > { %v5892_v21 = vadd.f32 %v1208_v19, %v1024_v4  ;;  %v4353_v22 = vpop.f32.mrb[3].mxu1  ;;  %v1221_v23 = vpop.f32.mrb[60].mxu0 }
 0x25f   : > { %v4428_v24 = vpop.f32.mrb[61].mxu0 }
 0x260   : > { %v1224_v26 = vpop.f32.mrb[62].mxu0  ;;  %4627 = vmatmul.mubr.bf16.gmra.mrb[108].mxu1 %v5582_v8 }
 0x261   : > { %v4429_v27 = vpop.f32.mrb[63].mxu0  ;;  %4630 = vmatprep.mubr.msk.bf16.mxu1 %vm5210_vm0, %v5209_v2 }
 0x263   : > { %v1029_v49 = vpop.f32.mrb[4].mxu1 }
 0x264   : > { %v5897_v31 = vadd.f32 %v1213_v40, %v1029_v49  ;;  %v4356_v33 = vpop.f32.mrb[5].mxu1 }
 0x265   : > { %v1032_v34 = vpop.f32.mrb[6].mxu1 }
 0x266   : > { %v5899_v35 = vadd.f32 %v1216_v0, %v1032_v34  ;;  %v4357_v36 = vpop.f32.mrb[7].mxu1  ;;  %v1229_v43 = vpop.f32.mrb[64].mxu0 }
 0x267   : > { %v4432_v44 = vpop.f32.mrb[65].mxu0 }
 0x268   : > { %v1232_v45 = vpop.f32.mrb[66].mxu0  ;;  %4631 = vmatmul.mubr.bf16.gmra.mrb[112].mxu1 %v5612_v30 }
 0x269   : > { %v4433_v46 = vpop.f32.mrb[67].mxu0  ;;  %4634 = vmatprep.mubr.msk.bf16.mxu1 %vm5210_vm0, %v5209_v2 }
 0x26b   : > { %v1037_v8 = vpop.f32.mrb[8].mxu1 }
 0x26c   : > { %v5904_v48 = vadd.f32 %v1221_v23, %v1037_v8  ;;  %v4360_v51 = vpop.f32.mrb[9].mxu1 }
 0x26d   : > { %v1040_v56 = vpop.f32.mrb[10].mxu1 }
 0x26e   : > { %v5906_v57 = vadd.f32 %v1224_v26, %v1040_v56  ;;  %v4361_v59 = vpop.f32.mrb[11].mxu1  ;;  %v1237_v60 = vpop.f32.mrb[68].mxu0 }
 0x26f   : > { %v4436_v63 = vpop.f32.mrb[69].mxu0 }
 0x270   : > { %v1240_v1 = vpop.f32.mrb[70].mxu0  ;;  %4635 = vmatmul.mubr.bf16.gmra.mrb[116].mxu1 %v5635_v52 }
 0x271   : > { %v4437_v3 = vpop.f32.mrb[71].mxu0  ;;  %4638 = vmatprep.mubr.msk.bf16.mxu1 %vm5210_vm0, %v5209_v2 }
 0x273   : > { %v1045_v30 = vpop.f32.mrb[12].mxu1 }
 0x274   : > { %v5911_v5 = vadd.f32 %v1229_v43, %v1045_v30  ;;  %v4364_v12 = vpop.f32.mrb[13].mxu1 }
 0x275   : > { %v1048_v13 = vpop.f32.mrb[14].mxu1 }
 0x276   : > { %v5913_v15 = vadd.f32 %v1232_v45, %v1048_v13  ;;  %v4365_v18 = vpop.f32.mrb[15].mxu1  ;;  %v1245_v20 = vpop.f32.mrb[72].mxu0 }
 0x277   : > { %v4440_v58 = vpop.f32.mrb[73].mxu0 }
 0x278   : > { %v1248_v47 = vpop.f32.mrb[74].mxu0  ;;  %4639 = vmatmul.mubr.bf16.gmra.mrb[120].mxu1 %v5654_v11 }
 0x279   : > { %v4441_v17 = vpop.f32.mrb[75].mxu0  ;;  %4642 = vmatprep.mubr.msk.bf16.mxu1 %vm5210_vm0, %v5209_v2 }
 0x27b   : > { %v1053_v52 = vpop.f32.mrb[16].mxu1 }
 0x27c   : > { %v5918_v6 = vadd.f32 %v1237_v60, %v1053_v52  ;;  %v4368_v38 = vpop.f32.mrb[17].mxu1 }
 0x27d   : > { %v1056_v28 = vpop.f32.mrb[18].mxu1 }
 0x27e   : > { %v5920_v61 = vadd.f32 %v1240_v1, %v1056_v28  ;;  %v4369_v50 = vpop.f32.mrb[19].mxu1  ;;  %v1253_v9 = vpop.f32.mrb[76].mxu0 }
 0x27f   : > { %v4444_v19 = vpop.f32.mrb[77].mxu0 }
 0x280   : > { %v1256_v29 = vpop.f32.mrb[78].mxu0  ;;  %4643 = vmatmul.mubr.bf16.gmra.mrb[124].mxu1 %v5668_v32 }
 0x281   : > { %v4445_v40 = vpop.f32.mrb[79].mxu0  ;;  %4646 = vmatprep.mubr.msk.bf16.mxu1 %vm5210_vm0, %v5209_v2 }
 0x283   : > { %v1061_v11 = vpop.f32.mrb[20].mxu1 }
 0x284   : > { %v5925_v53 = vadd.f32 %v1245_v20, %v1061_v11  ;;  %v4372_v0 = vpop.f32.mrb[21].mxu1 }
 0x285   : > { %v1064_v14 = vpop.f32.mrb[22].mxu1 }
 0x286   : > { %v5927_v25 = vadd.f32 %v1248_v47, %v1064_v14  ;;  %v4373_v54 = vpop.f32.mrb[23].mxu1  ;;  %v1261_v4 = vpop.f32.mrb[80].mxu0 }
 0x287   : > { %v4448_v22 = vpop.f32.mrb[81].mxu0 }
 0x288   : > { %v1264_v23 = vpop.f32.mrb[82].mxu0  ;;  %4647 = vmatmul.mubr.bf16.gmra.mrb[128].mxu1 %v5682_v55 }
 0x289   : > { %v4449_v24 = vpop.f32.mrb[83].mxu0  ;;  %4650 = vmatprep.mubr.msk.bf16.mxu1 %vm5210_vm0, %v5209_v2 }
 0x28b   : > { %v1069_v32 = vpop.f32.mrb[24].mxu1 }
 0x28c   : > { %v5932_v26 = vadd.f32 %v1253_v9, %v1069_v32  ;;  %v4376_v27 = vpop.f32.mrb[25].mxu1 }
 0x28d   : > { %v1072_v49 = vpop.f32.mrb[26].mxu1 }
 0x28e   : > { %v5934_v33 = vadd.f32 %v1256_v29, %v1072_v49  ;;  %v4377_v34 = vpop.f32.mrb[27].mxu1  ;;  %v1269_v36 = vpop.f32.mrb[84].mxu0 }
 0x28f   : > { %v4452_v43 = vpop.f32.mrb[85].mxu0 }
 0x290   : > { %v1272_v44 = vpop.f32.mrb[86].mxu0  ;;  %4651 = vmatmul.mubr.bf16.gmra.mrb[132].mxu1 %v5696_v16  ;;  %v5048_v43 = vld [vmem:[%s6635_s4 + $0x40] sm:$0xff]  }
 0x291   : > { %v4453_v45 = vpop.f32.mrb[87].mxu0  ;;  %4654 = vmatprep.mubr.msk.bf16.mxu1 %vm5210_vm0, %v5209_v2  ;;  %4675 = vmatpush3.bf16.msra.mxu0 %v5048_v43 }
 0x292   : > { %4676 = vmatprep.subr.bf16.mxu0 %v5209_v2 }
 0x293   : > { %v1077_v55 = vpop.f32.mrb[28].mxu1 }
 0x294   : > { %v5939_v46 = vadd.f32 %v1261_v4, %v1077_v55  ;;  %v4380_v8 = vpop.f32.mrb[29].mxu1 }
 0x295   : > { %v1080_v51 = vpop.f32.mrb[30].mxu1 }
 0x296   : > { %v5941_v56 = vadd.f32 %v1264_v23, %v1080_v51  ;;  %v4381_v59 = vpop.f32.mrb[31].mxu1  ;;  %v1277_v60 = vpop.f32.mrb[88].mxu0 }
 0x297   : > { %v4456_v63 = vpop.f32.mrb[89].mxu0 }
 0x298   : > { %v1280_v1 = vpop.f32.mrb[90].mxu0  ;;  %4655 = vmatmul.mubr.bf16.gmra.mrb[136].mxu1 %v5710_v42 }
 0x299   : > { %v4457_v3 = vpop.f32.mrb[91].mxu0  ;;  %4658 = vmatprep.mubr.msk.bf16.mxu1 %vm5210_vm0, %v5209_v2 }
 0x29b   : > { %v1085_v16 = vpop.f32.mrb[32].mxu1 }
 0x29c   : > { %v5946_v30 = vadd.f32 %v1269_v36, %v1085_v16  ;;  %v4384_v12 = vpop.f32.mrb[33].mxu1 }
 0x29d   : > { %v1088_v13 = vpop.f32.mrb[34].mxu1 }
 0x29e   : > { %v5948_v18 = vadd.f32 %v1272_v44, %v1088_v13  ;;  %v4385_v20 = vpop.f32.mrb[35].mxu1  ;;  %v1285_v58 = vpop.f32.mrb[92].mxu0 }
 0x29f   : > { %v4460_v47 = vpop.f32.mrb[93].mxu0 }
 0x2a0   : > { %v1288_v17 = vpop.f32.mrb[94].mxu0  ;;  %4659 = vmatmul.mubr.bf16.gmra.mrb[140].mxu1 %v5724_v7  ;;  %v5049_v47 = vld [vmem:[%s6635_s4 + $0x48] sm:$0xff]  }
 0x2a1   : > { %v4461_v52 = vpop.f32.mrb[95].mxu0  ;;  %4662 = vmatprep.mubr.msk.bf16.mxu1 %vm5210_vm0, %v5209_v2  ;;  %4677 = vmatpush3.bf16.msra.mxu0 %v5049_v47 }
 0x2a2   : > { %4678 = vmatprep.subr.bf16.mxu0 %v5209_v2 }
 0x2a3   : > { %v1093_v42 = vpop.f32.mrb[36].mxu1 }
 0x2a4   : > { %v5953_v38 = vadd.f32 %v1277_v60, %v1093_v42  ;;  %v4388_v28 = vpop.f32.mrb[37].mxu1 }
 0x2a5   : > { %v1096_v50 = vpop.f32.mrb[38].mxu1 }
 0x2a6   : > { %v5955_v9 = vadd.f32 %v1280_v1, %v1096_v50  ;;  %v4389_v19 = vpop.f32.mrb[39].mxu1  ;;  %v1293_v29 = vpop.f32.mrb[96].mxu0 }
 0x2a7   : > { %v4464_v40 = vpop.f32.mrb[97].mxu0 }
 0x2a8   : > { %v1296_v11 = vpop.f32.mrb[98].mxu0  ;;  %4663 = vmatmul.mubr.bf16.gmra.mrb[144].mxu1 %v5738_v37 }
 0x2a9   : > { %v4465_v0 = vpop.f32.mrb[99].mxu0  ;;  %4666 = vmatprep.mubr.msk.bf16.mxu1 %vm5210_vm0, %v5209_v2 }
 0x2ab   : > { %v1101_v7 = vpop.f32.mrb[40].mxu1 }
 0x2ac   : > { %v5960_v14 = vadd.f32 %v1285_v58, %v1101_v7  ;;  %v4392_v54 = vpop.f32.mrb[41].mxu1 }
 0x2ad   : > { %v1104_v4 = vpop.f32.mrb[42].mxu1 }
 0x2ae   : > { %v5962_v22 = vadd.f32 %v1288_v17, %v1104_v4  ;;  %v4393_v23 = vpop.f32.mrb[43].mxu1  ;;  %v1301_v24 = vpop.f32.mrb[100].mxu0 }
 0x2af   : > { %v4468_v32 = vpop.f32.mrb[101].mxu0  ;;  %v5051_v23 = vld [vmem:[%s6635_s4 + $0x50] sm:$0xff]  }
 0x2b0   : > { %v1304_v27 = vpop.f32.mrb[102].mxu0  ;;  %4667 = vmatmul.mubr.bf16.gmra.mrb[148].mxu1 %v5763_v10  ;;  %4679 = vmatpush3.bf16.msra.mxu0 %v5051_v23 }
 0x2b1   : > { %v4469_v49 = vpop.f32.mrb[103].mxu0  ;;  %4670 = vmatprep.mubr.msk.bf16.mxu1 %vm5210_vm0, %v5209_v2  ;;  %4680 = vmatprep.subr.bf16.mxu0 %v5209_v2 }
 0x2b3   : > { %v1109_v37 = vpop.f32.mrb[44].mxu1 }
 0x2b4   : > { %v5967_v34 = vadd.f32 %v1293_v29, %v1109_v37  ;;  %v4396_v36 = vpop.f32.mrb[45].mxu1  ;;  %v5050_v29 = vld [vmem:[%s6635_s4] sm:$0xff]  }
 0x2b5   : > { %v1112_v44 = vpop.f32.mrb[46].mxu1  ;;  %4703 = vmatpush3.bf16.msra.mxu1 %v5050_v29 }
 0x2b6   : > { %v5972_v45 = vadd.f32 %v1296_v11, %v1112_v44  ;;  %v4397_v55 = vpop.f32.mrb[47].mxu1  ;;  %v1747_v8 = vpop.f32.mrb[104].mxu0  ;;  %4704 = vmatprep.subr.bf16.mxu1 %v5209_v2 }
 0x2b7   : > { %v4556_v51 = vpop.f32.mrb[105].mxu0 }
 0x2b8   : > { %v1750_v10 = vpop.f32.mrb[106].mxu0  ;;  %4671 = vmatmul.mubr.bf16.gmra.mrb[152].mxu1 %v1914_v62 }
 0x2b9   : > { %v4557_v59 = vpop.f32.mrb[107].mxu0  ;;  %4718 = vmatprep.mubr.msk.bf16.mxu1 %vm5210_vm0, %v5209_v2 }
 0x2bb   : > { %v1117_v60 = vpop.f32.mrb[48].mxu1 }
 0x2bc   : > { %v5979_v63 = vadd.f32 %v1301_v24, %v1117_v60  ;;  %v4400_v1 = vpop.f32.mrb[49].mxu1 }
 0x2bd   : > { %v1120_v3 = vpop.f32.mrb[50].mxu1 }
 0x2be   : > { %v4401_v16 = vpop.f32.mrb[51].mxu1  ;;  %v1755_v12 = vpop.f32.mrb[108].mxu0 }
 0x2bf   : > { %v4560_v13 = vpop.f32.mrb[109].mxu0 }
 0x2c0   : > { %v1758_v20 = vpop.f32.mrb[110].mxu0 }
 0x2c1   : > { %v4561_v58 = vpop.f32.mrb[111].mxu0 }
 0x2c3   : > { %v1457_v41 = vpop.f32.mrb[52].mxu1 }
 0x2c4   : > { %v1559_v62 = vadd.f32 %v1457_v41, %v5890_v39  ;;  %v4488_v17 = vpop.f32.mrb[53].mxu1 }
 0x2c5   : > { %v1460_v52 = vpop.f32.mrb[54].mxu1  ;;  %v5055_v17 = vld [vmem:[%s6635_s4 + $0x58] sm:$0xff]  }
 0x2c6   : > { %v1560_v42 = vadd.f32 %v1460_v52, %v5892_v21  ;;  %v4489_v28 = vpop.f32.mrb[55].mxu1  ;;  %v1763_v50 = vpop.f32.mrb[112].mxu0  ;;  %v5987_v19 = vadd.f32 %v1747_v8, %v1559_v62  ;;  %v5052_v21 = vld [vmem:[%s6635_s4 + $0x8] sm:$0xff]   ;;  %4681 = vmatpush3.bf16.msra.mxu0 %v5055_v17 }
 0x2c7   : > { %v4564_v40 = vpop.f32.mrb[113].mxu0  ;;  %4705 = vmatpush3.bf16.msra.mxu1 %v5052_v21  ;;  %4682 = vmatprep.subr.bf16.mxu0 %v5209_v2 }
 0x2c8   : > { %v1766_v11 = vpop.f32.mrb[114].mxu0  ;;  %v5992_v0 = vadd.f32 %v1750_v10, %v1560_v42  ;;  %4706 = vmatprep.subr.bf16.mxu1 %v5209_v2 }
 0x2c9   : > { %v4565_v39 = vpop.f32.mrb[115].mxu0 }
 0x2cb   : > { %v1465_v7 = vpop.f32.mrb[56].mxu1 }
 0x2cc   : > { %v1561_v54 = vadd.f32 %v1465_v7, %v5897_v31  ;;  %v4492_v4 = vpop.f32.mrb[57].mxu1  ;;  %v5053_v31 = vld [vmem:[%s6635_s4 + $0x10] sm:$0xff]  }
 0x2cd   : > { %v1468_v24 = vpop.f32.mrb[58].mxu1  ;;  %4707 = vmatpush3.bf16.msra.mxu1 %v5053_v31 }
 0x2ce   : > { %v1562_v32 = vadd.f32 %v1468_v24, %v5899_v35  ;;  %v4493_v27 = vpop.f32.mrb[59].mxu1  ;;  %v1771_v49 = vpop.f32.mrb[116].mxu0  ;;  %v6004_v37 = vadd.f32 %v1755_v12, %v1561_v54  ;;  %4708 = vmatprep.subr.bf16.mxu1 %v5209_v2  ;;  %v5054_v35 = vld [vmem:[%s6635_s4 + $0x18] sm:$0xff]   ;;  %v5056_v12 = vld [vmem:[%s6635_s4 + $0x20] sm:$0xff]  }
 0x2cf   : > { %v4568_v36 = vpop.f32.mrb[117].mxu0 }
 0x2d0   : > { %v1774_v43 = vpop.f32.mrb[118].mxu0  ;;  %v6010_v44 = vadd.f32 %v1758_v20, %v1562_v32 }
 0x2d1   : > { %v4569_v55 = vpop.f32.mrb[119].mxu0  ;;  %4709 = vmatpush3.bf16.msra.mxu1 %v5054_v35 }
 0x2d2   : > { %4710 = vmatprep.subr.bf16.mxu1 %v5209_v2 }
 0x2d3   : > { %v1473_v8 = vpop.f32.mrb[60].mxu1 }
 0x2d4   : > { %v1563_v51 = vadd.f32 %v1473_v8, %v5904_v48  ;;  %v4496_v10 = vpop.f32.mrb[61].mxu1 }
 0x2d5   : > { %v1476_v59 = vpop.f32.mrb[62].mxu1  ;;  %4711 = vmatpush3.bf16.msra.mxu1 %v5056_v12 }
 0x2d6   : > { %v1564_v60 = vadd.f32 %v1476_v59, %v5906_v57  ;;  %v4497_v1 = vpop.f32.mrb[63].mxu1  ;;  %v1779_v3 = vpop.f32.mrb[120].mxu0  ;;  %v6019_v16 = vadd.f32 %v1763_v50, %v1563_v51  ;;  %4712 = vmatprep.subr.bf16.mxu1 %v5209_v2  ;;  %v5057_v57 = vld [vmem:[%s6635_s4 + $0x28] sm:$0xff]  }
 0x2d7   : > { %v4572_v13 = vpop.f32.mrb[121].mxu0 }
 0x2d8   : > { %v1782_v20 = vpop.f32.mrb[122].mxu0  ;;  %v6024_v58 = vadd.f32 %v1766_v11, %v1564_v60 }
 0x2d9   : > { %v4573_v48 = vpop.f32.mrb[123].mxu0  ;;  %4713 = vmatpush3.bf16.msra.mxu1 %v5057_v57 }
 0x2da   : > { %4714 = vmatprep.subr.bf16.mxu1 %v5209_v2 }
 0x2db   : > { %v1481_v47 = vpop.f32.mrb[64].mxu1 }
 0x2dc   : > { %v1565_v41 = vadd.f32 %v1481_v47, %v5911_v5  ;;  %v4500_v62 = vpop.f32.mrb[65].mxu1  ;;  %v5058_v5 = vld [vmem:[%s6635_s4 + $0x30] sm:$0xff]   ;;  %v5061_v47 = vld [vmem:[%s6635_s4 + $0x68] sm:$0xff]  }
 0x2dd   : > { %v1484_v52 = vpop.f32.mrb[66].mxu1  ;;  %4715 = vmatpush3.bf16.msra.mxu1 %v5058_v5 }
 0x2de   : > { %v1566_v42 = vadd.f32 %v1484_v52, %v5913_v15  ;;  %v4501_v28 = vpop.f32.mrb[67].mxu1  ;;  %v1787_v50 = vpop.f32.mrb[124].mxu0  ;;  %v6036_v29 = vadd.f32 %v1771_v49, %v1565_v41  ;;  %4716 = vmatprep.subr.bf16.mxu1 %v5209_v2  ;;  %v5060_v15 = vld [vmem:[%s6635_s4 + $0x38] sm:$0xff]  }
 0x2df   : > { %v4576_v40 = vpop.f32.mrb[125].mxu0 }
 0x2e0   : > { %v1790_v11 = vpop.f32.mrb[126].mxu0  ;;  %v6042_v39 = vadd.f32 %v1774_v43, %v1566_v42 }
 0x2e1   : > { %v4577_v21 = vpop.f32.mrb[127].mxu0  ;;  %4717 = vmatpush3.bf16.msra.mxu1 %v5060_v15 }
 0x2e2   : > { %4758 = vmatprep.subr.bf16.mxu1 %v5209_v2 }
 0x2e3   : > { %v1489_v7 = vpop.f32.mrb[68].mxu1 }
 0x2e4   : > { %v1567_v54 = vadd.f32 %v1489_v7, %v5918_v6  ;;  %v4504_v4 = vpop.f32.mrb[69].mxu1  ;;  %v5059_v6 = vld [vmem:[%s6635_s4 + $0x60] sm:$0xff]  }
 0x2e5   : > { %v1492_v23 = vpop.f32.mrb[70].mxu1  ;;  %4683 = vmatpush3.bf16.msra.mxu0 %v5059_v6 }
 0x2e6   : > { %v1568_v24 = vadd.f32 %v1492_v23, %v5920_v61  ;;  %v4505_v32 = vpop.f32.mrb[71].mxu1  ;;  %v1795_v27 = vpop.f32.mrb[128].mxu0  ;;  %v6051_v49 = vadd.f32 %v1779_v3, %v1567_v54  ;;  %4684 = vmatprep.subr.bf16.mxu0 %v5209_v2 }
 0x2e7   : > { %v4580_v31 = vpop.f32.mrb[129].mxu0 }
 0x2e8   : > { %v1798_v36 = vpop.f32.mrb[130].mxu0  ;;  %v6053_v43 = vadd.f32 %v1782_v20, %v1568_v24 }
 0x2e9   : > { %v4581_v55 = vpop.f32.mrb[131].mxu0  ;;  %4685 = vmatpush3.bf16.msra.mxu0 %v5061_v47 }
 0x2ea   : > { %4686 = vmatprep.subr.bf16.mxu0 %v5209_v2 }
 0x2eb   : > { %v1497_v35 = vpop.f32.mrb[72].mxu1 }
 0x2ec   : > { %v1569_v8 = vadd.f32 %v1497_v35, %v5925_v53  ;;  %v4508_v51 = vpop.f32.mrb[73].mxu1 }
 0x2ed   : > { %v1500_v10 = vpop.f32.mrb[74].mxu1 }
 0x2ee   : > { %v1570_v61 = vadd.f32 %v1500_v10, %v5927_v25  ;;  %v4509_v59 = vpop.f32.mrb[75].mxu1  ;;  %v1803_v60 = vpop.f32.mrb[132].mxu0  ;;  %v6061_v1 = vadd.f32 %v1787_v50, %v1569_v8 }
 0x2ef   : > { %v4584_v3 = vpop.f32.mrb[133].mxu0 }
 0x2f0   : > { %v1806_v12 = vpop.f32.mrb[134].mxu0  ;;  %v6063_v13 = vadd.f32 %v1790_v11, %v1570_v61 }
 0x2f1   : > { %v4585_v20 = vpop.f32.mrb[135].mxu0 }
 0x2f3   : > { %v1505_v48 = vpop.f32.mrb[76].mxu1 }
 0x2f4   : > { %v1571_v57 = vadd.f32 %v1505_v48, %v5932_v26  ;;  %v4512_v53 = vpop.f32.mrb[77].mxu1 }
 0x2f5   : > { %v1508_v41 = vpop.f32.mrb[78].mxu1 }
 0x2f6   : > { %v1572_v25 = vadd.f32 %v1508_v41, %v5934_v33  ;;  %v4513_v62 = vpop.f32.mrb[79].mxu1  ;;  %v1811_v17 = vpop.f32.mrb[136].mxu0  ;;  %v6070_v52 = vadd.f32 %v1795_v27, %v1571_v57 }
 0x2f7   : > { %v4588_v42 = vpop.f32.mrb[137].mxu0 }
 0x2f8   : > { %v1814_v28 = vpop.f32.mrb[138].mxu0  ;;  %v6073_v50 = vadd.f32 %v1798_v36, %v1572_v25 }
 0x2f9   : > { %v4589_v26 = vpop.f32.mrb[139].mxu0 }
 0x2fb   : > { %v1513_v5 = vpop.f32.mrb[80].mxu1 }
 0x2fc   : > { %v1573_v40 = vadd.f32 %v1513_v5, %v5939_v46  ;;  %v4516_v11 = vpop.f32.mrb[81].mxu1  ;;  %v5062_v46 = vld [vmem:[%s6635_s4 + $0x70] sm:$0xff]  }
 0x2fd   : > { %v1516_v21 = vpop.f32.mrb[82].mxu1  ;;  %4687 = vmatpush3.bf16.msra.mxu0 %v5062_v46 }
 0x2fe   : > { %v1574_v15 = vadd.f32 %v1516_v21, %v5941_v56  ;;  %v4517_v33 = vpop.f32.mrb[83].mxu1  ;;  %v1819_v7 = vpop.f32.mrb[140].mxu0  ;;  %v6077_v54 = vadd.f32 %v1803_v60, %v1573_v40  ;;  %4688 = vmatprep.subr.bf16.mxu0 %v5209_v2 }
 0x2ff   : > { %v4592_v4 = vpop.f32.mrb[141].mxu0 }
 0x300   : > { %v1822_v23 = vpop.f32.mrb[142].mxu0  ;;  %v6079_v24 = vadd.f32 %v1806_v12, %v1574_v15 }
 0x301   : > { %v4593_v32 = vpop.f32.mrb[143].mxu0 }
 0x303   : > { %v1521_v27 = vpop.f32.mrb[84].mxu1 }
 0x304   : > { %v1575_v31 = vadd.f32 %v1521_v27, %v5946_v30  ;;  %v4520_v36 = vpop.f32.mrb[85].mxu1 }
 0x305   : > { %v1524_v55 = vpop.f32.mrb[86].mxu1 }
 0x306   : > { %v1576_v56 = vadd.f32 %v1524_v55, %v5948_v18  ;;  %v4521_v6 = vpop.f32.mrb[87].mxu1  ;;  %v1827_v35 = vpop.f32.mrb[144].mxu0  ;;  %v6086_v8 = vadd.f32 %v1811_v17, %v1575_v31  ;;  %v5063_v18 = vld [vmem:[%s6635_s4 + $0x78] sm:$0xff]  }
 0x307   : > { %v4596_v51 = vpop.f32.mrb[145].mxu0  ;;  %4689 = vmatpush3.bf16.msra.mxu0 %v5063_v18 }
 0x308   : > { %v1830_v10 = vpop.f32.mrb[146].mxu0  ;;  %v6089_v61 = vadd.f32 %v1814_v28, %v1576_v56  ;;  %4730 = vmatprep.subr.bf16.mxu0 %v5209_v2 }
 0x309   : > { %v4597_v30 = vpop.f32.mrb[147].mxu0 }
 0x30b   : > { %v1529_v59 = vpop.f32.mrb[88].mxu1 }
 0x30c   : > { %v1577_v60 = vadd.f32 %v1529_v59, %v5953_v38  ;;  %v4524_v3 = vpop.f32.mrb[89].mxu1 }
 0x30d   : > { %v1532_v12 = vpop.f32.mrb[90].mxu1 }
 0x30e   : > { %v1578_v20 = vadd.f32 %v1532_v12, %v5955_v9  ;;  %v4525_v48 = vpop.f32.mrb[91].mxu1  ;;  %v1835_v57 = vpop.f32.mrb[148].mxu0  ;;  %v6096_v53 = vadd.f32 %v1819_v7, %v1577_v60 }
 0x30f   : > { %v4600_v47 = vpop.f32.mrb[149].mxu0 }
 0x310   : > { %v1838_v41 = vpop.f32.mrb[150].mxu0  ;;  %v6099_v25 = vadd.f32 %v1822_v23, %v1578_v20 }
 0x311   : > { %v4601_v38 = vpop.f32.mrb[151].mxu0 }
 0x313   : > { %v1537_v62 = vpop.f32.mrb[92].mxu1 }
 0x314   : > { %v1579_v17 = vadd.f32 %v1537_v62, %v5960_v14  ;;  %v4528_v42 = vpop.f32.mrb[93].mxu1 }
 0x315   : > { %v1540_v28 = vpop.f32.mrb[94].mxu1 }
 0x316   : > { %v1580_v26 = vadd.f32 %v1540_v28, %v5962_v22  ;;  %v4529_v9 = vpop.f32.mrb[95].mxu1  ;;  %v1843_v5 = vpop.f32.mrb[152].mxu0  ;;  %v6103_v40 = vadd.f32 %v1827_v35, %v1579_v17 }
 0x317   : > { %v4604_v11 = vpop.f32.mrb[153].mxu0 }
 0x318   : > { %v1846_v21 = vpop.f32.mrb[154].mxu0  ;;  %v6105_v15 = vadd.f32 %v1830_v10, %v1580_v26 }
 0x319   : > { %v4605_v33 = vpop.f32.mrb[155].mxu0 }
 0x31b   : > { %v1545_v7 = vpop.f32.mrb[96].mxu1 }
 0x31c   : > { %v1581_v4 = vadd.f32 %v1545_v7, %v5967_v34  ;;  %v4532_v23 = vpop.f32.mrb[97].mxu1  ;;  %v6119_v34 = vld [vmem:[%s6634_s3] ss:$0 sm:$0xff] }
 0x31d   : > { %v1548_v32 = vpop.f32.mrb[98].mxu1 }
 0x31e   : > { %v1582_v14 = vadd.f32 %v1548_v32, %v5972_v45  ;;  %v4533_v27 = vpop.f32.mrb[99].mxu1  ;;  %v6109_v31 = vadd.f32 %v1835_v57, %v1581_v4 }
 0x320   : > { %v6111_v22 = vadd.f32 %v1838_v41, %v1582_v14 }
 0x323   : > { %v1553_v36 = vpop.f32.mrb[100].mxu1 }
 0x324   : > { %v1583_v46 = vadd.f32 %v1553_v36, %v5979_v63  ;;  %v4536_v55 = vpop.f32.mrb[101].mxu1 }
 0x325   : > { %v1556_v56 = vpop.f32.mrb[102].mxu1 }
 0x326   : > { %v4537_v6 = vpop.f32.mrb[103].mxu1  ;;  %v6114_v35 = vadd.f32 %v1843_v5, %v1583_v46 }
 0x32b   : > { %v2011_v51 = vpop.f32.mrb[104].mxu1 }
 0x32c   : > { %v2113_v45 = vadd.f32 %v2011_v51, %v5987_v19  ;;  %v4624_v10 = vpop.f32.mrb[105].mxu1 }
 0x32d   : > { %v2014_v30 = vpop.f32.mrb[106].mxu1 }
 0x32e   : > { %v2145_v59 = vadd.f32 %v6119_v34, %v2113_v45  ;;  %v2114_v60 = vadd.f32 %v2014_v30, %v5992_v0  ;;  %v4625_v63 = vpop.f32.mrb[107].mxu1 }
 0x330   : > { %v2170_v3 = vmax.f32 %v2145_v59, 0.0  ;;  %v2146_v18 = vadd.f32 %v6119_v34, %v2114_v60 }
 0x332   : > { %2195 = vst [vmem:[#allocation2] sm:$0xff] %v2170_v3  ;;  %v2171_v12 = vmax.f32 %v2146_v18, 0.0 }
 0x333   : > { %v2019_v20 = vpop.f32.mrb[108].mxu1 }
 0x334   : > { %2196 = vst [vmem:[#allocation2 + $0x8] sm:$0xff] %v2171_v12  ;;  %v2115_v48 = vadd.f32 %v2019_v20, %v6004_v37  ;;  %v4628_v57 = vpop.f32.mrb[109].mxu1 }
 0x335   : > { %v2022_v47 = vpop.f32.mrb[110].mxu1 }
 0x336   : > { %v2147_v19 = vadd.f32 %v6119_v34, %v2115_v48  ;;  %v2116_v41 = vadd.f32 %v2022_v47, %v6010_v44  ;;  %v4629_v38 = vpop.f32.mrb[111].mxu1 }
 0x338   : > { %v2172_v62 = vmax.f32 %v2147_v19, 0.0  ;;  %v2148_v0 = vadd.f32 %v6119_v34, %v2116_v41 }
 0x33a   : > { %2197 = vst [vmem:[#allocation2 + $0x10] sm:$0xff] %v2172_v62  ;;  %v2173_v17 = vmax.f32 %v2148_v0, 0.0 }
 0x33b   : > { %v2027_v42 = vpop.f32.mrb[112].mxu1 }
 0x33c   : > { %2198 = vst [vmem:[#allocation2 + $0x18] sm:$0xff] %v2173_v17  ;;  %v2117_v28 = vadd.f32 %v2027_v42, %v6019_v16  ;;  %v4632_v26 = vpop.f32.mrb[113].mxu1 }
 0x33d   : > { %v2030_v9 = vpop.f32.mrb[114].mxu1 }
 0x33e   : > { %v2149_v37 = vadd.f32 %v6119_v34, %v2117_v28  ;;  %v2118_v5 = vadd.f32 %v2030_v9, %v6024_v58  ;;  %v4633_v11 = vpop.f32.mrb[115].mxu1 }
 0x340   : > { %v2174_v21 = vmax.f32 %v2149_v37, 0.0  ;;  %v2150_v44 = vadd.f32 %v6119_v34, %v2118_v5 }
 0x342   : > { %2199 = vst [vmem:[#allocation2 + $0x20] sm:$0xff] %v2174_v21  ;;  %v2175_v33 = vmax.f32 %v2150_v44, 0.0 }
 0x343   : > { %v2035_v7 = vpop.f32.mrb[116].mxu1 }
 0x344   : > { %2200 = vst [vmem:[#allocation2 + $0x28] sm:$0xff] %v2175_v33  ;;  %v2119_v4 = vadd.f32 %v2035_v7, %v6036_v29  ;;  %v4636_v23 = vpop.f32.mrb[117].mxu1 }
 0x345   : > { %v2038_v32 = vpop.f32.mrb[118].mxu1 }
 0x346   : > { %v2151_v16 = vadd.f32 %v6119_v34, %v2119_v4  ;;  %v2120_v14 = vadd.f32 %v2038_v32, %v6042_v39  ;;  %v4637_v27 = vpop.f32.mrb[119].mxu1 }
 0x348   : > { %v2176_v36 = vmax.f32 %v2151_v16, 0.0  ;;  %v2152_v58 = vadd.f32 %v6119_v34, %v2120_v14 }
 0x349   : > { %v2220_v63 = vld [vmem:[#allocation2] ss:$5 sm:$0xff]  ;;  %v2230_v3 = vld [vmem:[#allocation2 + $0x1] ss:$5 sm:$0xff] }
 0x34a   : > { %2201 = vst [vmem:[#allocation2 + $0x30] sm:$0xff] %v2176_v36  ;;  %v2177_v46 = vmax.f32 %v2152_v58, 0.0  ;;  %v2245_v41 = vld [vmem:[#allocation2 + $0x2] ss:$5 sm:$0xff] }
 0x34b   : > { %v2043_v55 = vpop.f32.mrb[120].mxu1  ;;  %v2275_v16 = vld [vmem:[#allocation2 + $0x4] ss:$5 sm:$0xff] }
 0x34c   : > { %2202 = vst [vmem:[#allocation2 + $0x38] sm:$0xff] %v2177_v46  ;;  %v2121_v56 = vadd.f32 %v2043_v55, %v6051_v49  ;;  %v4640_v6 = vpop.f32.mrb[121].mxu1  ;;  %v5064_v46 = vld [vmem:[%s6635_s4 + $0xc0] sm:$0xff]  }
 0x34d   : > { %v2046_v51 = vpop.f32.mrb[122].mxu1 }
 0x34e   : > { %v2153_v29 = vadd.f32 %v6119_v34, %v2121_v56  ;;  %v2122_v45 = vadd.f32 %v2046_v51, %v6053_v43  ;;  %v4641_v10 = vpop.f32.mrb[123].mxu1  ;;  %v2239_v43 = vmax.f32 %v2220_v63, %v2230_v3 }
 0x34f   : > { %v5065_v10 = vld [vmem:[%s6635_s4 + $0xc8] sm:$0xff]  }
 0x350   : > { %v2178_v30 = vmax.f32 %v2153_v29, 0.0  ;;  %v2154_v39 = vadd.f32 %v6119_v34, %v2122_v45  ;;  %v2254_v62 = vmax.f32 %v2239_v43, %v2245_v41 }
 0x352   : > { %2203 = vst [vmem:[#allocation2 + $0x40] sm:$0xff] %v2178_v30  ;;  %v2179_v59 = vmax.f32 %v2154_v39, 0.0 }
 0x353   : > { %v2051_v60 = vpop.f32.mrb[124].mxu1 }
 0x354   : > { %2204 = vst [vmem:[#allocation2 + $0x48] sm:$0xff] %v2179_v59  ;;  %v2123_v18 = vadd.f32 %v2051_v60, %v6061_v1  ;;  %v4644_v12 = vpop.f32.mrb[125].mxu1 }
 0x355   : > { %v2054_v49 = vpop.f32.mrb[126].mxu1 }
 0x356   : > { %v2155_v20 = vadd.f32 %v6119_v34, %v2123_v18  ;;  %v2124_v48 = vadd.f32 %v2054_v49, %v6063_v13  ;;  %v4645_v57 = vpop.f32.mrb[127].mxu1  ;;  %v2260_v13 = vld [vmem:[#allocation2 + $0x3] ss:$5 sm:$0xff] }
 0x357   : > { %v2269_v33 = vmax.f32 %v2254_v62, %v2260_v13 }
 0x358   : > { %v2180_v47 = vmax.f32 %v2155_v20, 0.0  ;;  %v2156_v19 = vadd.f32 %v6119_v34, %v2124_v48  ;;  %v5068_v20 = vld [vmem:[%s6635_s4 + $0xd8] sm:$0xff]  }
 0x359   : > { %v2284_v27 = vmax.f32 %v2269_v33, %v2275_v16 }
 0x35a   : > { %2205 = vst [vmem:[#allocation2 + $0x50] sm:$0xff] %v2180_v47  ;;  %v2181_v38 = vmax.f32 %v2156_v19, 0.0  ;;  %v5070_v47 = vld [vmem:[%s6635_s4 + $0xe0] sm:$0xff]  }
 0x35b   : > { %v2059_v0 = vpop.f32.mrb[128].mxu1  ;;  %v2222_v17 = vld [vmem:[#allocation2 + $0x28] ss:$5 sm:$0xff]  ;;  %v2232_v42 = vld [vmem:[#allocation2 + $0x29] ss:$5 sm:$0xff] }
 0x35c   : > { %2206 = vst [vmem:[#allocation2 + $0x58] sm:$0xff] %v2181_v38  ;;  %v2125_v1 = vadd.f32 %v2059_v0, %v6070_v52  ;;  %v4648_v28 = vpop.f32.mrb[129].mxu1  ;;  %v2240_v26 = vmax.f32 %v2222_v17, %v2232_v42  ;;  %v2247_v37 = vld [vmem:[#allocation2 + $0x2a] ss:$5 sm:$0xff]  ;;  %v2262_v7 = vld [vmem:[#allocation2 + $0x2b] ss:$5 sm:$0xff] }
 0x35d   : > { %v2062_v9 = vpop.f32.mrb[130].mxu1  ;;  %v2277_v14 = vld [vmem:[#allocation2 + $0x2c] ss:$5 sm:$0xff] }
 0x35e   : > { %v2157_v5 = vadd.f32 %v6119_v34, %v2125_v1  ;;  %v2126_v11 = vadd.f32 %v2062_v9, %v6073_v50  ;;  %v4649_v21 = vpop.f32.mrb[131].mxu1  ;;  %v2255_v44 = vmax.f32 %v2240_v26, %v2247_v37  ;;  %v5072_v17 = vld [vmem:[%s6635_s4 + $0xe8] sm:$0xff]  }
 0x360   : > { %v2182_v4 = vmax.f32 %v2157_v5, 0.0  ;;  %v2158_v23 = vadd.f32 %v6119_v34, %v2126_v11  ;;  %v2270_v32 = vmax.f32 %v2255_v44, %v2262_v7  ;;  %v5076_v7 = vld [vmem:[%s6635_s4 + $0xf8] sm:$0xff]  }
 0x362   : > { %2207 = vst [vmem:[#allocation2 + $0x60] sm:$0xff] %v2182_v4  ;;  %v2183_v52 = vmax.f32 %v2158_v23, 0.0  ;;  %v2285_v36 = vmax.f32 %v2270_v32, %v2277_v14 }
 0x363   : > { %v2067_v58 = vpop.f32.mrb[132].mxu1 }
 0x364   : > { %2208 = vst [vmem:[#allocation2 + $0x68] sm:$0xff] %v2183_v52  ;;  %v2127_v50 = vadd.f32 %v2067_v58, %v6077_v54  ;;  %v4652_v55 = vpop.f32.mrb[133].mxu1  ;;  %v6153_v56 = vpack.c.bf16 %v2285_v36, %v2284_v27 }
 0x365   : > { %v2070_v6 = vpop.f32.mrb[134].mxu1 }
 0x366   : > { %v2159_v51 = vadd.f32 %v6119_v34, %v2127_v50  ;;  %v2128_v29 = vadd.f32 %v2070_v6, %v6079_v24  ;;  %v4653_v45 = vpop.f32.mrb[135].mxu1  ;;  %4719 = vmatmul.mubr.bf16.vlgmr.msra.gmra.mrb[156].mxu1 %v6153_v56  ;;  %v5066_v24 = vld [vmem:[%s6635_s4 + $0xd0] sm:$0xff]  }
 0x367   : > { %4759 = vmatpush3.bf16.msra.mxu1 %v5064_v46  ;;  %4722 = vmatprep.mubr.msk.bf16.mxu1 %vm5210_vm0, %v5209_v2 }
 0x368   : > { %v2184_v54 = vmax.f32 %v2159_v51, 0.0  ;;  %v2160_v30 = vadd.f32 %v6119_v34, %v2128_v29  ;;  %4760 = vmatprep.subr.bf16.mxu1 %v5209_v2 }
 0x36a   : > { %2209 = vst [vmem:[#allocation2 + $0x70] sm:$0xff] %v2184_v54  ;;  %v2185_v39 = vmax.f32 %v2160_v30, 0.0 }
 0x36b   : > { %v2075_v59 = vpop.f32.mrb[136].mxu1  ;;  %4761 = vmatpush3.bf16.msra.mxu1 %v5065_v10 }
 0x36c   : > { %2210 = vst [vmem:[#allocation2 + $0x78] sm:$0xff] %v2185_v39  ;;  %v2129_v60 = vadd.f32 %v2075_v59, %v6086_v8  ;;  %v4656_v63 = vpop.f32.mrb[137].mxu1  ;;  %4762 = vmatprep.subr.bf16.mxu1 %v5209_v2 }
 0x36d   : > { %v2078_v3 = vpop.f32.mrb[138].mxu1 }
 0x36e   : > { %v2161_v18 = vadd.f32 %v6119_v34, %v2129_v60  ;;  %v2130_v12 = vadd.f32 %v2078_v3, %v6089_v61  ;;  %v4657_v49 = vpop.f32.mrb[139].mxu1 }
 0x36f   : > { %4763 = vmatpush3.bf16.msra.mxu1 %v5066_v24 }
 0x370   : > { %v2186_v48 = vmax.f32 %v2161_v18, 0.0  ;;  %v2162_v57 = vadd.f32 %v6119_v34, %v2130_v12  ;;  %4764 = vmatprep.subr.bf16.mxu1 %v5209_v2 }
 0x371   : > { %v2224_v26 = vld [vmem:[#allocation2 + $0x50] ss:$5 sm:$0xff]  ;;  %v2234_v9 = vld [vmem:[#allocation2 + $0x51] ss:$5 sm:$0xff] }
 0x372   : > { %2211 = vst [vmem:[#allocation2 + $0x80] sm:$0xff] %v2186_v48  ;;  %v2187_v8 = vmax.f32 %v2162_v57, 0.0  ;;  %v2241_v33 = vmax.f32 %v2224_v26, %v2234_v9  ;;  %v2264_v55 = vld [vmem:[#allocation2 + $0x53] ss:$5 sm:$0xff]  ;;  %v2279_v24 = vld [vmem:[#allocation2 + $0x54] ss:$5 sm:$0xff] }
 0x373   : > { %v2083_v43 = vpop.f32.mrb[140].mxu1  ;;  %4765 = vmatpush3.bf16.msra.mxu1 %v5068_v20 }
 0x374   : > { %2212 = vst [vmem:[#allocation2 + $0x88] sm:$0xff] %v2187_v8  ;;  %v2131_v61 = vadd.f32 %v2083_v43, %v6096_v53  ;;  %v4660_v19 = vpop.f32.mrb[141].mxu1  ;;  %4766 = vmatprep.subr.bf16.mxu1 %v5209_v2 }
 0x375   : > { %v2086_v41 = vpop.f32.mrb[142].mxu1  ;;  %v2849_v19 = vrot.slane %v6153_v56, 2 }
 0x376   : > { %v2163_v38 = vadd.f32 %v6119_v34, %v2131_v61  ;;  %v2132_v62 = vadd.f32 %v2086_v41, %v6099_v25  ;;  %v4661_v0 = vpop.f32.mrb[143].mxu1  ;;  %v5074_v25 = vld [vmem:[%s6635_s4 + $0xf0] sm:$0xff]  }
 0x377   : > { %4767 = vmatpush3.bf16.msra.mxu1 %v5070_v47  ;;  %v2325_v47 = vshrl.u32 %v6153_v56, 16 }
 0x378   : > { %v2188_v42 = vmax.f32 %v2163_v38, 0.0  ;;  %v2164_v1 = vadd.f32 %v6119_v34, %v2132_v62  ;;  %4768 = vmatprep.subr.bf16.mxu1 %v5209_v2 }
 0x37a   : > { %2213 = vst [vmem:[#allocation2 + $0x90] sm:$0xff] %v2188_v42  ;;  %v2189_v53 = vmax.f32 %v2164_v1, 0.0  ;;  %v5069_v42 = vld [vmem:[%s6635_s4 + $0x88] sm:$0xff]  }
 0x37b   : > { %v2091_v28 = vpop.f32.mrb[144].mxu1  ;;  %4769 = vmatpush3.bf16.msra.mxu1 %v5072_v17 }
 0x37c   : > { %2214 = vst [vmem:[#allocation2 + $0x98] sm:$0xff] %v2189_v53  ;;  %v2133_v37 = vadd.f32 %v2091_v28, %v6103_v40  ;;  %v4664_v13 = vpop.f32.mrb[145].mxu1  ;;  %4770 = vmatprep.subr.bf16.mxu1 %v5209_v2  ;;  %v2249_v40 = vld [vmem:[#allocation2 + $0x52] ss:$5 sm:$0xff] }
 0x37d   : > { %v2094_v5 = vpop.f32.mrb[146].mxu1  ;;  %v2256_v16 = vmax.f32 %v2241_v33, %v2249_v40  ;;  %v5071_v28 = vld [vmem:[%s6635_s4 + $0x90] sm:$0xff]  }
 0x37e   : > { %v2165_v11 = vadd.f32 %v6119_v34, %v2133_v37  ;;  %v2134_v21 = vadd.f32 %v2094_v5, %v6105_v15  ;;  %v4665_v44 = vpop.f32.mrb[147].mxu1  ;;  %v5073_v5 = vld [vmem:[%s6635_s4 + $0x98] sm:$0xff]  }
 0x37f   : > { %4771 = vmatpush3.bf16.msra.mxu1 %v5074_v25  ;;  %v2271_v10 = vmax.f32 %v2256_v16, %v2264_v55 }
 0x380   : > { %v2190_v4 = vmax.f32 %v2165_v11, 0.0  ;;  %v2166_v23 = vadd.f32 %v6119_v34, %v2134_v21  ;;  %4772 = vmatprep.subr.bf16.mxu1 %v5209_v2 }
 0x381   : > { %v2286_v3 = vmax.f32 %v2271_v10, %v2279_v24  ;;  %v5081_v24 = vld [vmem:[%s6635_s4 + $0x108] sm:$0xff]  }
 0x382   : > { %2215 = vst [vmem:[#allocation2 + $0xa0] sm:$0xff] %v2190_v4  ;;  %v2191_v32 = vmax.f32 %v2166_v23, 0.0 }
 0x383   : > { %v2099_v14 = vpop.f32.mrb[148].mxu1  ;;  %v2226_v52 = vld [vmem:[#allocation2 + $0x78] ss:$5 sm:$0xff]  ;;  %v2236_v27 = vld [vmem:[#allocation2 + $0x79] ss:$5 sm:$0xff]  ;;  %4773 = vmatpush3.bf16.msra.mxu1 %v5076_v7 }
 0x384   : > { %2216 = vst [vmem:[#allocation2 + $0xa8] sm:$0xff] %v2191_v32  ;;  %v2135_v15 = vadd.f32 %v2099_v14, %v6109_v31  ;;  %v4668_v36 = vpop.f32.mrb[149].mxu1  ;;  %v2242_v58 = vmax.f32 %v2226_v52, %v2236_v27  ;;  %4814 = vmatprep.subr.bf16.mxu1 %v5209_v2  ;;  %v2251_v50 = vld [vmem:[#allocation2 + $0x7a] ss:$5 sm:$0xff]  ;;  %v2266_v54 = vld [vmem:[#allocation2 + $0x7b] ss:$5 sm:$0xff] }
 0x385   : > { %v2102_v46 = vpop.f32.mrb[150].mxu1  ;;  %v2327_v31 = vshll.u32 %v6153_v56, 16  ;;  %v2281_v60 = vld [vmem:[#allocation2 + $0x7c] ss:$5 sm:$0xff]  ;;  %v2710_v32 = vrot.slane %v2325_v47, 1 }
 0x386   : > { %v2167_v6 = vadd.f32 %v6119_v34, %v2135_v15  ;;  %v2136_v51 = vadd.f32 %v2102_v46, %v6111_v22  ;;  %v4669_v29 = vpop.f32.mrb[151].mxu1  ;;  %v2257_v45 = vmax.f32 %v2242_v58, %v2251_v50  ;;  %v5075_v7 = vld [vmem:[%s6635_s4 + $0xa0] sm:$0xff]   ;;  %v5077_v27 = vld [vmem:[%s6635_s4 + $0xa8] sm:$0xff]   ;;  %v5078_v50 = vld [vmem:[%s6635_s4 + $0xb0] sm:$0xff]  }
 0x387   : > { %v2329_v48 = vrot.slane %v2327_v31, 1  ;;  %v2711_v16 = vrot.slane %v2327_v31, 2  ;;  %v5079_v29 = vld [vmem:[%s6635_s4 + $0xb8] sm:$0xff]  }
 0x388   : > { %v2192_v30 = vmax.f32 %v2167_v6, 0.0  ;;  %v2168_v39 = vadd.f32 %v6119_v34, %v2136_v51  ;;  %v2272_v59 = vmax.f32 %v2257_v45, %v2266_v54 }
 0x389   : > { %v2330_v38 = vor.u32 %v2329_v48, %v2325_v47  ;;  %v2712_v46 = vor.u32 %v2711_v16, %v2710_v32  ;;  %v5091_v47 = vld [vmem:[%s6637_s6 + $0x10] sm:$0xff]  }
 0x38a   : > { %2217 = vst [vmem:[#allocation2 + $0xb0] sm:$0xff] %v2192_v30  ;;  %v2193_v63 = vmax.f32 %v2168_v39, 0.0  ;;  %v2287_v18 = vmax.f32 %v2272_v59, %v2281_v60  ;;  %v2577_v39 = vrot.slane %v6153_v56, 1  ;;  %v5080_v59 = vld [vmem:[%s6635_s4 + $0x100] sm:$0xff]   ;;  %v5082_v60 = vld [vmem:[%s6635_s4 + $0x110] sm:$0xff]  }
 0x38b   : > { %v2107_v12 = vpop.f32.mrb[152].mxu1 }
 0x38c   : > { %2218 = vst [vmem:[#allocation2 + $0xb8] sm:$0xff] %v2193_v63  ;;  %v2137_v22 = vadd.f32 %v2107_v12, %v6114_v35  ;;  %v4672_v49 = vpop.f32.mrb[153].mxu1  ;;  %v6208_v20 = vpack.c.bf16 %v2287_v18, %v2286_v3  ;;  %v5083_v3 = vld [vmem:[%s6635_s4 + $0x118] sm:$0xff]   ;;  %v5084_v18 = vld [vmem:[%s6635_s4 + $0x120] sm:$0xff]   ;;  %v5085_v12 = vld [vmem:[%s6635_s4 + $0x128] sm:$0xff]  }
 0x38d   : > { %v2110_v57 = vpop.f32.mrb[154].mxu1  ;;  %v5087_v49 = vld [vmem:[%s6635_s4 + $0x138] sm:$0xff]  }
 0x38e   : > { %v2169_v8 = vadd.f32 %v6119_v34, %v2137_v22  ;;  %v4673_v43 = vpop.f32.mrb[155].mxu1  ;;  %4723 = vmatmul.mubr.bf16.gmra.mrb[160].mxu1 %v6208_v20  ;;  %v2332_v61 = vshll.u32 %v6208_v20, 16  ;;  %v2850_v35 = vrot.slane %v6208_v20, 2  ;;  %v5067_v34 = vld [vmem:[%s6635_s4 + $0x80] sm:$0xff]   ;;  %v2336_v21 = vshrl.u32 %v6208_v20, 16  ;;  %v5086_v22 = vld [vmem:[%s6635_s4 + $0x130] sm:$0xff]  }
 0x38f   : > { %4726 = vmatprep.mubr.msk.bf16.mxu1 %vm5210_vm0, %v5209_v2  ;;  %v2578_v30 = vrot.slane %v6208_v20, 1  ;;  %v5089_v20 = vld [vmem:[%s6637_s6 + $0x8] sm:$0xff]   ;;  %v5090_v43 = vld [vmem:[%s6637_s6 + $0x40] sm:$0xff]  }
 0x390   : > { %v2194_v41 = vmax.f32 %v2169_v8, 0.0  ;;  %v2334_v62 = vrot.slane %v2332_v61, 1  ;;  %v6224_v0 = vsel %vm1890_vm10, %v2849_v19, %v2850_v35  ;;  %v2713_v4 = vrot.slane %v2336_v21, 1  ;;  %v5088_v8 = vld [vmem:[%s6637_s6] sm:$0xff]  }
 0x391   : > { %v2714_v23 = vrot.slane %v2332_v61, 2  ;;  %v2579_v31 = vsel %vm1336_vm9, %v2577_v39, %v2578_v30 }
 0x392   : > { %2219 = vst [vmem:[#allocation2 + $0xc0] sm:$0xf] %v2194_v41  ;;  %v2335_v17 = vsel %vm822_vm11, %v2330_v38, %v2334_v62  ;;  %v2338_v14 = vor.u32 %v2336_v21, %v2334_v62  ;;  %v5093_v62 = vld [vmem:[%s6637_s6 + $0x18] sm:$0xff]  }
 0x393   : > { %4691 = vmatmul.mubr.bf16.vlgmr.msra.gmra.mrb[156].mxu0 %v2335_v17  ;;  %v2228_v1 = vld [vmem:[#allocation2 + $0xa0] ss:$5 sm:$0x7f]  ;;  %v2238_v53 = vld [vmem:[#allocation2 + $0xa1] ss:$5 sm:$0x7f]  ;;  %v2715_v15 = vor.u32 %v2714_v23, %v2713_v4 }
 0x394   : > { %4731 = vmatpush3.bf16.msra.mxu0 %v5067_v34  ;;  %4694 = vmatprep.mubr.msk.bf16.mxu0 %vm5210_vm0, %v5209_v2  ;;  %v2243_v26 = vmax.f32 %v2228_v1, %v2238_v53  ;;  %v5094_v34 = vld [vmem:[%s6637_s6 + $0x50] sm:$0xff]   ;;  %v5096_v17 = vld [vmem:[%s6637_s6 + $0x58] sm:$0xff]   ;;  %v5098_v1 = vld [vmem:[%s6637_s6 + $0x60] sm:$0xff]  }
 0x395   : > { %4732 = vmatprep.subr.bf16.mxu0 %v5209_v2  ;;  %v2716_v55 = vsel %vm1600_vm12, %v2712_v46, %v2715_v15  ;;  %v5099_v53 = vld [vmem:[%s6637_s6 + $0x30] sm:$0xff]  }
 0x398   : > { %4733 = vmatpush3.bf16.msra.mxu0 %v5069_v42  ;;  %v5097_v42 = vld [vmem:[%s6637_s6 + $0x28] sm:$0xff]  }
 0x399   : > { %4734 = vmatprep.subr.bf16.mxu0 %v5209_v2  ;;  %v2253_v9 = vld [vmem:[#allocation2 + $0xa2] ss:$5 sm:$0x7f]  ;;  %v2268_v37 = vld [vmem:[#allocation2 + $0xa3] ss:$5 sm:$0x7f] }
 0x39a   : > { %v2258_v25 = vmax.f32 %v2243_v26, %v2253_v9  ;;  %v2283_v11 = vld [vmem:[#allocation2 + $0xa4] ss:$5 sm:$0x7f] }
 0x39b   : > { %v5101_v26 = vld [vmem:[%s6637_s6 + $0x38] sm:$0xff]   ;;  %v5102_v9 = vld [vmem:[%s6637_s6 + $0x70] sm:$0xff]  }
 0x39c   : > { %4735 = vmatpush3.bf16.msra.mxu0 %v5071_v28  ;;  %v2273_v13 = vmax.f32 %v2258_v25, %v2268_v37  ;;  %v5100_v28 = vld [vmem:[%s6637_s6 + $0x68] sm:$0xff]   ;;  %v5104_v25 = vld [vmem:[%s6637_s6 + $0x78] sm:$0xff]  }
 0x39d   : > { %4736 = vmatprep.subr.bf16.mxu0 %v5209_v2 }
 0x39e   : > { %v2288_v44 = vmax.f32 %v2273_v13, %v2283_v11 }
 0x3a0   : > { %v6242_v33 = vpack.c.bf16 %v2288_v44, %v2288_v44  ;;  %4737 = vmatpush3.bf16.msra.mxu0 %v5073_v5 }
 0x3a1   : > { %4738 = vmatprep.subr.bf16.mxu0 %v5209_v2 }
 0x3a2   : > { %4727 = vmatmul.mubr.bf16.gmra.mrb[164].mxu1 %v6242_v33  ;;  %v2340_v40 = vshll.u32 %v6242_v33, 16  ;;  %v2344_v36 = vshrl.u32 %v6242_v33, 16  ;;  %v2580_v56 = vrot.slane %v6242_v33, 1  ;;  %v2852_v48 = vrot.slane %v6242_v33, 2 }
 0x3a3   : > { %4774 = vmatprep.mubr.msk.bf16.mxu1 %vm5210_vm0, %v5209_v2 }
 0x3a4   : > { %v2342_v52 = vrot.slane %v2340_v40, 1  ;;  %4739 = vmatpush3.bf16.msra.mxu0 %v5075_v7  ;;  %v2717_v6 = vrot.slane %v2344_v36, 1  ;;  %v2718_v51 = vrot.slane %v2340_v40, 2  ;;  %v2581_v63 = vsel %vm1336_vm9, %v2578_v30, %v2580_v56 }
 0x3a5   : > { %4740 = vmatprep.subr.bf16.mxu0 %v5209_v2  ;;  %v2853_v57 = vsel %vm1890_vm10, %v2850_v35, %v2852_v48  ;;  %v5092_v35 = vld [vmem:[%s6637_s6 + $0x48] sm:$0xff]  }
 0x3a6   : > { %v2343_v58 = vsel %vm822_vm11, %v2338_v14, %v2342_v52  ;;  %v2346_v45 = vor.u32 %v2344_v36, %v2342_v52  ;;  %v2719_v10 = vor.u32 %v2718_v51, %v2717_v6 }
 0x3a7   : > { %4695 = vmatmul.mubr.bf16.gmra.mrb[160].mxu0 %v2343_v58 }
 0x3a8   : > { %4741 = vmatpush3.bf16.msra.mxu0 %v5077_v27  ;;  %4698 = vmatprep.mubr.msk.bf16.mxu0 %vm5210_vm0, %v5209_v2  ;;  %v2720_v54 = vsel %vm1600_vm12, %v2715_v15, %v2719_v10 }
 0x3a9   : > { %4742 = vmatprep.subr.bf16.mxu0 %v5209_v2 }
 0x3aa   : > { %4775 = vmatmul.mubr.bf16.vlgmr.msra.gmra.mrb[168].mxu1 %v2716_v55 }
 0x3ab   : > { %4778 = vmatprep.mubr.msk.bf16.mxu1 %vm5210_vm0, %v5209_v2  ;;  %4815 = vmatpush3.bf16.msra.mxu1 %v5090_v43 }
 0x3ac   : > { %4743 = vmatpush3.bf16.msra.mxu0 %v5078_v50  ;;  %4816 = vmatprep.subr.bf16.mxu1 %v5209_v2 }
 0x3ad   : > { %4744 = vmatprep.subr.bf16.mxu0 %v5209_v2 }
 0x3af   : > { %4699 = vmatmul.mubr.bf16.gmra.mrb[164].mxu0 %v2346_v45  ;;  %4817 = vmatpush3.bf16.msra.mxu1 %v5092_v35 }
 0x3b0   : > { %4745 = vmatpush3.bf16.msra.mxu0 %v5079_v29  ;;  %4746 = vmatprep.mubr.msk.bf16.mxu0 %vm5210_vm0, %v5209_v2 }
 0x3b1   : > { %4786 = vmatprep.subr.bf16.mxu0 %v5209_v2  ;;  %4818 = vmatprep.subr.bf16.mxu1 %v5209_v2 }
 0x3b2   : > { %4779 = vmatmul.mubr.bf16.gmra.mrb[172].mxu1 %v2720_v54 }
 0x3b3   : > { %4782 = vmatprep.mubr.msk.bf16.mxu1 %vm5210_vm0, %v5209_v2  ;;  %4819 = vmatpush3.bf16.msra.mxu1 %v5094_v34 }
 0x3b4   : > { %4820 = vmatprep.subr.bf16.mxu1 %v5209_v2 }
 0x3b7   : > { %4747 = vmatmul.mubr.bf16.vlgmr.msra.gmra.mrb[168].mxu0 %v2579_v31  ;;  %4821 = vmatpush3.bf16.msra.mxu1 %v5096_v17 }
 0x3b8   : > { %4787 = vmatpush3.bf16.msra.mxu0 %v5080_v59  ;;  %4750 = vmatprep.mubr.msk.bf16.mxu0 %vm5210_vm0, %v5209_v2 }
 0x3b9   : > { %4788 = vmatprep.subr.bf16.mxu0 %v5209_v2  ;;  %4822 = vmatprep.subr.bf16.mxu1 %v5209_v2 }
 0x3ba   : > { %4783 = vmatmul.mubr.bf16.gmra.mrb[176].mxu1 %v2719_v10 }
 0x3bb   : > { %4830 = vmatprep.mubr.msk.bf16.mxu1 %vm5210_vm0, %v5209_v2  ;;  %4823 = vmatpush3.bf16.msra.mxu1 %v5098_v1 }
 0x3bc   : > { %4789 = vmatpush3.bf16.msra.mxu0 %v5081_v24  ;;  %4824 = vmatprep.subr.bf16.mxu1 %v5209_v2 }
 0x3bd   : > { %4790 = vmatprep.subr.bf16.mxu0 %v5209_v2 }
 0x3bf   : > { %4751 = vmatmul.mubr.bf16.gmra.mrb[172].mxu0 %v2581_v63  ;;  %4825 = vmatpush3.bf16.msra.mxu1 %v5100_v28 }
 0x3c0   : > { %4791 = vmatpush3.bf16.msra.mxu0 %v5082_v60  ;;  %4754 = vmatprep.mubr.msk.bf16.mxu0 %vm5210_vm0, %v5209_v2 }
 0x3c1   : > { %4792 = vmatprep.subr.bf16.mxu0 %v5209_v2  ;;  %4826 = vmatprep.subr.bf16.mxu1 %v5209_v2 }
 0x3c3   : > { %4827 = vmatpush3.bf16.msra.mxu1 %v5102_v9 }
 0x3c4   : > { %4793 = vmatpush3.bf16.msra.mxu0 %v5083_v3  ;;  %4828 = vmatprep.subr.bf16.mxu1 %v5209_v2 }
 0x3c5   : > { %4794 = vmatprep.subr.bf16.mxu0 %v5209_v2 }
 0x3c7   : > { %4755 = vmatmul.mubr.bf16.gmra.mrb[176].mxu0 %v2580_v56  ;;  %4829 = vmatpush3.bf16.msra.mxu1 %v5104_v25 }
 0x3c8   : > { %4795 = vmatpush3.bf16.msra.mxu0 %v5084_v18  ;;  %4802 = vmatprep.mubr.msk.bf16.mxu0 %vm5210_vm0, %v5209_v2 }
 0x3c9   : > { %4796 = vmatprep.subr.bf16.mxu0 %v5209_v2  ;;  %4854 = vmatprep.subr.bf16.mxu1 %v5209_v2 }
 0x3cc   : > { %4797 = vmatpush3.bf16.msra.mxu0 %v5085_v12 }
 0x3cd   : > { %4798 = vmatprep.subr.bf16.mxu0 %v5209_v2 }
 0x3d0   : > { %4799 = vmatpush3.bf16.msra.mxu0 %v5086_v22 }
 0x3d1   : > { %4800 = vmatprep.subr.bf16.mxu0 %v5209_v2 }
 0x3d4   : > { %4801 = vmatpush3.bf16.msra.mxu0 %v5087_v49 }
 0x3d5   : > { %4834 = vmatprep.subr.bf16.mxu0 %v5209_v2 }
 0x3d7   : > { %4803 = vmatmul.mubr.bf16.vlgmr.msra.gmra.mrb[180].mxu0 %v6224_v0  ;;  %v5095_v0 = vld [vmem:[%s6637_s6 + $0x20] sm:$0xff]  }
 0x3d8   : > { %4806 = vmatprep.mubr.msk.bf16.mxu0 %vm5210_vm0, %v5209_v2  ;;  %4835 = vmatpush3.bf16.msra.mxu0 %v5088_v8 }
 0x3d9   : > { %4836 = vmatprep.subr.bf16.mxu0 %v5209_v2 }
 0x3dc   : > { %4837 = vmatpush3.bf16.msra.mxu0 %v5089_v20 }
 0x3dd   : > { %4838 = vmatprep.subr.bf16.mxu0 %v5209_v2 }
 0x3df   : > { %4807 = vmatmul.mubr.bf16.gmra.mrb[184].mxu0 %v2853_v57 }
 0x3e0   : > { %4810 = vmatprep.mubr.msk.bf16.mxu0 %vm5210_vm0, %v5209_v2  ;;  %4839 = vmatpush3.bf16.msra.mxu0 %v5091_v47 }
 0x3e1   : > { %4840 = vmatprep.subr.bf16.mxu0 %v5209_v2 }
 0x3e4   : > { %4841 = vmatpush3.bf16.msra.mxu0 %v5093_v62 }
 0x3e5   : > { %4842 = vmatprep.subr.bf16.mxu0 %v5209_v2 }
 0x3e7   : > { %4811 = vmatmul.mubr.bf16.gmra.mrb[188].mxu0 %v2852_v48 }
 0x3e8   : > { %4850 = vmatprep.mubr.msk.bf16.mxu0 %vm5210_vm0, %v5209_v2  ;;  %4843 = vmatpush3.bf16.msra.mxu0 %v5095_v0 }
 0x3e9   : > { %4844 = vmatprep.subr.bf16.mxu0 %v5209_v2 }
 0x3ec   : > { %4845 = vmatpush3.bf16.msra.mxu0 %v5097_v42 }
 0x3ed   : > { %4846 = vmatprep.subr.bf16.mxu0 %v5209_v2 }
 0x3f0   : > { %4847 = vmatpush3.bf16.msra.mxu0 %v5099_v53 }
 0x3f1   : > { %4848 = vmatprep.subr.bf16.mxu0 %v5209_v2 }
 0x3f4   : > { %4849 = vmatpush3.bf16.msra.mxu0 %v5101_v26  ;;  %v3961_v26 = vld [vmem:[%s6636_s5] ss:$0 sm:$0xff] }
 0x3f5   : > { %4874 = vmatprep.subr.bf16.mxu0 %v5209_v2 }
 0x439   : > { %v2536_v61 = vpop.f32.mrb[156].mxu1 }
 0x43a   : > { %v4720_v19 = vpop.f32.mrb[157].mxu1 }
 0x43b   : > { %v2539_v41 = vpop.f32.mrb[158].mxu1 }
 0x43c   : > { %v4721_v38 = vpop.f32.mrb[159].mxu1 }
 0x461   : > { %v2544_v37 = vpop.f32.mrb[160].mxu1 }
 0x462   : > { %v4724_v13 = vpop.f32.mrb[161].mxu1 }
 0x463   : > { %v2547_v5 = vpop.f32.mrb[162].mxu1 }
 0x464   : > { %v4725_v11 = vpop.f32.mrb[163].mxu1 }
 0x466   : > { %v2432_v21 = vpop.f32.mrb[156].mxu0 }
 0x467   : > { %v2537_v44 = vadd.f32 %v2536_v61, %v2432_v21  ;;  %v4692_v33 = vpop.f32.mrb[157].mxu0 }
 0x468   : > { %v2435_v7 = vpop.f32.mrb[158].mxu0 }
 0x469   : > { %v2540_v4 = vadd.f32 %v2539_v41, %v2435_v7  ;;  %v4693_v23 = vpop.f32.mrb[159].mxu0 }
 0x475   : > { %v2552_v40 = vpop.f32.mrb[164].mxu1 }
 0x476   : > { %v4728_v32 = vpop.f32.mrb[165].mxu1 }
 0x477   : > { %v2555_v16 = vpop.f32.mrb[166].mxu1 }
 0x478   : > { %v4729_v14 = vpop.f32.mrb[167].mxu1 }
 0x47a   : > { %v2440_v52 = vpop.f32.mrb[160].mxu0 }
 0x47b   : > { %v2545_v27 = vadd.f32 %v2544_v37, %v2440_v52  ;;  %v4696_v15 = vpop.f32.mrb[161].mxu0 }
 0x47c   : > { %v2443_v36 = vpop.f32.mrb[162].mxu0 }
 0x47d   : > { %v2548_v58 = vadd.f32 %v2547_v5, %v2443_v36  ;;  %v4697_v46 = vpop.f32.mrb[163].mxu0  ;;  %v2806_v50 = vpop.f32.mrb[168].mxu1 }
 0x47e   : > { %v4776_v55 = vpop.f32.mrb[169].mxu1 }
 0x47f   : > { %v2809_v6 = vpop.f32.mrb[170].mxu1 }
 0x480   : > { %v4777_v51 = vpop.f32.mrb[171].mxu1 }
 0x482   : > { %v2448_v29 = vpop.f32.mrb[164].mxu0 }
 0x483   : > { %v2553_v45 = vadd.f32 %v2552_v40, %v2448_v29  ;;  %v4700_v10 = vpop.f32.mrb[165].mxu0 }
 0x484   : > { %v2451_v54 = vpop.f32.mrb[166].mxu0 }
 0x485   : > { %v4701_v30 = vpop.f32.mrb[167].mxu0  ;;  %v2814_v39 = vpop.f32.mrb[172].mxu1 }
 0x486   : > { %v4780_v59 = vpop.f32.mrb[173].mxu1 }
 0x487   : > { %v2817_v31 = vpop.f32.mrb[174].mxu1 }
 0x488   : > { %v4781_v24 = vpop.f32.mrb[175].mxu1 }
 0x48a   : > { %v2667_v56 = vpop.f32.mrb[168].mxu0 }
 0x48b   : > { %v2689_v60 = vadd.f32 %v2667_v56, %v2537_v44  ;;  %v4748_v63 = vpop.f32.mrb[169].mxu0  ;;  %v5103_v56 = vld [vmem:[%s6637_s6 + $0xc0] sm:$0xff]  }
 0x48c   : > { %v2670_v3 = vpop.f32.mrb[170].mxu0 }
 0x48d   : > { %v2690_v18 = vadd.f32 %v2670_v3, %v2540_v4  ;;  %v4749_v12 = vpop.f32.mrb[171].mxu0  ;;  %v2822_v22 = vpop.f32.mrb[176].mxu1  ;;  %v2828_v49 = vadd.f32 %v2806_v50, %v2689_v60  ;;  %v5105_v3 = vld [vmem:[%s6637_s6 + $0xc8] sm:$0xff]  }
 0x48e   : > { %v4784_v48 = vpop.f32.mrb[177].mxu1 }
 0x48f   : > { %v2825_v57 = vpop.f32.mrb[178].mxu1  ;;  %v2829_v8 = vadd.f32 %v2809_v6, %v2690_v18  ;;  %v5107_v48 = vld [vmem:[%s6637_s6 + $0xd0] sm:$0xff]  }
 0x490   : > { %v4785_v20 = vpop.f32.mrb[179].mxu1  ;;  %v5108_v57 = vld [vmem:[%s6637_s6 + $0x88] sm:$0xff]  }
 0x491   : > { %v5110_v20 = vld [vmem:[%s6637_s6 + $0x90] sm:$0xff]  }
 0x492   : > { %v2675_v43 = vpop.f32.mrb[172].mxu0 }
 0x493   : > { %v2691_v47 = vadd.f32 %v2675_v43, %v2545_v27  ;;  %v4752_v61 = vpop.f32.mrb[173].mxu0  ;;  %v5111_v43 = vld [vmem:[%s6637_s6 + $0xe0] sm:$0xff]  }
 0x494   : > { %v2678_v19 = vpop.f32.mrb[174].mxu0  ;;  %v5113_v61 = vld [vmem:[%s6637_s6 + $0xe8] sm:$0xff]  }
 0x495   : > { %v2692_v35 = vadd.f32 %v2678_v19, %v2548_v58  ;;  %v4753_v41 = vpop.f32.mrb[175].mxu0  ;;  %v2830_v38 = vadd.f32 %v2814_v39, %v2691_v47  ;;  %v5112_v47 = vld [vmem:[%s6637_s6 + $0x98] sm:$0xff]   ;;  %v5114_v19 = vld [vmem:[%s6637_s6 + $0xa0] sm:$0xff]  }
 0x496   : > { %v5116_v41 = vld [vmem:[%s6637_s6 + $0xa8] sm:$0xff]  }
 0x497   : > { %v2831_v62 = vadd.f32 %v2817_v31, %v2692_v35  ;;  %v5115_v35 = vld [vmem:[%s6637_s6 + $0xf0] sm:$0xff]  }
 0x49a   : > { %v2683_v34 = vpop.f32.mrb[176].mxu0 }
 0x49b   : > { %v2693_v0 = vadd.f32 %v2683_v34, %v2553_v45  ;;  %v4756_v17 = vpop.f32.mrb[177].mxu0 }
 0x49c   : > { %v2686_v42 = vpop.f32.mrb[178].mxu0 }
 0x49d   : > { %v4757_v1 = vpop.f32.mrb[179].mxu0  ;;  %v2832_v53 = vadd.f32 %v2822_v22, %v2693_v0  ;;  %v5106_v22 = vld [vmem:[%s6637_s6 + $0x80] sm:$0xff]   ;;  %v5118_v0 = vld [vmem:[%s6637_s6 + $0xb0] sm:$0xff]   ;;  %v5119_v42 = vld [vmem:[%s6637_s6 + $0xb8] sm:$0xff]  }
 0x49e   : > { %v5120_v1 = vld [vmem:[%s6637_s6 + $0x100] sm:$0xff]  }
 0x4aa   : > { %v2939_v28 = vpop.f32.mrb[180].mxu0 }
 0x4ab   : > { %v2961_v9 = vadd.f32 %v2939_v28, %v2828_v49  ;;  %v4804_v25 = vpop.f32.mrb[181].mxu0  ;;  %v5121_v28 = vld [vmem:[%s6637_s6 + $0x108] sm:$0xff]  }
 0x4ac   : > { %v2942_v37 = vpop.f32.mrb[182].mxu0  ;;  %v5124_v25 = vld [vmem:[%s6637_s6 + $0x120] sm:$0xff]  }
 0x4ad   : > { %v2973_v13 = vadd.f32 %v3961_v26, %v2961_v9  ;;  %v2962_v5 = vadd.f32 %v2942_v37, %v2829_v8  ;;  %v4805_v11 = vpop.f32.mrb[183].mxu0  ;;  %v5109_v8 = vld [vmem:[%s6637_s6 + $0xd8] sm:$0xff]   ;;  %v5125_v37 = vld [vmem:[%s6637_s6 + $0x128] sm:$0xff]  }
 0x4ae   : > { %v5123_v9 = vld [vmem:[%s6637_s6 + $0x118] sm:$0xff]  }
 0x4af   : > { %v2978_v21 = vmax.f32 %v2973_v13, 0.0  ;;  %v2974_v44 = vadd.f32 %v3961_v26, %v2962_v5  ;;  %v5126_v13 = vld [vmem:[%s6637_s6 + $0x130] sm:$0xff]   ;;  %v5127_v5 = vld [vmem:[%s6637_s6 + $0x138] sm:$0xff]  }
 0x4b1   : > { %2983 = vst [vmem:[#allocation3] sm:$0xff] %v2978_v21  ;;  %v2979_v33 = vmax.f32 %v2974_v44, 0.0  ;;  %v5128_v21 = vld [vmem:[%s6639_s8] sm:$0xff]   ;;  %v5129_v44 = vld [vmem:[%s6639_s8 + $0x8] sm:$0xff]  }
 0x4b2   : > { %v2947_v7 = vpop.f32.mrb[184].mxu0 }
 0x4b3   : > { %2984 = vst [vmem:[#allocation3 + $0x8] sm:$0xff] %v2979_v33  ;;  %v2963_v4 = vadd.f32 %v2947_v7, %v2830_v38  ;;  %v4808_v23 = vpop.f32.mrb[185].mxu0  ;;  %v5117_v38 = vld [vmem:[%s6637_s6 + $0xf8] sm:$0xff]   ;;  %v5130_v33 = vld [vmem:[%s6639_s8 + $0x10] sm:$0xff]  }
 0x4b4   : > { %v2950_v40 = vpop.f32.mrb[186].mxu0  ;;  %v5131_v7 = vld [vmem:[%s6639_s8 + $0x18] sm:$0xff]   ;;  %v5133_v23 = vld [vmem:[%s6639_s8 + $0x28] sm:$0xff]  }
 0x4b5   : > { %v2975_v32 = vadd.f32 %v3961_v26, %v2963_v4  ;;  %v2964_v16 = vadd.f32 %v2950_v40, %v2831_v62  ;;  %v4809_v14 = vpop.f32.mrb[187].mxu0  ;;  %v5132_v4 = vld [vmem:[%s6639_s8 + $0x20] sm:$0xff]   ;;  %v5134_v40 = vld [vmem:[%s6639_s8 + $0x30] sm:$0xff]  }
 0x4b6   : > { %v5137_v14 = vld [vmem:[%s6641_s10 + $0x8] sm:$0xff]  }
 0x4b7   : > { %v2980_v52 = vmax.f32 %v2975_v32, 0.0  ;;  %v2976_v27 = vadd.f32 %v3961_v26, %v2964_v16  ;;  %v5135_v32 = vld [vmem:[%s6639_s8 + $0x38] sm:$0xff]   ;;  %v5136_v16 = vld [vmem:[%s6641_s10] sm:$0xff]  }
 0x4b9   : > { %2985 = vst [vmem:[#allocation3 + $0x10] sm:$0xff] %v2980_v52  ;;  %v2981_v15 = vmax.f32 %v2976_v27, 0.0  ;;  %v5138_v52 = vld [vmem:[%s6641_s10 + $0x10] sm:$0xff]   ;;  %v5139_v27 = vld [vmem:[%s6641_s10 + $0x18] sm:$0xff]  }
 0x4ba   : > { %v2955_v36 = vpop.f32.mrb[188].mxu0 }
 0x4bb   : > { %2986 = vst [vmem:[#allocation3 + $0x18] sm:$0xff] %v2981_v15  ;;  %v2965_v58 = vadd.f32 %v2955_v36, %v2832_v53  ;;  %v4812_v46 = vpop.f32.mrb[189].mxu0  ;;  %v5140_v15 = vld [vmem:[%s6641_s10 + $0x20] sm:$0xff]   ;;  %v5141_v36 = vld [vmem:[%s6641_s10 + $0x28] sm:$0xff]  }
 0x4bc   : > { %v2958_v50 = vpop.f32.mrb[190].mxu0 }
 0x4bd   : > { %v2977_v55 = vadd.f32 %v3961_v26, %v2965_v58  ;;  %v4813_v6 = vpop.f32.mrb[191].mxu0  ;;  %v5122_v26 = vld [vmem:[%s6637_s6 + $0x110] sm:$0xff]  }
 0x4bf   : > { %v2982_v51 = vmax.f32 %v2977_v55, 0.0 }
 0x4c1   : > { %2987 = vst [vmem:[#allocation3 + $0x20] sm:$0x7] %v2982_v51 }
 0x4c2   : > { %v2988_v29 = vld [vmem:[#allocation3] ss:$5 sm:$0x7f]  ;;  %v2990_v45 = vld [vmem:[#allocation3 + $0x1] ss:$5 sm:$0x7f] }
 0x4c3   : > { %v2991_v10 = vmax.f32 %v2988_v29, %v2990_v45 }
 0x4c8   : > { %v2993_v54 = vld [vmem:[#allocation3 + $0x2] ss:$5 sm:$0x7f]  ;;  %v2996_v39 = vld [vmem:[#allocation3 + $0x3] ss:$5 sm:$0x7f] }
 0x4c9   : > { %v2994_v30 = vmax.f32 %v2991_v10, %v2993_v54  ;;  %v2999_v31 = vld [vmem:[#allocation3 + $0x4] ss:$5 sm:$0x7f] }
 0x4cb   : > { %v2997_v59 = vmax.f32 %v2994_v30, %v2996_v39 }
 0x4cd   : > { %v3000_v24 = vmax.f32 %v2997_v59, %v2999_v31 }
 0x4cf   : > { %v6403_v60 = vpack.c.bf16 %v3000_v24, %v3000_v24 }
 0x4d1   : > { %4851 = vmatmul.mubr.bf16.vlgmr.msra.gmra.mrb[192].mxu0 %v6403_v60  ;;  %v3037_v63 = vshll.u32 %v6403_v60, 16  ;;  %v3035_v18 = vshrl.u32 %v6403_v60, 16  ;;  %v3235_v53 = vrot.slane %v6403_v60, 1  ;;  %v3451_v11 = vrot.slane %v6403_v60, 2 }
 0x4d2   : > { %4875 = vmatpush3.bf16.msra.mxu0 %v5103_v56  ;;  %4890 = vmatprep.mubr.msk.bf16.mxu0 %vm5210_vm0, %v5209_v2 }
 0x4d3   : > { %4876 = vmatprep.subr.bf16.mxu0 %v5209_v2  ;;  %v3039_v12 = vrot.slane %v3037_v63, 1  ;;  %v3342_v62 = vrot.slane %v3035_v18, 1  ;;  %v3343_v34 = vrot.slane %v3037_v63, 2 }
 0x4d5   : > { %v3040_v49 = vor.u32 %v3039_v12, %v3035_v18  ;;  %v3344_v17 = vor.u32 %v3343_v34, %v3342_v62  ;;  %v4002_v12 = vld [vmem:[%s6638_s7] ss:$0 sm:$0xff]  ;;  %v5142_v34 = vld [vmem:[%s6641_s10 + $0x30] sm:$0xff]  }
 0x4d6   : > { %4877 = vmatpush3.bf16.msra.mxu0 %v5105_v3 }
 0x4d7   : > { %4831 = vmatmul.mubr.bf16.vlgmr.msra.gmra.mrb[180].mxu1 %v3040_v49  ;;  %4878 = vmatprep.subr.bf16.mxu0 %v5209_v2 }
 0x4d8   : > { %4855 = vmatpush3.bf16.msra.mxu1 %v5106_v22  ;;  %4870 = vmatprep.mubr.msk.bf16.mxu1 %vm5210_vm0, %v5209_v2 }
 0x4d9   : > { %4856 = vmatprep.subr.bf16.mxu1 %v5209_v2 }
 0x4da   : > { %4879 = vmatpush3.bf16.msra.mxu0 %v5107_v48 }
 0x4db   : > { %4880 = vmatprep.subr.bf16.mxu0 %v5209_v2 }
 0x4dc   : > { %4857 = vmatpush3.bf16.msra.mxu1 %v5108_v57 }
 0x4dd   : > { %4858 = vmatprep.subr.bf16.mxu1 %v5209_v2 }
 0x4de   : > { %4881 = vmatpush3.bf16.msra.mxu0 %v5109_v8 }
 0x4df   : > { %4882 = vmatprep.subr.bf16.mxu0 %v5209_v2 }
 0x4e0   : > { %4859 = vmatpush3.bf16.msra.mxu1 %v5110_v20 }
 0x4e1   : > { %4860 = vmatprep.subr.bf16.mxu1 %v5209_v2 }
 0x4e2   : > { %4883 = vmatpush3.bf16.msra.mxu0 %v5111_v43 }
 0x4e3   : > { %4884 = vmatprep.subr.bf16.mxu0 %v5209_v2 }
 0x4e4   : > { %4861 = vmatpush3.bf16.msra.mxu1 %v5112_v47 }
 0x4e5   : > { %4862 = vmatprep.subr.bf16.mxu1 %v5209_v2 }
 0x4e6   : > { %4885 = vmatpush3.bf16.msra.mxu0 %v5113_v61 }
 0x4e7   : > { %4886 = vmatprep.subr.bf16.mxu0 %v5209_v2 }
 0x4e8   : > { %4863 = vmatpush3.bf16.msra.mxu1 %v5114_v19 }
 0x4e9   : > { %4864 = vmatprep.subr.bf16.mxu1 %v5209_v2 }
 0x4ea   : > { %4887 = vmatpush3.bf16.msra.mxu0 %v5115_v35 }
 0x4eb   : > { %4888 = vmatprep.subr.bf16.mxu0 %v5209_v2 }
 0x4ec   : > { %4865 = vmatpush3.bf16.msra.mxu1 %v5116_v41 }
 0x4ed   : > { %4866 = vmatprep.subr.bf16.mxu1 %v5209_v2 }
 0x4ee   : > { %4889 = vmatpush3.bf16.msra.mxu0 %v5117_v38 }
 0x4ef   : > { %4914 = vmatprep.subr.bf16.mxu0 %v5209_v2 }
 0x4f0   : > { %4867 = vmatpush3.bf16.msra.mxu1 %v5118_v0  ;;  %v5143_v0 = vld [vmem:[%s6641_s10 + $0x38] sm:$0xff]  }
 0x4f1   : > { %4891 = vmatmul.mubr.bf16.vlgmr.msra.gmra.mrb[196].mxu0 %v3344_v17  ;;  %4868 = vmatprep.subr.bf16.mxu1 %v5209_v2  ;;  %v3576_v17 = vld [vmem:[%s6640_s9] sm:$0x1] }
 0x4f2   : > { %4930 = vmatprep.mubr.msk.bf16.mxu0 %vm5210_vm0, %v5209_v2  ;;  %4915 = vmatpush3.bf16.msra.mxu0 %v5128_v21 }
 0x4f3   : > { %4916 = vmatprep.subr.bf16.mxu0 %v5209_v2 }
 0x4f4   : > { %4869 = vmatpush3.bf16.msra.mxu1 %v5119_v42 }
 0x4f5   : > { %4894 = vmatprep.subr.bf16.mxu1 %v5209_v2 }
 0x4f6   : > { %4917 = vmatpush3.bf16.msra.mxu0 %v5129_v44 }
 0x4f7   : > { %4871 = vmatmul.mubr.bf16.vlgmr.msra.gmra.mrb[184].mxu1 %v3235_v53  ;;  %4918 = vmatprep.subr.bf16.mxu0 %v5209_v2 }
 0x4f8   : > { %4895 = vmatpush3.bf16.msra.mxu1 %v5120_v1  ;;  %4910 = vmatprep.mubr.msk.bf16.mxu1 %vm5210_vm0, %v5209_v2 }
 0x4f9   : > { %4896 = vmatprep.subr.bf16.mxu1 %v5209_v2 }
 0x4fa   : > { %4919 = vmatpush3.bf16.msra.mxu0 %v5130_v33 }
 0x4fb   : > { %4920 = vmatprep.subr.bf16.mxu0 %v5209_v2 }
 0x4fc   : > { %4897 = vmatpush3.bf16.msra.mxu1 %v5121_v28 }
 0x4fd   : > { %4898 = vmatprep.subr.bf16.mxu1 %v5209_v2 }
 0x4fe   : > { %4921 = vmatpush3.bf16.msra.mxu0 %v5131_v7 }
 0x4ff   : > { %4922 = vmatprep.subr.bf16.mxu0 %v5209_v2 }
 0x500   : > { %4899 = vmatpush3.bf16.msra.mxu1 %v5122_v26 }
 0x501   : > { %4900 = vmatprep.subr.bf16.mxu1 %v5209_v2 }
 0x502   : > { %4923 = vmatpush3.bf16.msra.mxu0 %v5132_v4 }
 0x503   : > { %4924 = vmatprep.subr.bf16.mxu0 %v5209_v2 }
 0x504   : > { %4901 = vmatpush3.bf16.msra.mxu1 %v5123_v9 }
 0x505   : > { %4902 = vmatprep.subr.bf16.mxu1 %v5209_v2 }
 0x506   : > { %4925 = vmatpush3.bf16.msra.mxu0 %v5133_v23 }
 0x507   : > { %4926 = vmatprep.subr.bf16.mxu0 %v5209_v2 }
 0x508   : > { %4903 = vmatpush3.bf16.msra.mxu1 %v5124_v25 }
 0x509   : > { %4904 = vmatprep.subr.bf16.mxu1 %v5209_v2 }
 0x50a   : > { %4927 = vmatpush3.bf16.msra.mxu0 %v5134_v40 }
 0x50b   : > { %4928 = vmatprep.subr.bf16.mxu0 %v5209_v2 }
 0x50c   : > { %4905 = vmatpush3.bf16.msra.mxu1 %v5125_v37 }
 0x50d   : > { %4906 = vmatprep.subr.bf16.mxu1 %v5209_v2 }
 0x50e   : > { %4929 = vmatpush3.bf16.msra.mxu0 %v5135_v32 }
 0x510   : > { %4907 = vmatpush3.bf16.msra.mxu1 %v5126_v13 }
 0x511   : > { %4908 = vmatprep.subr.bf16.mxu1 %v5209_v2 }
 0x514   : > { %4909 = vmatpush3.bf16.msra.mxu1 %v5127_v5 }
 0x515   : > { %4934 = vmatprep.subr.bf16.mxu1 %v5209_v2 }
 0x517   : > { %4911 = vmatmul.mubr.bf16.vlgmr.msra.gmra.mrb[188].mxu1 %v3451_v11 }
 0x518   : > { %4950 = vmatprep.mubr.msk.bf16.mxu1 %vm5210_vm0, %v5209_v2  ;;  %4935 = vmatpush3.bf16.msra.mxu1 %v5136_v16  ;;  %vm3551_vm0 = vcmask 1042432  }
 0x519   : > { %4936 = vmatprep.subr.bf16.mxu1 %v5209_v2 }
 0x51c   : > { %4937 = vmatpush3.bf16.msra.mxu1 %v5137_v14 }
 0x51d   : > { %4938 = vmatprep.subr.bf16.mxu1 %v5209_v2 }
 0x520   : > { %4939 = vmatpush3.bf16.msra.mxu1 %v5138_v52 }
 0x521   : > { %4940 = vmatprep.subr.bf16.mxu1 %v5209_v2 }
 0x524   : > { %4941 = vmatpush3.bf16.msra.mxu1 %v5139_v27 }
 0x525   : > { %4942 = vmatprep.subr.bf16.mxu1 %v5209_v2 }
 0x528   : > { %4943 = vmatpush3.bf16.msra.mxu1 %v5140_v15 }
 0x529   : > { %4944 = vmatprep.subr.bf16.mxu1 %v5209_v2 }
 0x52c   : > { %4945 = vmatpush3.bf16.msra.mxu1 %v5141_v36 }
 0x52d   : > { %4946 = vmatprep.subr.bf16.mxu1 %v5209_v2 }
 0x530   : > { %4947 = vmatpush3.bf16.msra.mxu1 %v5142_v34 }
 0x531   : > { %4948 = vmatprep.subr.bf16.mxu1 %v5209_v2  ;;  %v3683_v2 = vld [vmem:[%s6642_s11] sm:$0x1] }
 0x534   : > { %4949 = vmatpush3.bf16.msra.mxu1 %v5143_v0 }
 0x5a4   : > { %v3212_v58 = vpop.f32.mrb[192].mxu0 }
 0x5a5   : > { %v4852_v46 = vpop.f32.mrb[193].mxu0 }
 0x5a6   : > { %v3215_v50 = vpop.f32.mrb[194].mxu0 }
 0x5a7   : > { %v4853_v55 = vpop.f32.mrb[195].mxu0 }
 0x5aa   : > { %v3124_v6 = vpop.f32.mrb[180].mxu1 }
 0x5ab   : > { %v3213_v51 = vadd.f32 %v3212_v58, %v3124_v6  ;;  %v4832_v29 = vpop.f32.mrb[181].mxu1 }
 0x5ac   : > { %v3127_v45 = vpop.f32.mrb[182].mxu1 }
 0x5ad   : > { %v4833_v10 = vpop.f32.mrb[183].mxu1 }
 0x5c4   : > { %v3428_v54 = vpop.f32.mrb[196].mxu0 }
 0x5c5   : > { %v4892_v30 = vpop.f32.mrb[197].mxu0 }
 0x5c6   : > { %v3431_v39 = vpop.f32.mrb[198].mxu0 }
 0x5c7   : > { %v4893_v59 = vpop.f32.mrb[199].mxu0 }
 0x5ca   : > { %v3319_v31 = vpop.f32.mrb[184].mxu1 }
 0x5cb   : > { %v3325_v24 = vadd.f32 %v3319_v31, %v3213_v51  ;;  %v4872_v56 = vpop.f32.mrb[185].mxu1 }
 0x5cc   : > { %v3322_v60 = vpop.f32.mrb[186].mxu1 }
 0x5cd   : > { %v4873_v63 = vpop.f32.mrb[187].mxu1  ;;  %v3434_v3 = vadd.f32 %v3428_v54, %v3325_v24 }
 0x5ea   : > { %v3535_v18 = vpop.f32.mrb[188].mxu1 }
 0x5eb   : > { %v3541_v22 = vadd.f32 %v3535_v18, %v3434_v3  ;;  %v4912_v49 = vpop.f32.mrb[189].mxu1 }
 0x5ec   : > { %v3538_v48 = vpop.f32.mrb[190].mxu1 }
 0x5ed   : > { %v3549_v57 = vadd.f32 %v4002_v12, %v3541_v22  ;;  %v4913_v8 = vpop.f32.mrb[191].mxu1 }
 0x5ef   : > { %v3550_v20 = vmax.f32 %v3549_v57, 0.0 }
 0x5f1   : > { %v3552_v43 = vsel %vm3551_vm0, %v3550_v20, -inf }
 0x5f2   : > { %v3553_v47 = vrot.slane %v3552_v43, 4 }
 0x5f4   : > { %v3554_v61 = vmax.f32 %v3552_v43, %v3553_v47 }
 0x5f6   : > { %v3555_v19 = vrot.slane %v3554_v61, 2 }
 0x5f8   : > { %v3556_v35 = vmax.f32 %v3554_v61, %v3555_v19 }
 0x5fa   : > { %v3557_v41 = vrot.slane %v3556_v35, 1 }
 0x5fc   : > { %v3558_v38 = vmax.f32 %v3556_v35, %v3557_v41 }
 0x5fe   : > { %v3559_v62 = vpack.c.bf16 %v3558_v38, %v3558_v38 }
 0x600   : > { %4931 = vmatmul.mubr.bf16.vlgmr.msra.gmra.mrb[200].mxu0 %v3559_v62 }
 0x6d3   : > { %v3659_v42 = vpop.f32.mrb[200].mxu0 }
 0x6d4   : > { %v3660_v1 = vadd.f32 %v3659_v42, %v3576_v17  ;;  %v4932_v53 = vpop.f32.mrb[201].mxu0 }
 0x6d5   : > { %v3662_v28 = vpop.f32.mrb[202].mxu0 }
 0x6d6   : > { %v3665_v26 = vmax.f32 %v3660_v1, 0.0  ;;  %v4933_v9 = vpop.f32.mrb[203].mxu0 }
 0x6d8   : > { %v3666_v25 = vpack.c.bf16 %v3665_v26, %v3665_v26 }
 0x6da   : > { %4951 = vmatmul.mubr.bf16.vlgmr.msra.gmra.mrb[192].mxu1 %v3666_v25 }
 0x7ad   : > { %v3766_v37 = vpop.f32.mrb[192].mxu1 }
 0x7ae   : > { %v3767_v13 = vadd.f32 %v3766_v37, %v3683_v2  ;;  %v4952_v5 = vpop.f32.mrb[193].mxu1 }
 0x7af   : > { %v3769_v11 = vpop.f32.mrb[194].mxu1 }
 0x7b0   : > { %3772 = vst [vmem:[%s405_s16] sm:$0x1] %v3767_v13  ;;  %v4953_v21 = vpop.f32.mrb[195].mxu1 }
 0x7b1   : > { %5157 = shalt.err (!%p5154_p3)
}
 0x7b2   : > { %s5158_s20 = scalar_lea.hbm %s6589_s19, 16  ;;  %s5162_s18 = scalar_lea.hbm %s6643_s12, 32 }
 0x7b3   : > { %p5159_p4 = scmp.ne.s32.totalorder %s6589_s19, %s5158_s20  ;;  %p5163_p9 = scmp.lt.u32.totalorder %s6589_s19, %s6643_s12 }
 0x7b4   : > { %p5164_p10 = scmp.lt.u32.totalorder %s5162_s18, %s5158_s20  ;;  %p5166_p12 = scmp.lt.u32.totalorder %s5158_s20, %s6589_s19 }
 0x7b5   : > { %p5160_p7 = pnand %p5159_p4, %p5316_p5 }
 0x7b6   : > { %p5165_p11 = por %p5164_p10, %p5163_p9 }
 0x7b7   : > { %p5161_p8 = pneg %p5160_p7 }
 0x7b8   : > { %p5167_p13 = por %p5166_p12, %p5165_p11 }
 0x7ba   : > { %p5168_p0 = pnand %p5167_p13, %p5161_p8 }
 0x7bc   : > { %5171 = shalt.err (!%p5168_p0)
}
 0x7bd   : > { %4955 = dma.vmem_to_hbm [thread:$0]  (%p5316_p5), %s6591_s29, 16, %s6589_s19, %s3774_s26  }
 0x7be PF: > { %p4961_p1 = scmp.ge.s32.totalorder %s5206_s24, 2  ;;  %s3798_s25 = sand.u32 1, %s5194_s21  }
 0x7bf   : > { %s3799_s17 = scalar_lea.sflag [#allocation5], %s3798_s25 }
 0x7c0   : > { %p4958_p2 = pnand %p4961_p1, %p5320_p6 }
 0x7c2   : > { %5189 = dma.done.wait (!%p4958_p2), %s3799_s17, 16  }
 0x7c3   : > { %5191 = vsyncadd (!%p4958_p2), %s3799_s17, 4294967280  ;;  %p22_p3 = scmp.ge.s32.totalorder %s5303_s27, 4   ;;  %s6648_s21 = smov %s5198_s22 }
 0x7c4   : > { %s6649_s22 = smov %s5202_s23  ;;  %s6650_s23 = smov %s5314_s30 }
 0x7c5   : > { %s6651_s24 = smov %s5303_s27  ;;  %24 = sbr.rel (!%p22_p3) target bundleno = 5 (0x5), region = 131 }
 0x7cc   :  { %3803 = vsyncpa [#allocation5], 1 }
 0x7cd   :  { %3805 = vsyncpa [#allocation5 + $0x1], 1 }

</bundles_post_ra>
